<compile_context>
chip_gen: v5e
topology: v5e:2x2
jax: 0.10.0
libtpu: 0.0.40
codegen_flags: <defaults>
</compile_context>

<pallas_src>
import jax
import jax.numpy as jnp
from jax.experimental import pallas as pl
from jax.experimental.pallas import tpu as pltpu


def _round_up(x, m):
    return (x + m - 1) // m * m


def _embed_gather_kernel(ids_ref, table_ref, out_ref):
    """One grid step: gather `rows` rows of the stacked table via one-hot MXU matmul.

    ids_ref   : (rows, 1) int32  -- row indices into the stacked table (VMEM)
    table_ref : (Vpad, D)        -- stacked [word; pitch] embedding table (VMEM, grid-invariant)
    out_ref   : (rows, D)        -- gathered rows (one full-tile store)
    """
    rows = out_ref.shape[0]
    vocab = table_ref.shape[0]

    ids = ids_ref[...]                                              # (rows, 1)
    col = jax.lax.broadcasted_iota(jnp.int32, (rows, vocab), 1)     # (rows, Vpad)
    onehot = (col == ids).astype(table_ref.dtype)                   # exact 0/1 rows
    # MXU gather.  fp32 contraction keeps the selected f32 table rows exact.
    # Out-of-range ids simply produce an all-zero one-hot row (memory-safe).
    out_ref[...] = jnp.dot(
        onehot,
        table_ref[...],
        precision=jax.lax.Precision.HIGHEST,
        preferred_element_type=jnp.float32,
    ).astype(out_ref.dtype)


def encoder_forward(src_seq, mask, d_seq, p_seq, word_emb, pitch_emb,
                    *, rows_per_step=512):
    """Pallas equivalent of Encoder.forward.

    Returns (B, L, 2*d_word_vec) = cat([word_emb[src_seq], pitch_emb[p_seq]], -1).
    `mask` and `d_seq` are unused, exactly as in the PyTorch reference forward.
    """
    del mask, d_seq  # unused by the reference forward
    B, L = src_seq.shape
    Vw, D = word_emb.shape
    Vp, Dp = pitch_emb.shape
    assert D == Dp, "word / pitch embeddings must share d_word_vec"

    out_dtype = jnp.result_type(word_emb.dtype, pitch_emb.dtype)
    # nn.Embedding(..., padding_idx=0) initializes row 0 to zeros; enforce it
    # here so callers passing raw weights still match the module semantics.
    word_emb = word_emb.astype(out_dtype).at[0].set(0)
    pitch_emb = pitch_emb.astype(out_dtype).at[0].set(0)

    # Stack the tables so one gather yields the channel-concat layout for free.
    # Pad vocab to a multiple of 128 for clean MXU / lane tiling (zero rows).
    table = jnp.concatenate([word_emb, pitch_emb], axis=0)          # (Vw+Vp, D)
    v_tot = Vw + Vp
    v_pad = max(128, _round_up(v_tot, 128))
    table = jnp.pad(table, ((0, v_pad - v_tot), (0, 0)))            # (Vpad, D)

    # Interleaved row ids: [w(b0,l0), p(b0,l0), w(b0,l1), p(b0,l1), ...]
    ids = jnp.stack(
        [src_seq.astype(jnp.int32), p_seq.astype(jnp.int32) + Vw], axis=-1
    ).reshape(-1)                                                   # (2*B*L,)

    rows = 2 * B * L
    tr = min(rows_per_step, _round_up(rows, 8))      # rows per grid step (mult of 8)
    rows_pad = _round_up(rows, tr)
    # Padding rows index 0 (a zeroed padding row); they are sliced off below.
    ids = jnp.pad(ids, (0, rows_pad - rows)).reshape(rows_pad, 1)

    grid = (rows_pad // tr,)
    out_flat = pl.pallas_call(
        _embed_gather_kernel,
        out_shape=jax.ShapeDtypeStruct((rows_pad, D), out_dtype),
        grid_spec=pltpu.PrefetchScalarGridSpec(
            num_scalar_prefetch=0,
            grid=grid,
            in_specs=[
                # Per-step tile of row ids.
                pl.BlockSpec((tr, 1), lambda i: (i, 0)),
                # Full stacked table, grid-invariant (index_map constant).
                # TODO(perf): for very large vocabularies, single-buffer this
                # block (or keep it in pl.ANY and DMA-gather rows) to respect
                # v7x's 64 MiB VMEM / v5e's 16 MiB scoped default.
                pl.BlockSpec((v_pad, D), lambda i: (0, 0)),
            ],
            out_specs=pl.BlockSpec((tr, D), lambda i: (i, 0)),
        ),
        compiler_params=pltpu.CompilerParams(
            # Row tiles are independent -> shard grid across TCs on v7x.
            dimension_semantics=("parallel",),
        ),
    )(ids, table)

    # Rows are [word, pitch] interleaved per token, so a plain reshape yields
    # the torch.cat(..., dim=2) layout: out[b, l, :D]=word, out[b, l, D:]=pitch.
    return out_flat[:rows].reshape(B, L, 2 * D)


if __name__ == "__main__":
    # Small, module-consistent shapes.
    n_src_vocab = 32
    n_pitch_vocab = 1600          # fixed by the module: nn.Embedding(1600, d_word_vec, 0)
    d_word_vec = 32
    batch, max_len = 2, 8

    key = jax.random.PRNGKey(0)
    k_we, k_pe, k_s, k_p = jax.random.split(key, 4)

    word_emb = jax.random.normal(k_we, (n_src_vocab, d_word_vec), dtype=jnp.float32)
    pitch_emb = jax.random.normal(k_pe, (n_pitch_vocab, d_word_vec), dtype=jnp.float32)

    src_seq = jax.random.randint(k_s, (batch, max_len), 0, n_src_vocab, dtype=jnp.int32)
    p_seq = jax.random.randint(k_p, (batch, max_len), 0, n_pitch_vocab, dtype=jnp.int32)
    # Exercise padding_idx=0 rows.
    src_seq = src_seq.at[0, 0].set(0)
    p_seq = p_seq.at[1, -1].set(0)

    mask = jnp.zeros((batch, max_len), dtype=jnp.bool_)   # unused by forward
    d_seq = jnp.zeros((batch, max_len), dtype=jnp.int32)  # unused by forward

    out = encoder_forward(src_seq, mask, d_seq, p_seq, word_emb, pitch_emb)
    out = jax.block_until_ready(out)

    # Plain-JAX reference (padding row zeroed, as nn.Embedding(padding_idx=0) inits it).
    we = word_emb.at[0].set(0.0)
    pe = pitch_emb.at[0].set(0.0)
    ref = jnp.concatenate([we[src_seq], pe[p_seq]], axis=2)

    assert out.shape == (batch, max_len, 2 * d_word_vec)
    assert jnp.allclose(out, ref, atol=1e-5, rtol=1e-5), "mismatch vs reference embedding concat"

    print("KERNEL_OK")
</pallas_src>

<mosaic_0001>
module attributes {stable_mosaic.version = 11 : i64} {
  func.func @_embed_gather_kernel(%arg0: i32, %arg1: memref<32x1xi32, #tpu.memory_space<vmem>>, %arg2: memref<1664x32xf32, #tpu.memory_space<vmem>>, %arg3: memref<32x32xf32, #tpu.memory_space<vmem>>) attributes {dimension_semantics = [#tpu.dimension_semantics<parallel>], iteration_bounds = array<i64: 1>, scalar_prefetch = 0 : i64, scratch_operands = 0 : i64, tpu.core_type = #tpu.core_type<tc>, window_params = [{transform_indices = @transform_0, window_bounds = array<i64: 32, 1>}, {pipeline_mode = #tpu.pipeline_mode<synchronous>, transform_indices = @transform_1, window_bounds = array<i64: 1664, 32>}, {transform_indices = @transform_2, window_bounds = array<i64: 32, 32>}]} {
    %c0 = arith.constant 0 : index
    %c0_0 = arith.constant 0 : index
    %0 = vector.load %arg1[%c0, %c0_0] : memref<32x1xi32, #tpu.memory_space<vmem>>, vector<32x1xi32>
    %1 = tpu.iota {dimensions = array<i32: 1>} : vector<32x1664xi32>
    %2 = vector.broadcast %0 : vector<32x1xi32> to vector<32x1664xi32>
    %3 = arith.cmpi eq, %1, %2 : vector<32x1664xi32>
    %4 = arith.extui %3 : vector<32x1664xi1> to vector<32x1664xi32>
    %5 = arith.sitofp %4 : vector<32x1664xi32> to vector<32x1664xf32>
    %c0_1 = arith.constant 0 : index
    %c0_2 = arith.constant 0 : index
    %6 = vector.load %arg2[%c0_1, %c0_2] : memref<1664x32xf32, #tpu.memory_space<vmem>>, vector<1664x32xf32>
    %cst = arith.constant dense<0.000000e+00> : vector<32x32xf32>
    %7 = tpu.matmul %5, %6, %cst {dimension_numbers = #tpu.dot_dimension_numbers<[1], [0], [0], [1], [0, 0, 1, 1], [], []>, precision = #tpu.contract_precision<fp32>} : vector<32x1664xf32>, vector<1664x32xf32>, vector<32x32xf32> -> vector<32x32xf32>
    %c0_3 = arith.constant 0 : index
    %c0_4 = arith.constant 0 : index
    %8 = vector.load %arg3[%c0_3, %c0_4] : memref<32x32xf32, #tpu.memory_space<vmem>>, vector<32x32xf32>
    tpu.vector_store %arg3[%c0_3, %c0_4], %7 {strides = array<i32>} : memref<32x32xf32, #tpu.memory_space<vmem>>, vector<32x32xf32>,
    return
  }
  func.func @transform_0(%arg0: i32) -> (i32, i32) {
    %c0_i32 = arith.constant 0 : i32
    %c0_i32_0 = arith.constant 0 : i32
    return %arg0, %c0_i32 : i32, i32
  }
  func.func @transform_1(%arg0: i32) -> (i32, i32) {
    %c0_i32 = arith.constant 0 : i32
    %c0_i32_0 = arith.constant 0 : i32
    %c0_i32_1 = arith.constant 0 : i32
    return %c0_i32, %c0_i32_0 : i32, i32
  }
  func.func @transform_2(%arg0: i32) -> (i32, i32) {
    %c0_i32 = arith.constant 0 : i32
    %c0_i32_0 = arith.constant 0 : i32
    return %arg0, %c0_i32 : i32, i32
  }
}

</mosaic_0001>

<bundles_post_ra>
// kernel: tpu_custom_call.1
= control target key start
LH: loop header
LB: loop body
LE: loop exit
PB: predicated region body
PF: predicated region fallthrough
CT: control target
= control target key end

     0   :  { %v6345_v2 = vmov 0   ;;  %s12053_s0 = inlined_call_operand.vmem [shape: s32[32,1], index: 0, kind: input, shape index: {}]   ;;  %s12054_s1 = inlined_call_operand.vmem [shape: f32[1664,32], index: 1, kind: input, shape index: {}]   ;;  %s12055_s2 = inlined_call_operand.hbm [shape: f32[32,32], index: 2, kind: output, shape index: {}]  }
   0x1   :  { %v12_v0 = vld [vmem:[%s12053_s0] sm:$0xff]  ;;  %v14_v1 = vld [vmem:[%s12053_s0 + $0x10] sm:$0xff]  ;;  %6317 = vset.pattern.permute.xlu0 %v6345_v2  ;;  %6318 = vset.pattern.permute.xlu1 %v6345_v2  ;;  %v213_v3 = vld [vmem:[%s12054_s1 + $0x78] sm:$0xff] }
   0x2   :  { %v212_v4 = vld [vmem:[%s12054_s1 + $0x70] sm:$0xff]  ;;  %31 = vperm.xlu0 %6317, %v12_v0   ;;  %37 = vperm.xlu1 %6318, %v14_v1   ;;  %v6378_v5 = vand.u32 4294901760, %v213_v3  ;;  %v211_v7 = vld [vmem:[%s12054_s1 + $0x68] sm:$0xff]  ;;  %v210_v8 = vld [vmem:[%s12054_s1 + $0x60] sm:$0xff] }
   0x3   :  { %v6380_v6 = vand.u32 4294901760, %v212_v4  ;;  %v209_v9 = vld [vmem:[%s12054_s1 + $0x58] sm:$0xff]  ;;  %v6391_v10 = vand.u32 4294901760, %v211_v7  ;;  %v6393_v11 = vand.u32 4294901760, %v210_v8  ;;  %v208_v13 = vld [vmem:[%s12054_s1 + $0x50] sm:$0xff]  ;;  %v207_v14 = vld [vmem:[%s12054_s1 + $0x48] sm:$0xff] }
   0x4   :  { %v6395_v12 = vand.u32 4294901760, %v209_v9  ;;  %v206_v15 = vld [vmem:[%s12054_s1 + $0x40] sm:$0xff]  ;;  %v6407_v16 = vsub.f32 %v213_v3, %v6378_v5  ;;  %654 = vmatpush.msra.mxu3 %v6378_v5  ;;  %407 = vmatpush.msra.mxu0 %v6378_v5  ;;  %v6414_v18 = vand.u32 4294901760, %v208_v13  ;;  %v6416_v19 = vand.u32 4294901760, %v207_v14 }
   0x5   :  { %v6410_v17 = vsub.f32 %v212_v4, %v6380_v6  ;;  %v6419_v20 = vsub.f32 %v211_v7, %v6391_v10  ;;  %v6422_v21 = vsub.f32 %v210_v8, %v6393_v11  ;;  %v6427_v23 = vand.u32 4294901760, %v206_v15 }
   0x6   :  { %v6425_v22 = vsub.f32 %v209_v9, %v6395_v12  ;;  %v473_v24 = vand.u32 4294901760, %v6407_v16  ;;  %586 = vmatpush.msra.mxu2 %v6407_v16  ;;  %656 = vmatpush.msra.mxu3 %v6380_v6  ;;  %v6434_v26 = vsub.f32 %v208_v13, %v6414_v18 }
   0x7   :  { %v479_v25 = vand.u32 4294901760, %v6410_v17 }
   0x8   :  { %7 = vsyncpa [#allocation3], 0  ;;  %v13_v27 = vld [vmem:[%s12053_s0 + $0x8] sm:$0xff]  ;;  %v15_v28 = vld [vmem:[%s12053_s0 + $0x18] sm:$0xff]  ;;  %v485_v29 = vand.u32 4294901760, %v6419_v20  ;;  %v491_v30 = vand.u32 4294901760, %v6422_v21  ;;  %409 = vmatpush.msra.mxu0 %v6380_v6  ;;  %v6446_v31 = vsub.f32 %v207_v14, %v6416_v19  ;;  %v474_v32 = vsub.f32 %v6407_v16, %v473_v24  ;;  %589 = vmatpush.msra.mxu2 %v6410_v17 }
   0x9   :  { %v480_v33 = vsub.f32 %v6410_v17, %v479_v25  ;;  %v497_v34 = vand.u32 4294901760, %v6425_v22  ;;  %658 = vmatpush.msra.mxu3 %v6391_v10  ;;  %v503_v36 = vand.u32 4294901760, %v6434_v26  ;;  %v6463_v37 = vsub.f32 %v206_v15, %v6427_v23  ;;  %v205_v38 = vld [vmem:[%s12054_s1 + $0x38] sm:$0xff]  ;;  %v204_v39 = vld [vmem:[%s12054_s1 + $0x30] sm:$0xff]  ;;  %v203_v43 = vld [vmem:[%s12054_s1 + $0x28] sm:$0xff]  ;;  %s6059_s30 = sshll.u32 %s12055_s2, 4  ;;  %s6060_s30 = int_to_ptr.hbm [resolvable:$true] %s6059_s30 }
   0xa   :  { %v486_v35 = vsub.f32 %v6419_v20, %v485_v29  ;;  %411 = vmatpush.msra.mxu0 %v6391_v10  ;;  %34 = vperm.xlu0 %6317, %v13_v27   ;;  %v475_v40 = vand.u32 4294901760, %v474_v32  ;;  %v492_v42 = vsub.f32 %v6422_v21, %v491_v30  ;;  %v509_v44 = vand.u32 4294901760, %v6446_v31  ;;  %v202_v45 = vld [vmem:[%s12054_s1 + $0x20] sm:$0xff]  ;;  %v201_v53 = vld [vmem:[%s12054_s1 + $0x18] sm:$0xff]  ;;  %v200_v59 = vld [vmem:[%s12054_s1 + $0x10] sm:$0xff]  ;;  %s6349_s3 = smov 128  }
   0xb   :  { %40 = vperm.xlu1 %6318, %v15_v28   ;;  %v481_v41 = vand.u32 4294901760, %v480_v33  ;;  %592 = vmatpush.msra.mxu2 %v6419_v20  ;;  %v498_v47 = vsub.f32 %v6425_v22, %v497_v34  ;;  %v6487_v48 = vand.u32 4294901760, %v205_v38  ;;  %v6489_v49 = vand.u32 4294901760, %v204_v39  ;;  %v199_v1 = vld [vmem:[%s12054_s1 + $0x8] sm:$0xff]  ;;  %s6350_s4 = smov 8  }
   0xc   :  { %660 = vmatpush.msra.mxu3 %v6393_v11  ;;  %476 = vmatpush.msra.mxu1 %v475_v40  ;;  %v487_v46 = vand.u32 4294901760, %v486_v35  ;;  %v504_v50 = vsub.f32 %v6434_v26, %v503_v36  ;;  %v515_v51 = vand.u32 4294901760, %v6463_v37  ;;  %v6497_v52 = vand.u32 4294901760, %v203_v43  ;;  %v227_v20 = vld [vmem:[%s12054_s1 + $0xe8] sm:$0xff] }
   0xd   :  { %413 = vmatpush.msra.mxu0 %v6393_v11  ;;  %595 = vmatpush.msra.mxu2 %v6422_v21  ;;  %v493_v54 = vand.u32 4294901760, %v492_v42  ;;  %v6503_v55 = vsub.f32 %v205_v38, %v6487_v48  ;;  %v6507_v56 = vsub.f32 %v204_v39, %v6489_v49  ;;  %v6509_v57 = vand.u32 4294901760, %v202_v45  ;;  %v226_v21 = vld [vmem:[%s12054_s1 + $0xe0] sm:$0xff] }
   0xe   :  { %662 = vmatpush.msra.mxu3 %v6395_v12  ;;  %482 = vmatpush.msra.mxu1 %v481_v41  ;;  %v510_v58 = vsub.f32 %v6446_v31, %v509_v44  ;;  %v499_v60 = vand.u32 4294901760, %v498_v47  ;;  %v6522_v62 = vsub.f32 %v203_v43, %v6497_v52  ;;  %v6524_v63 = vand.u32 4294901760, %v201_v53 }
   0xf   :  { %415 = vmatpush.msra.mxu0 %v6395_v12  ;;  %598 = vmatpush.msra.mxu2 %v6425_v22  ;;  %v521_v61 = vand.u32 4294901760, %v6503_v55  ;;  %v516_v0 = vsub.f32 %v6463_v37, %v515_v51  ;;  %v505_v2 = vand.u32 4294901760, %v504_v50  ;;  %v527_v3 = vand.u32 4294901760, %v6507_v56  ;;  %v225_v22 = vld [vmem:[%s12054_s1 + $0xd8] sm:$0xff] }
  0x10   :  { %664 = vmatpush.msra.mxu3 %v6414_v18  ;;  %488 = vmatpush.msra.mxu1 %v487_v46  ;;  %v6537_v4 = vsub.f32 %v202_v45, %v6509_v57  ;;  %v6539_v7 = vand.u32 4294901760, %v200_v59  ;;  %v511_v8 = vand.u32 4294901760, %v510_v58  ;;  %v533_v13 = vand.u32 4294901760, %v6522_v62 }
  0x11   :  { %417 = vmatpush.msra.mxu0 %v6414_v18  ;;  %601 = vmatpush.msra.mxu2 %v6434_v26  ;;  %v522_v9 = vsub.f32 %v6503_v55, %v521_v61  ;;  %v6549_v14 = vsub.f32 %v201_v53, %v6524_v63  ;;  %v6551_v15 = vand.u32 4294901760, %v199_v1  ;;  %v517_v27 = vand.u32 4294901760, %v516_v0  ;;  %v198_v0 = vld [vmem:[%s12054_s1] sm:$0xff]  ;;  %v224_v26 = vld [vmem:[%s12054_s1 + $0xd0] sm:$0xff] }
  0x12   :  { %666 = vmatpush.msra.mxu3 %v6416_v19  ;;  %494 = vmatpush.msra.mxu1 %v493_v54  ;;  %v528_v28 = vsub.f32 %v6507_v56, %v527_v3  ;;  %v539_v32 = vand.u32 4294901760, %v6537_v4  ;;  %v6561_v33 = vsub.f32 %v200_v59, %v6539_v7  ;;  %v534_v38 = vsub.f32 %v6522_v62, %v533_v13 }
  0x13   :  { %419 = vmatpush.msra.mxu0 %v6416_v19  ;;  %604 = vmatpush.msra.mxu2 %v6446_v31  ;;  %v523_v35 = vand.u32 4294901760, %v522_v9  ;;  %v545_v39 = vand.u32 4294901760, %v6549_v14  ;;  %v6571_v40 = vsub.f32 %v199_v1, %v6551_v15  ;;  %v6606_v1 = vand.u32 4294901760, %v198_v0  ;;  %v223_v31 = vld [vmem:[%s12054_s1 + $0xc8] sm:$0xff] }
  0x14   :  { %668 = vmatpush.msra.mxu3 %v6427_v23  ;;  %500 = vmatpush.msra.mxu1 %v499_v60  ;;  %v529_v41 = vand.u32 4294901760, %v528_v28  ;;  %v540_v42 = vsub.f32 %v6537_v4, %v539_v32  ;;  %v551_v43 = vand.u32 4294901760, %v6561_v33  ;;  %v535_v45 = vand.u32 4294901760, %v534_v38 }
  0x15   :  { %421 = vmatpush.msra.mxu0 %v6427_v23  ;;  %607 = vmatpush.msra.mxu2 %v6463_v37  ;;  %v546_v46 = vsub.f32 %v6549_v14, %v545_v39  ;;  %v557_v47 = vand.u32 4294901760, %v6571_v40  ;;  %v222_v37 = vld [vmem:[%s12054_s1 + $0xc0] sm:$0xff] }
  0x16   :  { %670 = vmatpush.msra.mxu3 %v6487_v48  ;;  %506 = vmatpush.msra.mxu1 %v505_v2  ;;  %v541_v50 = vand.u32 4294901760, %v540_v42  ;;  %v552_v53 = vsub.f32 %v6561_v33, %v551_v43  ;;  %v6609_v2 = vsub.f32 %v198_v0, %v6606_v1 }
  0x17   :  { %423 = vmatpush.msra.mxu0 %v6487_v48  ;;  %610 = vmatpush.msra.mxu2 %v6503_v55  ;;  %v547_v54 = vand.u32 4294901760, %v546_v46  ;;  %v558_v58 = vsub.f32 %v6571_v40, %v557_v47  ;;  %v6678_v46 = vand.u32 4294901760, %v225_v22  ;;  %v221_v55 = vld [vmem:[%s12054_s1 + $0xb8] sm:$0xff] }
  0x18   :  { %672 = vmatpush.msra.mxu3 %v6489_v49  ;;  %512 = vmatpush.msra.mxu1 %v511_v8  ;;  %v553_v59 = vand.u32 4294901760, %v552_v53  ;;  %v563_v8 = vand.u32 4294901760, %v6609_v2  ;;  %v6692_v53 = vand.u32 4294901760, %v224_v26 }
  0x19   :  { %425 = vmatpush.msra.mxu0 %v6489_v49  ;;  %613 = vmatpush.msra.mxu2 %v6507_v56  ;;  %v559_v60 = vand.u32 4294901760, %v558_v58  ;;  %v220_v56 = vld [vmem:[%s12054_s1 + $0xb0] sm:$0xff] }
  0x1a   :  { %674 = vmatpush.msra.mxu3 %v6497_v52  ;;  %518 = vmatpush.msra.mxu1 %v517_v27  ;;  %v564_v9 = vsub.f32 %v6609_v2, %v563_v8  ;;  %v229_v27 = vld [vmem:[%s12054_s1 + $0xf8] sm:$0xff] }
  0x1b   :  { %427 = vmatpush.msra.mxu0 %v6497_v52  ;;  %616 = vmatpush.msra.mxu2 %v6522_v62  ;;  %v6625_v28 = vand.u32 4294901760, %v229_v27 }
  0x1c   :  { %676 = vmatpush.msra.mxu3 %v6509_v57  ;;  %524 = vmatpush.msra.mxu1 %v523_v35  ;;  %v565_v16 = vand.u32 4294901760, %v564_v9  ;;  %v6646_v35 = vand.u32 4294901760, %v227_v20  ;;  %v6725_v9 = vand.u32 4294901760, %v222_v37 }
  0x1d   :  { %429 = vmatpush.msra.mxu0 %v6509_v57  ;;  %619 = vmatpush.msra.mxu2 %v6537_v4 }
  0x1e   :  { %678 = vmatpush.msra.mxu3 %v6524_v63  ;;  %530 = vmatpush.msra.mxu1 %v529_v41  ;;  %v6662_v41 = vand.u32 4294901760, %v226_v21  ;;  %v6665_v42 = vsub.f32 %v227_v20, %v6646_v35  ;;  %v6741_v20 = vand.u32 4294901760, %v221_v55 }
  0x1f   :  { %431 = vmatpush.msra.mxu0 %v6524_v63  ;;  %622 = vmatpush.msra.mxu2 %v6549_v14 }
  0x20   :  { %680 = vmatpush.msra.mxu3 %v6539_v7  ;;  %536 = vmatpush.msra.mxu1 %v535_v45  ;;  %v919_v45 = vand.u32 4294901760, %v6665_v42 }
  0x21   :  { %433 = vmatpush.msra.mxu0 %v6539_v7  ;;  %625 = vmatpush.msra.mxu2 %v6561_v33 }
  0x22   :  { %682 = vmatpush.msra.mxu3 %v6551_v15  ;;  %542 = vmatpush.msra.mxu1 %v541_v50  ;;  %v6681_v50 = vsub.f32 %v226_v21, %v6662_v41  ;;  %v6745_v21 = vsub.f32 %v222_v37, %v6725_v9 }
  0x23   :  { %435 = vmatpush.msra.mxu0 %v6551_v15  ;;  %628 = vmatpush.msra.mxu2 %v6571_v40  ;;  %v16_v40 = vlaneseq }
  0x24   :  { %548 = vmatpush.msra.mxu1 %v547_v54  ;;  %684 = vmatpush.msra.mxu3 %v6606_v1  ;;  %v6695_v54 = vsub.f32 %v225_v22, %v6678_v46  ;;  %v925_v58 = vand.u32 4294901760, %v6681_v50  ;;  %v6757_v22 = vsub.f32 %v221_v55, %v6741_v20 }
  0x25   :  { %437 = vmatpush.msra.mxu0 %v6606_v1  ;;  %631 = vmatpush.msra.mxu2 %v6609_v2 }
  0x26   :  { %554 = vmatpush.msra.mxu1 %v553_v59  ;;  %v6706_v59 = vand.u32 4294901760, %v223_v31  ;;  %v926_v0 = vsub.f32 %v6681_v50, %v925_v58 }
  0x27   :  { %713 = vmatpush.msrb.mxu0 %v473_v24  ;;  %v228_v24 = vld [vmem:[%s12054_s1 + $0xf0] sm:$0xff]  ;;  %841 = vmatpush.msrb.mxu2 %v6625_v28 }
  0x28   :  { %560 = vmatpush.msra.mxu1 %v559_v60  ;;  %v6633_v17 = vand.u32 4294901760, %v228_v24  ;;  %v6709_v60 = vsub.f32 %v224_v26, %v6692_v53  ;;  %v955_v26 = vand.u32 4294901760, %v6757_v22 }
  0x29   :  { %717 = vmatpush.msrb.mxu0 %v479_v25  ;;  %v6636_v25 = vsub.f32 %v229_v27, %v6625_v28  ;;  %v6728_v27 = vsub.f32 %v223_v31, %v6706_v59 }
  0x2a   :  { %566 = vmatpush.msra.mxu1 %v565_v16  ;;  %843 = vmatpush.msrb.mxu2 %v6633_v17  ;;  %v6649_v38 = vsub.f32 %v228_v24, %v6633_v17  ;;  %v927_v16 = vand.u32 4294901760, %v926_v0 }
  0x2b   :  { %721 = vmatpush.msrb.mxu0 %v485_v29  ;;  %v907_v29 = vand.u32 4294901760, %v6636_v25  ;;  %v943_v24 = vand.u32 4294901760, %v6728_v27 }
  0x2c   :  { %792 = vmatpush.msrb.mxu1 %v6378_v5  ;;  %845 = vmatpush.msrb.mxu2 %v6646_v35 }
  0x2d   :  { %725 = vmatpush.msrb.mxu0 %v491_v30  ;;  %v908_v5 = vsub.f32 %v6636_v25, %v907_v29  ;;  %v913_v30 = vand.u32 4294901760, %v6649_v38 }
  0x2e   :  { %794 = vmatpush.msrb.mxu1 %v6380_v6  ;;  %847 = vmatpush.msrb.mxu2 %v6662_v41 }
  0x2f   :  { %729 = vmatpush.msrb.mxu0 %v497_v34  ;;  %v909_v6 = vand.u32 4294901760, %v908_v5  ;;  %v914_v34 = vsub.f32 %v6649_v38, %v913_v30  ;;  %v6754_v5 = vand.u32 4294901760, %v220_v56 }
  0x30   :  { %796 = vmatpush.msrb.mxu1 %v6391_v10  ;;  %849 = vmatpush.msrb.mxu2 %v6678_v46 }
  0x31   :  { %733 = vmatpush.msrb.mxu0 %v503_v36  ;;  %910 = vmatpush.msrb.mxu3 %v909_v6  ;;  %v915_v10 = vand.u32 4294901760, %v914_v34  ;;  %v920_v36 = vsub.f32 %v6665_v42, %v919_v45  ;;  %v949_v6 = vand.u32 4294901760, %v6745_v21 }
  0x32   :  { %798 = vmatpush.msrb.mxu1 %v6393_v11  ;;  %851 = vmatpush.msrb.mxu2 %v6692_v53 }
  0x33   :  { %737 = vmatpush.msrb.mxu0 %v509_v44  ;;  %916 = vmatpush.msrb.mxu3 %v915_v10  ;;  %v921_v11 = vand.u32 4294901760, %v920_v36  ;;  %v931_v44 = vand.u32 4294901760, %v6695_v54  ;;  %v6771_v36 = vsub.f32 %v220_v56, %v6754_v5  ;;  %v950_v62 = vsub.f32 %v6745_v21, %v949_v6 }
  0x34   :  { %800 = vmatpush.msrb.mxu1 %v6395_v12  ;;  %853 = vmatpush.msrb.mxu2 %v6706_v59 }
  0x35   :  { %741 = vmatpush.msrb.mxu0 %v515_v51  ;;  %922 = vmatpush.msrb.mxu3 %v921_v11  ;;  %v932_v12 = vsub.f32 %v6695_v54, %v931_v44  ;;  %v937_v51 = vand.u32 4294901760, %v6709_v60  ;;  %v961_v4 = vand.u32 4294901760, %v6771_v36  ;;  %v951_v11 = vand.u32 4294901760, %v950_v62 }
  0x36   :  { %802 = vmatpush.msrb.mxu1 %v6414_v18  ;;  %855 = vmatpush.msrb.mxu2 %v6725_v9 }
  0x37   :  { %745 = vmatpush.msrb.mxu0 %v521_v61  ;;  %v933_v18 = vand.u32 4294901760, %v932_v12  ;;  %v938_v61 = vsub.f32 %v6709_v60, %v937_v51  ;;  %928 = vmatpush.msrb.mxu3 %v927_v16  ;;  %v962_v37 = vsub.f32 %v6771_v36, %v961_v4 }
  0x38   :  { %804 = vmatpush.msrb.mxu1 %v6416_v19  ;;  %857 = vmatpush.msrb.mxu2 %v6741_v20 }
  0x39   :  { %749 = vmatpush.msrb.mxu0 %v527_v3  ;;  %v939_v19 = vand.u32 4294901760, %v938_v61  ;;  %v944_v3 = vsub.f32 %v6728_v27, %v943_v24  ;;  %934 = vmatpush.msrb.mxu3 %v933_v18 }
  0x3a   :  { %806 = vmatpush.msrb.mxu1 %v6427_v23  ;;  %v219_v23 = vld [vmem:[%s12054_s1 + $0xa8] sm:$0xff]  ;;  %859 = vmatpush.msrb.mxu2 %v6754_v5 }
  0x3b   :  { %753 = vmatpush.msrb.mxu0 %v533_v13  ;;  %v945_v34 = vand.u32 4294901760, %v944_v3  ;;  %v6768_v10 = vand.u32 4294901760, %v219_v23  ;;  %940 = vmatpush.msrb.mxu3 %v939_v19  ;;  %v956_v13 = vsub.f32 %v6757_v22, %v955_v26 }
  0x3c   :  { %808 = vmatpush.msrb.mxu1 %v6487_v48  ;;  %v218_v48 = vld [vmem:[%s12054_s1 + $0xa0] sm:$0xff] }
  0x3d   :  { %757 = vmatpush.msrb.mxu0 %v539_v32  ;;  %v6787_v32 = vand.u32 4294901760, %v218_v48  ;;  %v6790_v31 = vsub.f32 %v219_v23, %v6768_v10  ;;  %946 = vmatpush.msrb.mxu3 %v945_v34  ;;  %v957_v0 = vand.u32 4294901760, %v956_v13 }
  0x3e   :  { %810 = vmatpush.msrb.mxu1 %v6489_v49  ;;  %861 = vmatpush.msrb.mxu2 %v6768_v10  ;;  %v217_v49 = vld [vmem:[%s12054_s1 + $0x98] sm:$0xff] }
  0x3f   :  { %761 = vmatpush.msrb.mxu0 %v545_v39  ;;  %v967_v12 = vand.u32 4294901760, %v6790_v31  ;;  %v6803_v16 = vand.u32 4294901760, %v217_v49  ;;  %952 = vmatpush.msrb.mxu3 %v951_v11  ;;  %v6809_v14 = vsub.f32 %v218_v48, %v6787_v32  ;;  %v963_v39 = vand.u32 4294901760, %v962_v37 }
  0x40   :  { %812 = vmatpush.msrb.mxu1 %v6497_v52  ;;  %863 = vmatpush.msrb.mxu2 %v6787_v32  ;;  %v216_v52 = vld [vmem:[%s12054_s1 + $0x90] sm:$0xff]  ;;  %v6862_v11 = vand.u32 127, %v16_v40 }
  0x41   :  { %765 = vmatpush.msrb.mxu0 %v551_v43  ;;  %v968_v55 = vsub.f32 %v6790_v31, %v967_v12  ;;  %v6818_v18 = vand.u32 4294901760, %v216_v52  ;;  %v6821_v33 = vsub.f32 %v217_v49, %v6803_v16  ;;  %958 = vmatpush.msrb.mxu3 %v957_v0  ;;  %v973_v43 = vand.u32 4294901760, %v6809_v14 }
  0x42   :  { %814 = vmatpush.msrb.mxu1 %v6509_v57  ;;  %865 = vmatpush.msrb.mxu2 %v6803_v16  ;;  %v215_v57 = vld [vmem:[%s12054_s1 + $0x88] sm:$0xff]  ;;  %12227 = vst [vmem:[#allocation5_spill] sm:$0xff] %v6862_v11 }
  0x43   :  { %769 = vmatpush.msrb.mxu0 %v557_v47  ;;  %v969_v61 = vand.u32 4294901760, %v968_v55  ;;  %v979_v56 = vand.u32 4294901760, %v6821_v33  ;;  %v6832_v19 = vand.u32 4294901760, %v215_v57  ;;  %v6835_v3 = vsub.f32 %v216_v52, %v6818_v18  ;;  %964 = vmatpush.msrb.mxu3 %v963_v39 }
  0x44   :  { %816 = vmatpush.msrb.mxu1 %v6524_v63  ;;  %v974_v47 = vsub.f32 %v6809_v14, %v973_v43  ;;  %867 = vmatpush.msrb.mxu2 %v6818_v18  ;;  %v214_v63 = vld [vmem:[%s12054_s1 + $0x80] sm:$0xff]  ;;  %v12077_v39 = vmov 1.0   ;;  %v12073_v55 = vmov 0.0  }
  0x45   :  { %773 = vmatpush.msrb.mxu0 %v563_v8  ;;  %v980_v23 = vsub.f32 %v6821_v33, %v979_v56  ;;  %v985_v2 = vand.u32 4294901760, %v6835_v3  ;;  %v6851_v8 = vand.u32 4294901760, %v214_v63  ;;  %v6854_v34 = vsub.f32 %v215_v57, %v6832_v19  ;;  %970 = vmatpush.msrb.mxu3 %v969_v61 }
  0x46   :  { %818 = vmatpush.msrb.mxu1 %v6539_v7  ;;  %v975_v62 = vand.u32 4294901760, %v974_v47  ;;  %869 = vmatpush.msrb.mxu2 %v6832_v19 }
  0x47   :  { %v981_v48 = vand.u32 4294901760, %v980_v23  ;;  %v986_v7 = vsub.f32 %v6835_v3, %v985_v2  ;;  %v991_v13 = vand.u32 4294901760, %v6854_v34  ;;  %v6866_v49 = vsub.f32 %v214_v63, %v6851_v8 }
  0x48   :  { %820 = vmatpush.msrb.mxu1 %v6551_v15  ;;  %976 = vmatpush.msrb.mxu3 %v975_v62 }
  0x49   :  { %871 = vmatpush.msrb.mxu2 %v6851_v8  ;;  %v987_v15 = vand.u32 4294901760, %v986_v7  ;;  %v992_v37 = vsub.f32 %v6854_v34, %v991_v13  ;;  %v997_v52 = vand.u32 4294901760, %v6866_v49 }
  0x4a   :  { %822 = vmatpush.msrb.mxu1 %v6606_v1  ;;  %982 = vmatpush.msrb.mxu3 %v981_v48 }
  0x4b   :  { %v993_v61 = vand.u32 4294901760, %v992_v37  ;;  %v998_v47 = vsub.f32 %v6866_v49, %v997_v52 }
  0x4c   :  { %988 = vmatpush.msrb.mxu3 %v987_v15 }
  0x4d   :  { %v999_v23 = vand.u32 4294901760, %v998_v47  ;;  %v242_v47 = vld [vmem:[%s12054_s1 + $0x160] sm:$0xff] }
  0x4e   :  { %994 = vmatpush.msrb.mxu3 %v993_v61  ;;  %v6923_v61 = vadd.s32 128, %v6862_v11 }
  0x50   :  { %1000 = vmatpush.msrb.mxu3 %v999_v23 }
  0x74   :  { %v6868_v0 = vpop.permute.xlu0 %31  ;;  %v6885_v57 = vpop.permute.xlu1 %37 }
  0x75   :  { %vm42_vm0 = vcmp.eq.s32.totalorder %v6862_v11, %v6868_v0  ;;  %vm68_vm1 = vcmp.eq.s32.totalorder %v6862_v11, %v6885_v57  ;;  %vm43_vm4 = vcmp.eq.s32.totalorder %v6923_v61, %v6868_v0  ;;  %vm69_vm6 = vcmp.eq.s32.totalorder %v6923_v61, %v6885_v57 }
  0x76   :  { %6123 = vmatmul.msk.f32.vlgmr.msra.gmra.mxu1 %vm42_vm0, %v12077_v39  ;;  %v6071_v1 = vsel %vm42_vm0, 1.0, %v12073_v55  ;;  %v6097_v15 = vsel %vm68_vm1, 1.0, %v12073_v55 }
  0x77   :  { %v439_v40 = vsub.f32 %v6071_v1, %v6071_v1  ;;  %1088 = vmatpush.msra.mxu1 %v6625_v28  ;;  %v455_v1 = vsub.f32 %v6097_v15, %v6097_v15 }
  0x79   :  { %634 = vmatmul.f32.vlgmr.msra.gmra.mxu2 %v439_v40  ;;  %v440_v63 = vand.u32 4294901760, %v439_v40  ;;  %1090 = vmatpush.msra.mxu1 %v6633_v17 }
  0x7a   :  { %1147 = vmatpush.msra.mxu2 %v907_v29 }
  0x7b   :  { %688 = vmatmul.f32.vlgmr.msra.gmra.mxu3 %v440_v63  ;;  %v441_v62 = vsub.f32 %v439_v40, %v440_v63  ;;  %1092 = vmatpush.msra.mxu1 %v6646_v35  ;;  %v241_v63 = vld [vmem:[%s12054_s1 + $0x158] sm:$0xff] }
  0x7c   :  { %v6896_v48 = vpop.permute.xlu0 %34  ;;  %1151 = vmatpush.msra.mxu2 %v913_v30  ;;  %1226 = vmatpush.msra.mxu3 %v6625_v28 }
  0x7d   :  { %vm55_vm2 = vcmp.eq.s32.totalorder %v6862_v11, %v6896_v48  ;;  %v442_v7 = vand.u32 4294901760, %v441_v62  ;;  %1094 = vmatpush.msra.mxu1 %v6662_v41  ;;  %v6917_v28 = vpop.permute.xlu1 %40  ;;  %vm56_vm5 = vcmp.eq.s32.totalorder %v6923_v61, %v6896_v48 }
  0x7e   :  { %6124 = vmatmul.msk.f32.gmra.mxu1 %vm55_vm2, %v12077_v39  ;;  %v6084_v29 = vsel %vm55_vm2, 1.0, %v12073_v55  ;;  %1155 = vmatpush.msra.mxu2 %v919_v45  ;;  %vm81_vm3 = vcmp.eq.s32.totalorder %v6862_v11, %v6917_v28  ;;  %v456_v45 = vand.u32 4294901760, %v455_v1  ;;  %vm82_vm7 = vcmp.eq.s32.totalorder %v6923_v61, %v6917_v28 }
  0x7f   :  { %443 = vmatmul.f32.vlgmr.msra.gmra.mxu0 %v442_v7  ;;  %v447_v37 = vsub.f32 %v6084_v29, %v6084_v29  ;;  %1228 = vmatpush.msra.mxu3 %v6633_v17  ;;  %v7048_v29 = vand.u32 4294901760, %v241_v63 }
  0x80   :  { %1020 = vmatpush.msra.mxu0 %v6636_v25  ;;  %1096 = vmatpush.msra.mxu1 %v6678_v46  ;;  %v6110_v25 = vsel %vm81_vm3, 1.0, %v12073_v55 }
  0x81   :  { %639 = vmatmul.f32.gmra.mxu2 %v447_v37  ;;  %v448_v30 = vand.u32 4294901760, %v447_v37  ;;  %1230 = vmatpush.msra.mxu3 %v6646_v35  ;;  %v6072_v35 = vsel %vm43_vm4, 1.0, %v12073_v55 }
  0x82   :  { %1159 = vmatpush.msra.mxu2 %v925_v58  ;;  %1023 = vmatpush.msra.mxu0 %v6649_v38  ;;  %v457_v38 = vsub.f32 %v455_v1, %v456_v45 }
  0x83   :  { %694 = vmatmul.f32.gmra.mxu3 %v448_v30  ;;  %v449_v40 = vsub.f32 %v447_v37, %v448_v30  ;;  %1098 = vmatpush.msra.mxu1 %v6692_v53 }
  0x84   :  { %1163 = vmatpush.msra.mxu2 %v931_v44  ;;  %1026 = vmatpush.msra.mxu0 %v6665_v42  ;;  %v463_v42 = vsub.f32 %v6110_v25, %v6110_v25  ;;  %v244_v44 = vld [vmem:[%s12054_s1 + $0x170] sm:$0xff] }
  0x85   :  { %v450_v17 = vand.u32 4294901760, %v449_v40  ;;  %1232 = vmatpush.msra.mxu3 %v6662_v41  ;;  %1100 = vmatpush.msra.mxu1 %v6706_v59  ;;  %v6960_v41 = vsub.f32 %v6072_v35, %v6072_v35  ;;  %v7083_v40 = vsub.f32 %v241_v63, %v7048_v29 }
  0x86   :  { %6125 = vmatmul.msk.f32.gmra.mxu1 %vm68_vm1, %v12077_v39  ;;  %1167 = vmatpush.msra.mxu2 %v937_v51  ;;  %v464_v58 = vand.u32 4294901760, %v463_v42  ;;  %v6993_v51 = vand.u32 4294901760, %v244_v44 }
  0x87   :  { %451 = vmatmul.f32.gmra.mxu0 %v450_v17  ;;  %1234 = vmatpush.msra.mxu3 %v6678_v46  ;;  %v458_v46 = vand.u32 4294901760, %v457_v38 }
  0x88   :  { %1029 = vmatpush.msra.mxu0 %v6681_v50  ;;  %1102 = vmatpush.msra.mxu1 %v6725_v9  ;;  %v245_v50 = vld [vmem:[%s12054_s1 + $0x178] sm:$0xff] }
  0x89   :  { %644 = vmatmul.f32.gmra.mxu2 %v455_v1  ;;  %1236 = vmatpush.msra.mxu3 %v6692_v53  ;;  %v874_v53 = vand.u32 4294901760, %v6960_v41  ;;  %v239_v1 = vld [vmem:[%s12054_s1 + $0x148] sm:$0xff] }
  0x8a   :  { %1171 = vmatpush.msra.mxu2 %v943_v24  ;;  %1032 = vmatpush.msra.mxu0 %v6695_v54  ;;  %v6980_v54 = vand.u32 4294901760, %v245_v50  ;;  %v243_v24 = vld [vmem:[%s12054_s1 + $0x168] sm:$0xff] }
  0x8b   :  { %700 = vmatmul.f32.gmra.mxu3 %v456_v45  ;;  %1104 = vmatpush.msra.mxu1 %v6741_v20 }
  0x8c   :  { %1175 = vmatpush.msra.mxu2 %v949_v6  ;;  %1035 = vmatpush.msra.mxu0 %v6709_v60  ;;  %v6085_v60 = vsel %vm56_vm5, 1.0, %v12073_v55  ;;  %v7010_v6 = vsub.f32 %v245_v50, %v6980_v54 }
  0x8d   :  { %1238 = vmatpush.msra.mxu3 %v6706_v59  ;;  %1106 = vmatpush.msra.mxu1 %v6754_v5  ;;  %v465_v59 = vsub.f32 %v463_v42, %v464_v58 }
  0x8e   :  { %6126 = vmatmul.msk.f32.gmra.mxu1 %vm81_vm3, %v12077_v39  ;;  %1179 = vmatpush.msra.mxu2 %v955_v26  ;;  %v7012_v26 = vand.u32 4294901760, %v243_v24  ;;  %v12076_v62 = vand.u32 4294901760, %v7010_v6 }
  0x8f   :  { %459 = vmatmul.f32.gmra.mxu0 %v458_v46  ;;  %1240 = vmatpush.msra.mxu3 %v6725_v9  ;;  %v875_v9 = vsub.f32 %v6960_v41, %v874_v53 }
  0x90   :  { %1038 = vmatpush.msra.mxu0 %v6728_v27  ;;  %1108 = vmatpush.msra.mxu1 %v6768_v10  ;;  %v7006_v27 = vsub.f32 %v6085_v60, %v6085_v60  ;;  %v7043_v7 = vsub.f32 %v243_v24, %v7012_v26 }
  0x91   :  { %649 = vmatmul.f32.gmra.mxu2 %v463_v42  ;;  %1242 = vmatpush.msra.mxu3 %v6741_v20  ;;  %v6098_v20 = vsel %vm69_vm6, 1.0, %v12073_v55  ;;  %v12067_v42 = vand.u32 4294901760, %v7083_v40 }
  0x92   :  { %1183 = vmatpush.msra.mxu2 %v961_v4  ;;  %1041 = vmatpush.msra.mxu0 %v6745_v21  ;;  %v466_v4 = vand.u32 4294901760, %v465_v59  ;;  %v7023_v21 = vsub.f32 %v244_v44, %v6993_v51  ;;  %v882_v23 = vand.u32 4294901760, %v7006_v27  ;;  %v7055_v37 = vsub.f32 %v6098_v20, %v6098_v20 }
  0x93   :  { %706 = vmatmul.f32.gmra.mxu3 %v464_v58  ;;  %1110 = vmatpush.msra.mxu1 %v6787_v32  ;;  %v237_v58 = vld [vmem:[%s12054_s1 + $0x138] sm:$0xff]  ;;  %v1366_v24 = vsub.f32 %v7083_v40, %v12067_v42 }
  0x94   :  { %1187 = vmatpush.msra.mxu2 %v967_v12  ;;  %1044 = vmatpush.msra.mxu0 %v6757_v22  ;;  %v7037_v22 = vand.u32 4294901760, %v242_v47  ;;  %v876_v12 = vand.u32 4294901760, %v875_v9  ;;  %v12071_v15 = vand.u32 4294901760, %v7023_v21  ;;  %v890_v17 = vand.u32 4294901760, %v7055_v37 }
  0x95   :  { %1244 = vmatpush.msra.mxu3 %v6754_v5  ;;  %1112 = vmatpush.msra.mxu1 %v6803_v16  ;;  %v240_v5 = vld [vmem:[%s12054_s1 + $0x150] sm:$0xff]  ;;  %v7149_v59 = vand.u32 4294901760, %v237_v58 }
  0x96   :  { %6131 = vmatmul.msk.f32.vlgmr.msrb.gmra.mxu1 %vm42_vm0, %v12077_v39  ;;  %1191 = vmatpush.msra.mxu2 %v973_v43  ;;  %v1342_v43 = vsub.f32 %v7010_v6, %v12076_v62  ;;  %v7075_v30 = vand.u32 4294901760, %v240_v5  ;;  %v891_v44 = vsub.f32 %v7055_v37, %v890_v17 }
  0x97   :  { %467 = vmatmul.f32.gmra.mxu0 %v466_v4  ;;  %1246 = vmatpush.msra.mxu3 %v6768_v10  ;;  %v7061_v10 = vsub.f32 %v242_v47, %v7037_v22  ;;  %v235_v47 = vld [vmem:[%s12054_s1 + $0x128] sm:$0xff] }
  0x98   :  { %1047 = vmatpush.msra.mxu0 %v6771_v36  ;;  %1114 = vmatpush.msra.mxu1 %v6818_v18  ;;  %v883_v36 = vsub.f32 %v7006_v27, %v882_v23  ;;  %v1343_v25 = vand.u32 4294901760, %v1342_v43  ;;  %v7114_v38 = vsub.f32 %v240_v5, %v7075_v30  ;;  %v892_v63 = vand.u32 4294901760, %v891_v44  ;;  %v232_v44 = vld [vmem:[%s12054_s1 + $0x110] sm:$0xff] }
  0x99   :  { %877 = vmatmul.f32.vlgmr.msrb.gmra.mxu2 %v876_v12  ;;  %1248 = vmatpush.msra.mxu3 %v6787_v32  ;;  %v238_v32 = vld [vmem:[%s12054_s1 + $0x140] sm:$0xff]  ;;  %v1367_v5 = vand.u32 4294901760, %v1366_v24  ;;  %v7188_v43 = vand.u32 4294901760, %v235_v47 }
  0x9a   :  { %1195 = vmatpush.msra.mxu2 %v979_v56  ;;  %1050 = vmatpush.msra.mxu0 %v6790_v31  ;;  %v12069_v56 = vand.u32 4294901760, %v7043_v7  ;;  %v1348_v31 = vsub.f32 %v7023_v21, %v12071_v15  ;;  %v884_v45 = vand.u32 4294901760, %v883_v36  ;;  %v7124_v46 = vand.u32 4294901760, %v238_v32  ;;  %v254_v15 = vld [vmem:[%s12054_s1 + $0x1c0] sm:$0xff] }
  0x9b   :  { %6135 = vmatmul.msk.f32.vlgmr.msrb.gmra.mxu3 %vm43_vm4, %v12077_v39  ;;  %1116 = vmatpush.msra.mxu1 %v6832_v19  ;;  %v7468_v62 = vand.u32 4294901760, %v254_v15 }
  0x9c   :  { %1199 = vmatpush.msra.mxu2 %v985_v2  ;;  %1053 = vmatpush.msra.mxu0 %v6809_v14  ;;  %v12068_v2 = vand.u32 4294901760, %v7061_v10  ;;  %v7103_v14 = vand.u32 4294901760, %v239_v1  ;;  %v1354_v35 = vsub.f32 %v7043_v7, %v12069_v56  ;;  %v1349_v50 = vand.u32 4294901760, %v1348_v31  ;;  %v255_v56 = vld [vmem:[%s12054_s1 + $0x1c8] sm:$0xff] }
  0x9d   :  { %1250 = vmatpush.msra.mxu3 %v6803_v16  ;;  %1118 = vmatpush.msra.mxu1 %v6851_v8  ;;  %v6111_v16 = vsel %vm82_vm7, 1.0, %v12073_v55  ;;  %v7160_v9 = vsub.f32 %v238_v32, %v7124_v46 }
  0x9e   :  { %6132 = vmatmul.msk.f32.gmra.mxu1 %vm55_vm2, %v12077_v39  ;;  %1203 = vmatpush.msra.mxu2 %v991_v13  ;;  %v7140_v13 = vsub.f32 %v239_v1, %v7103_v14  ;;  %v1355_v60 = vand.u32 4294901760, %v1354_v35  ;;  %v234_v1 = vld [vmem:[%s12054_s1 + $0x120] sm:$0xff] }
  0x9f   :  { %6127 = vmatmul.msk.f32.vlgmr.msrb.gmra.mxu0 %vm42_vm0, %v12077_v39  ;;  %1252 = vmatpush.msra.mxu3 %v6818_v18  ;;  %v1360_v18 = vsub.f32 %v7061_v10, %v12068_v2  ;;  %v12062_v36 = vand.u32 4294901760, %v7160_v9  ;;  %v7210_v35 = vand.u32 4294901760, %v234_v1 }
  0xa0   :  { %1056 = vmatpush.msra.mxu0 %v6821_v33  ;;  %1207 = vmatpush.msra.mxu2 %v997_v52  ;;  %v7146_v33 = vsub.f32 %v6111_v16, %v6111_v16  ;;  %v12066_v52 = vand.u32 4294901760, %v7114_v38  ;;  %v233_v16 = vld [vmem:[%s12054_s1 + $0x118] sm:$0xff] }
  0xa1   :  { %885 = vmatmul.f32.gmra.mxu2 %v884_v45  ;;  %1254 = vmatpush.msra.mxu3 %v6832_v19  ;;  %v236_v19 = vld [vmem:[%s12054_s1 + $0x130] sm:$0xff] }
  0xa2   :  { %1344 = vmatpush.msrb.mxu1 %v1343_v25  ;;  %1059 = vmatpush.msra.mxu0 %v6835_v3  ;;  %v1361_v3 = vand.u32 4294901760, %v1360_v18  ;;  %v7172_v4 = vand.u32 4294901760, %v236_v19  ;;  %v898_v20 = vand.u32 4294901760, %v7146_v33  ;;  %v1372_v12 = vsub.f32 %v7114_v38, %v12066_v52  ;;  %v257_v52 = vld [vmem:[%s12054_s1 + $0x1d8] sm:$0xff] }
  0xa3   :  { %6136 = vmatmul.msk.f32.gmra.mxu3 %vm56_vm5, %v12077_v39  ;;  %1454 = vmatpush.msrb.mxu2 %v7010_v6 }
  0xa4   :  { %1256 = vmatpush.msra.mxu3 %v6851_v8  ;;  %1350 = vmatpush.msrb.mxu1 %v1349_v50  ;;  %v12065_v8 = vand.u32 4294901760, %v7140_v13  ;;  %v7199_v32 = vsub.f32 %v236_v19, %v7172_v4  ;;  %v899_v45 = vsub.f32 %v7146_v33, %v898_v20  ;;  %v7220_v50 = vsub.f32 %v235_v47, %v7188_v43 }
  0xa5   :  { %1062 = vmatpush.msra.mxu0 %v6854_v34  ;;  %v7183_v34 = vsub.f32 %v237_v58, %v7149_v59  ;;  %1457 = vmatpush.msrb.mxu2 %v7023_v21  ;;  %v1384_v58 = vsub.f32 %v7160_v9, %v12062_v36  ;;  %v7233_v19 = vand.u32 4294901760, %v233_v16 }
  0xa6   :  { %6133 = vmatmul.msk.f32.gmra.mxu1 %vm68_vm1, %v12077_v39  ;;  %1522 = vmatpush.msrb.mxu3 %v6980_v54  ;;  %v1378_v31 = vsub.f32 %v7140_v13, %v12065_v8  ;;  %v900_v24 = vand.u32 4294901760, %v899_v45 }
  0xa7   :  { %6128 = vmatmul.msk.f32.gmra.mxu0 %vm55_vm2, %v12077_v39  ;;  %1356 = vmatpush.msrb.mxu1 %v1355_v60  ;;  %v12057_v25 = vand.u32 4294901760, %v7183_v34  ;;  %v12056_v60 = vand.u32 4294901760, %v7199_v32  ;;  %v7259_v45 = vsub.f32 %v233_v16, %v7233_v19 }
  0xa8   :  { %1065 = vmatpush.msra.mxu0 %v6866_v49  ;;  %1460 = vmatpush.msrb.mxu2 %v7043_v7  ;;  %v1373_v49 = vand.u32 4294901760, %v1372_v12  ;;  %v1379_v18 = vand.u32 4294901760, %v1378_v31  ;;  %v12058_v12 = vand.u32 4294901760, %v7220_v50  ;;  %v231_v31 = vld [vmem:[%s12054_s1 + $0x108] sm:$0xff] }
  0xa9   :  { %893 = vmatmul.f32.gmra.mxu2 %v892_v63  ;;  %1362 = vmatpush.msrb.mxu1 %v1361_v3  ;;  %v1390_v47 = vsub.f32 %v7183_v34, %v12057_v25  ;;  %v7243_v3 = vsub.f32 %v234_v1, %v7210_v35  ;;  %v1385_v63 = vand.u32 4294901760, %v1384_v58  ;;  %v1396_v1 = vsub.f32 %v7199_v32, %v12056_v60 }
  0xaa   :  { %1275 = vmatpush.msrb.mxu0 %v6980_v54  ;;  %1524 = vmatpush.msrb.mxu3 %v6993_v51  ;;  %v1402_v16 = vsub.f32 %v7220_v50, %v12058_v12  ;;  %v12061_v25 = vand.u32 4294901760, %v7259_v45 }
  0xab   :  { %6137 = vmatmul.msk.f32.gmra.mxu3 %vm69_vm6, %v12077_v39  ;;  %1368 = vmatpush.msrb.mxu1 %v1367_v5  ;;  %v7248_v5 = vand.u32 4294901760, %v232_v44  ;;  %v12059_v58 = vand.u32 4294901760, %v7243_v3 }
  0xac   :  { %1463 = vmatpush.msrb.mxu2 %v7061_v10  ;;  %1277 = vmatpush.msrb.mxu0 %v6993_v51 }
  0xad   :  { %1526 = vmatpush.msrb.mxu3 %v7012_v26  ;;  %1374 = vmatpush.msrb.mxu1 %v1373_v49  ;;  %v1391_v49 = vand.u32 4294901760, %v1390_v47  ;;  %v7277_v60 = vsub.f32 %v232_v44, %v7248_v5  ;;  %v1397_v47 = vand.u32 4294901760, %v1396_v1  ;;  %v1408_v44 = vsub.f32 %v7243_v3, %v12059_v58 }
  0xae   :  { %6134 = vmatmul.msk.f32.gmra.mxu1 %vm81_vm3, %v12077_v39  ;;  %1466 = vmatpush.msrb.mxu2 %v7083_v40 }
  0xaf   :  { %6129 = vmatmul.msk.f32.gmra.mxu0 %vm68_vm1, %v12077_v39  ;;  %1528 = vmatpush.msrb.mxu3 %v7037_v22  ;;  %v12060_v1 = vand.u32 4294901760, %v7277_v60 }
  0xb0   :  { %1279 = vmatpush.msrb.mxu0 %v7012_v26  ;;  %1380 = vmatpush.msrb.mxu1 %v1379_v18  ;;  %v7267_v18 = vand.u32 4294901760, %v231_v31 }
  0xb1   :  { %901 = vmatmul.f32.gmra.mxu2 %v900_v24  ;;  %v230_v24 = vld [vmem:[%s12054_s1 + $0x100] sm:$0xff]  ;;  %1530 = vmatpush.msrb.mxu3 %v7048_v29 }
  0xb2   :  { %1469 = vmatpush.msrb.mxu2 %v7114_v38  ;;  %1281 = vmatpush.msrb.mxu0 %v7037_v22  ;;  %v7295_v12 = vsub.f32 %v231_v31, %v7267_v18  ;;  %v1414_v31 = vsub.f32 %v7259_v45, %v12061_v25  ;;  %v260_v25 = vld [vmem:[%s12054_s1 + $0x1f0] sm:$0xff] }
  0xb3   :  { %6138 = vmatmul.msk.f32.gmra.mxu3 %vm82_vm7, %v12077_v39  ;;  %1386 = vmatpush.msrb.mxu1 %v1385_v63  ;;  %v7285_v63 = vand.u32 4294901760, %v230_v24 }
  0xb4   :  { %1472 = vmatpush.msrb.mxu2 %v7140_v13  ;;  %1283 = vmatpush.msrb.mxu0 %v7048_v29  ;;  %v12063_v58 = vand.u32 4294901760, %v7295_v12 }
  0xb5   :  { %1532 = vmatpush.msrb.mxu3 %v7075_v30  ;;  %1392 = vmatpush.msrb.mxu1 %v1391_v49  ;;  %v7310_v49 = vsub.f32 %v230_v24, %v7285_v63  ;;  %v261_v24 = vld [vmem:[%s12054_s1 + $0x1f8] sm:$0xff] }
  0xb6   :  { %1122 = vmatmul.f32.vlgmr.msra.gmra.mxu1 %v874_v53  ;;  %1475 = vmatpush.msrb.mxu2 %v7160_v9  ;;  %v1403_v53 = vand.u32 4294901760, %v1402_v16  ;;  %v1409_v16 = vand.u32 4294901760, %v1408_v44  ;;  %v1415_v44 = vand.u32 4294901760, %v1414_v31  ;;  %v7340_v36 = vand.u32 4294901760, %v261_v24 }
  0xb7   :  { %6130 = vmatmul.msk.f32.gmra.mxu0 %vm81_vm3, %v12077_v39  ;;  %1534 = vmatpush.msrb.mxu3 %v7103_v14  ;;  %12228 = vst [vmem:[#allocation6_spill] sm:$0xff] %v7310_v49 }
  0xb8   :  { %1285 = vmatpush.msrb.mxu0 %v7075_v30  ;;  %1398 = vmatpush.msrb.mxu1 %v1397_v47  ;;  %v1420_v47 = vsub.f32 %v7277_v60, %v12060_v1  ;;  %v1426_v1 = vsub.f32 %v7295_v12, %v12063_v58 }
  0xb9   :  { %6139 = vmatmul.msk.f32.vlgmr.msra.gmra.mxu2 %vm43_vm4, %v12077_v39  ;;  %1536 = vmatpush.msrb.mxu3 %v7124_v46 }
  0xba   :  { %1478 = vmatpush.msrb.mxu2 %v7183_v34  ;;  %1287 = vmatpush.msrb.mxu0 %v7103_v14 }
  0xbb   :  { %6143 = vmatmul.msk.f32.vlgmr.msra.gmra.mxu3 %vm43_vm4, %v12077_v39  ;;  %1404 = vmatpush.msrb.mxu1 %v1403_v53  ;;  %v12064_v53 = vand.u32 4294901760, %v7310_v49 }
  0xbc   :  { %1481 = vmatpush.msrb.mxu2 %v7199_v32  ;;  %1289 = vmatpush.msrb.mxu0 %v7124_v46 }
  0xbd   :  { %1538 = vmatpush.msrb.mxu3 %v7149_v59  ;;  %1410 = vmatpush.msrb.mxu1 %v1409_v16  ;;  %v1432_v31 = vsub.f32 %v7310_v49, %v12064_v53  ;;  %v7354_v16 = vand.u32 4294901760, %v260_v25  ;;  %v258_v53 = vld [vmem:[%s12054_s1 + $0x1e0] sm:$0xff] }
  0xbe   :  { %1128 = vmatmul.f32.gmra.mxu1 %v882_v23  ;;  %1484 = vmatpush.msrb.mxu2 %v7220_v50  ;;  %v1421_v23 = vand.u32 4294901760, %v1420_v47  ;;  %v1427_v47 = vand.u32 4294901760, %v1426_v1 }
  0xbf   :  { %1068 = vmatmul.f32.vlgmr.msra.gmra.mxu0 %v6960_v41  ;;  %1540 = vmatpush.msrb.mxu3 %v7172_v4  ;;  %v259_v41 = vld [vmem:[%s12054_s1 + $0x1e8] sm:$0xff]  ;;  %v1433_v1 = vand.u32 4294901760, %v1432_v31  ;;  %v7376_v8 = vsub.f32 %v260_v25, %v7354_v16  ;;  %v7391_v25 = vand.u32 4294901760, %v258_v53  ;;  %v7403_v31 = vand.u32 4294901760, %v257_v52 }
  0xc0   :  { %1291 = vmatpush.msrb.mxu0 %v7149_v59  ;;  %1416 = vmatpush.msrb.mxu1 %v1415_v44  ;;  %v7361_v58 = vand.u32 4294901760, %v259_v41  ;;  %v7365_v44 = vsub.f32 %v261_v24, %v7340_v36  ;;  %v7380_v24 = vadd.s32 256, %v6862_v11 }
  0xc1   :  { %6140 = vmatmul.msk.f32.gmra.mxu2 %vm56_vm5, %v12077_v39  ;;  %1542 = vmatpush.msrb.mxu3 %v7188_v43  ;;  %12229 = vst [vmem:[#allocation7_spill] sm:$0xff] %v7376_v8  ;;  %v7419_v42 = vsub.f32 %v258_v53, %v7391_v25 }
  0xc2   :  { %1487 = vmatpush.msrb.mxu2 %v7243_v3  ;;  %1293 = vmatpush.msrb.mxu0 %v7172_v4  ;;  %vm44_vm8 = vcmp.eq.s32.totalorder %v7380_v24, %v6868_v0  ;;  %vm57_vm9 = vcmp.eq.s32.totalorder %v7380_v24, %v6896_v48  ;;  %vm70_vm10 = vcmp.eq.s32.totalorder %v7380_v24, %v6885_v57 }
  0xc3   :  { %6144 = vmatmul.msk.f32.gmra.mxu3 %vm56_vm5, %v12077_v39  ;;  %1422 = vmatpush.msrb.mxu1 %v1421_v23  ;;  %v7383_v23 = vsub.f32 %v259_v41, %v7361_v58  ;;  %v12072_v41 = vand.u32 4294901760, %v7376_v8  ;;  %12231 = vst [vmem:[#allocation9_spill] sm:$0xff] %v7419_v42  ;;  %v6073_v53 = vsel %vm44_vm8, 1.0, %v12073_v55  ;;  %v7452_v55 = vand.u32 4294901760, %v255_v56 }
  0xc4   :  { %1490 = vmatpush.msrb.mxu2 %v7259_v45  ;;  %1295 = vmatpush.msrb.mxu0 %v7188_v43  ;;  %vm83_vm11 = vcmp.eq.s32.totalorder %v7380_v24, %v6917_v28  ;;  %v268_v24 = vld [vmem:[%s12054_s1 + $0x230] sm:$0xff] }
  0xc5   :  { %1544 = vmatpush.msrb.mxu3 %v7210_v35  ;;  %1428 = vmatpush.msrb.mxu1 %v1427_v47  ;;  %12230 = vst [vmem:[#allocation8_spill] sm:$0xff] %v7383_v23  ;;  %v12075_v47 = vand.u32 4294901760, %v7383_v23 }
  0xc6   :  { %1134 = vmatmul.f32.gmra.mxu1 %v890_v17  ;;  %1493 = vmatpush.msrb.mxu2 %v7277_v60  ;;  %v12070_v17 = vand.u32 4294901760, %v7365_v44 }
  0xc7   :  { %1073 = vmatmul.f32.gmra.mxu0 %v7006_v27  ;;  %1546 = vmatpush.msrb.mxu3 %v7233_v19  ;;  %v256_v27 = vld [vmem:[%s12054_s1 + $0x1d0] sm:$0xff] }
  0xc8   :  { %1297 = vmatpush.msrb.mxu0 %v7210_v35  ;;  %1434 = vmatpush.msrb.mxu1 %v1433_v1  ;;  %v1776_v1 = vsub.f32 %v7365_v44, %v12070_v17  ;;  %v7421_v2 = vand.u32 4294901760, %v256_v27  ;;  %v7439_v17 = vsub.f32 %v257_v52, %v7403_v31  ;;  %v12081_v52 = vand.u32 4294901760, %v7419_v42 }
  0xc9   :  { %6141 = vmatmul.msk.f32.gmra.mxu2 %vm69_vm6, %v12077_v39  ;;  %1548 = vmatpush.msrb.mxu3 %v7248_v5 }
  0xca   :  { %1496 = vmatpush.msrb.mxu2 %v7295_v12  ;;  %1299 = vmatpush.msrb.mxu0 %v7233_v19  ;;  %12232 = vst [vmem:[#allocation10_spill] sm:$0xff] %v7439_v17 }
  0xcb   :  { %6145 = vmatmul.msk.f32.gmra.mxu3 %vm69_vm6, %v12077_v39  ;;  %1660 = vmatpush.msra.mxu1 %v6980_v54  ;;  %v1782_v54 = vsub.f32 %v7376_v8, %v12072_v41  ;;  %v1777_v41 = vand.u32 4294901760, %v1776_v1  ;;  %v12238_v8 = vand.u32 4294901760, %v7023_v21 }
  0xcc   :  { %1499 = vmatpush.msrb.mxu2 %v7310_v49  ;;  %1301 = vmatpush.msrb.mxu0 %v7248_v5 }
  0xcd   :  { %1550 = vmatpush.msrb.mxu3 %v7267_v18  ;;  %1662 = vmatpush.msra.mxu1 %v6993_v51  ;;  %v1307_v51 = vsub.f32 %v6073_v53, %v6073_v53  ;;  %v1783_v1 = vand.u32 4294901760, %v1782_v54 }
  0xce   :  { %1140 = vmatmul.f32.gmra.mxu1 %v898_v20  ;;  %v1788_v20 = vsub.f32 %v7383_v23, %v12075_v47  ;;  %1709 = vmatpush.msra.mxu2 %v7340_v36  ;;  %v253_v47 = vld [vmem:[%s12054_s1 + $0x1b8] sm:$0xff] }
  0xcf   :  { %1078 = vmatmul.f32.gmra.mxu0 %v7055_v37  ;;  %1552 = vmatpush.msrb.mxu3 %v7285_v63  ;;  %v7455_v37 = vsub.f32 %v256_v27, %v7421_v2  ;;  %v7483_v27 = vsub.f32 %v255_v56, %v7452_v55  ;;  %v7485_v61 = vand.u32 4294901760, %v253_v47  ;;  %v1308_v23 = vand.u32 4294901760, %v1307_v51 }
  0xd0   :  { %1303 = vmatpush.msrb.mxu0 %v7267_v18  ;;  %1664 = vmatpush.msra.mxu1 %v7012_v26  ;;  %v1789_v53 = vand.u32 4294901760, %v1788_v20  ;;  %v1794_v26 = vsub.f32 %v7419_v42, %v12081_v52  ;;  %v12235_v56 = vmov 0.0   ;;  %v12236_v52 = vand.u32 4294901760, %v7439_v17 }
  0xd1   :  { %6142 = vmatmul.msk.f32.gmra.mxu2 %vm82_vm7, %v12077_v39  ;;  %1778 = vmatpush.msra.mxu3 %v1777_v41  ;;  %v12234_v41 = vmov 1.0   ;;  %v6086_v20 = vsel %vm57_vm9, 1.0, %v12235_v56  ;;  %v7505_v42 = vsub.f32 %v254_v15, %v7468_v62  ;;  %v12237_v49 = vand.u32 4294901760, %v7455_v37 }
  0xd2   :  { %1711 = vmatpush.msra.mxu2 %v7354_v16  ;;  %1305 = vmatpush.msrb.mxu0 %v7285_v63  ;;  %v1800_v54 = vsub.f32 %v7439_v17, %v12236_v52  ;;  %v1315_v17 = vsub.f32 %v6086_v20, %v6086_v20 }
  0xd3   :  { %6146 = vmatmul.msk.f32.gmra.mxu3 %vm82_vm7, %v12077_v39  ;;  %1666 = vmatpush.msra.mxu1 %v7037_v22  ;;  %v252_v39 = vld [vmem:[%s12054_s1 + $0x1b0] sm:$0xff]  ;;  %v12233_v22 = vand.u32 4294901760, %v7010_v6  ;;  %v1806_v52 = vsub.f32 %v7455_v37, %v12237_v49 }
  0xd4   :  { %1713 = vmatpush.msra.mxu2 %v7361_v58  ;;  %1784 = vmatpush.msra.mxu3 %v1783_v1  ;;  %v7509_v6 = vand.u32 4294901760, %v252_v39  ;;  %v251_v1 = vld [vmem:[%s12054_s1 + $0x1a8] sm:$0xff]  ;;  %v1801_v49 = vand.u32 4294901760, %v1800_v54  ;;  %v1316_v20 = vand.u32 4294901760, %v1315_v17 }
  0xd5   :  { %1581 = vmatpush.msra.mxu0 %v12233_v22  ;;  %1668 = vmatpush.msra.mxu1 %v7048_v29  ;;  %v1795_v22 = vand.u32 4294901760, %v1794_v26  ;;  %v1309_v29 = vsub.f32 %v1307_v51, %v1308_v23  ;;  %v12089_v26 = vand.u32 4294901760, %v7505_v42  ;;  %v7530_v15 = vand.u32 4294901760, %v251_v1 }
  0xd6   :  { %6147 = vmatmul.msk.f32.vlgmr.msrb.gmra.mxu1 %vm44_vm8, %v12234_v41  ;;  %1715 = vmatpush.msra.mxu2 %v7391_v25  ;;  %v7537_v21 = vsub.f32 %v252_v39, %v7509_v6  ;;  %v249_v39 = vld [vmem:[%s12054_s1 + $0x198] sm:$0xff] }
  0xd7   :  { %1083 = vmatmul.f32.gmra.mxu0 %v7146_v33  ;;  %1790 = vmatpush.msra.mxu3 %v1789_v53  ;;  %v7520_v33 = vsub.f32 %v253_v47, %v7485_v61  ;;  %v250_v53 = vld [vmem:[%s12054_s1 + $0x1a0] sm:$0xff]  ;;  %v12239_v47 = vand.u32 4294901760, %v7043_v7  ;;  %v1310_v7 = vand.u32 4294901760, %v1309_v29  ;;  %v248_v29 = vld [vmem:[%s12054_s1 + $0x190] sm:$0xff] }
  0xd8   :  { %1585 = vmatpush.msra.mxu0 %v12238_v8  ;;  %1670 = vmatpush.msra.mxu1 %v7075_v30  ;;  %v1807_v30 = vand.u32 4294901760, %v1806_v52  ;;  %v12240_v8 = vand.u32 4294901760, %v7483_v27 }
  0xd9   :  { %1502 = vmatmul.f32.vlgmr.msrb.gmra.mxu2 %v1307_v51  ;;  %1796 = vmatpush.msra.mxu3 %v1795_v22  ;;  %v12090_v54 = vand.u32 4294901760, %v7520_v33  ;;  %v7564_v22 = vsub.f32 %v251_v1, %v7530_v15 }
  0xda   :  { %1717 = vmatpush.msra.mxu2 %v7403_v31  ;;  %1589 = vmatpush.msra.mxu0 %v12239_v47  ;;  %v1812_v51 = vsub.f32 %v7483_v27, %v12240_v8  ;;  %v12241_v47 = vand.u32 4294901760, %v7061_v10  ;;  %v1818_v10 = vsub.f32 %v7505_v42, %v12089_v26  ;;  %v12242_v26 = vand.u32 4294901760, %v7083_v40 }
  0xdb   :  { %1556 = vmatmul.f32.vlgmr.msrb.gmra.mxu3 %v1308_v23  ;;  %1672 = vmatpush.msra.mxu1 %v7103_v14  ;;  %v7544_v23 = vand.u32 4294901760, %v250_v53  ;;  %v6099_v14 = vsel %vm70_vm10, 1.0, %v12235_v56  ;;  %v1824_v1 = vsub.f32 %v7520_v33, %v12090_v54  ;;  %v12093_v54 = vand.u32 4294901760, %v7564_v22 }
  0xdc   :  { %1719 = vmatpush.msra.mxu2 %v7421_v2  ;;  %1593 = vmatpush.msra.mxu0 %v12241_v47  ;;  %v1813_v8 = vand.u32 4294901760, %v1812_v51  ;;  %v1317_v47 = vsub.f32 %v1315_v17, %v1316_v20  ;;  %v1323_v52 = vsub.f32 %v6099_v14, %v6099_v14  ;;  %v1819_v51 = vand.u32 4294901760, %v1818_v10 }
  0xdd   :  { %1802 = vmatpush.msra.mxu3 %v1801_v49  ;;  %1674 = vmatpush.msra.mxu1 %v7124_v46  ;;  %v7572_v49 = vadd.s32 384, %v6862_v11  ;;  %v7581_v46 = vsub.f32 %v250_v53, %v7544_v23  ;;  %v7591_v11 = vand.u32 4294901760, %v248_v29  ;;  %v12244_v40 = vand.u32 4294901760, %v7537_v21 }
  0xde   :  { %6148 = vmatmul.msk.f32.gmra.mxu1 %vm57_vm9, %v12234_v41  ;;  %1721 = vmatpush.msra.mxu2 %v7452_v55  ;;  %v1318_v10 = vand.u32 4294901760, %v1317_v47 }
  0xdf   :  { %1311 = vmatmul.f32.vlgmr.msrb.gmra.mxu0 %v1310_v7  ;;  %1808 = vmatpush.msra.mxu3 %v1807_v30  ;;  %v7578_v7 = vand.u32 4294901760, %v249_v39  ;;  %v247_v30 = vld [vmem:[%s12054_s1 + $0x188] sm:$0xff]  ;;  %v1830_v53 = vsub.f32 %v7537_v21, %v12244_v40  ;;  %vm45_vm12 = vcmp.eq.s32.totalorder %v7572_v49, %v6868_v0  ;;  %v12245_v40 = vand.u32 4294901760, %v7140_v13 }
  0xe0   :  { %1597 = vmatpush.msra.mxu0 %v12242_v26  ;;  %1676 = vmatpush.msra.mxu1 %v7149_v59  ;;  %v246_v59 = vld [vmem:[%s12054_s1 + $0x180] sm:$0xff]  ;;  %v1825_v26 = vand.u32 4294901760, %v1824_v1  ;;  %v7610_v14 = vand.u32 4294901760, %v247_v30  ;;  %v6074_v1 = vsel %vm45_vm12, 1.0, %v12235_v56  ;;  %vm58_vm13 = vcmp.eq.s32.totalorder %v7572_v49, %v6896_v48 }
  0xe1   :  { %1507 = vmatmul.f32.gmra.mxu2 %v1315_v17  ;;  %v12243_v17 = vand.u32 4294901760, %v7114_v38  ;;  %1814 = vmatpush.msra.mxu3 %v1813_v8  ;;  %v12094_v38 = vand.u32 4294901760, %v7581_v46  ;;  %v7627_v8 = vsub.f32 %v248_v29, %v7591_v11  ;;  %v7629_v13 = vand.u32 4294901760, %v246_v59 }
  0xe2   :  { %1723 = vmatpush.msra.mxu2 %v7468_v62  ;;  %1678 = vmatpush.msra.mxu1 %v7172_v4  ;;  %v1836_v4 = vsub.f32 %v7564_v22, %v12093_v54  ;;  %v1831_v47 = vand.u32 4294901760, %v1830_v53  ;;  %v7654_v29 = vsub.f32 %v6074_v1, %v6074_v1  ;;  %vm71_vm14 = vcmp.eq.s32.totalorder %v7572_v49, %v6885_v57 }
  0xe3   :  { %1562 = vmatmul.f32.gmra.mxu3 %v1316_v20  ;;  %1601 = vmatpush.msra.mxu0 %v12243_v17  ;;  %v7608_v20 = vsub.f32 %v249_v39, %v7578_v7  ;;  %v1324_v17 = vand.u32 4294901760, %v1323_v52  ;;  %v6112_v39 = vsel %vm83_vm11, 1.0, %v12235_v56  ;;  %vm84_vm15 = vcmp.eq.s32.totalorder %v7572_v49, %v6917_v28 }
  0xe4   :  { %1725 = vmatpush.msra.mxu2 %v7485_v61  ;;  %1820 = vmatpush.msra.mxu3 %v1819_v51  ;;  %v1842_v51 = vsub.f32 %v7581_v46, %v12094_v38  ;;  %v1331_v54 = vsub.f32 %v6112_v39, %v6112_v39  ;;  %v1837_v53 = vand.u32 4294901760, %v1836_v4  ;;  %v7650_v38 = vsub.f32 %v246_v59, %v7629_v13 }
  0xe5   :  { %1605 = vmatpush.msra.mxu0 %v12245_v40  ;;  %1680 = vmatpush.msra.mxu1 %v7188_v43  ;;  %v7642_v40 = vsub.f32 %v247_v30, %v7610_v14  ;;  %v12246_v43 = vand.u32 4294901760, %v7160_v9  ;;  %v12247_v30 = vand.u32 4294901760, %v7183_v34  ;;  %v12249_v59 = vand.u32 4294901760, %v7199_v32 }
  0xe6   :  { %6149 = vmatmul.msk.f32.gmra.mxu1 %vm70_vm10, %v12234_v41  ;;  %1727 = vmatpush.msra.mxu2 %v7509_v6  ;;  %v1843_v9 = vand.u32 4294901760, %v1842_v51  ;;  %v1332_v34 = vand.u32 4294901760, %v1331_v54  ;;  %v12101_v1 = vand.u32 4294901760, %v7654_v29  ;;  %v12250_v51 = vand.u32 4294901760, %v7220_v50 }
  0xe7   :  { %1319 = vmatmul.f32.gmra.mxu0 %v1318_v10  ;;  %1826 = vmatpush.msra.mxu3 %v1825_v26  ;;  %v1325_v10 = vsub.f32 %v1323_v52, %v1324_v17  ;;  %v1853_v26 = vand.u32 4294901760, %v7627_v8  ;;  %v1859_v4 = vand.u32 4294901760, %v7642_v40  ;;  %v12252_v50 = vand.u32 4294901760, %v7243_v3 }
  0xe8   :  { %1609 = vmatpush.msra.mxu0 %v12246_v43  ;;  %1682 = vmatpush.msra.mxu1 %v7210_v35  ;;  %v12248_v35 = vand.u32 4294901760, %v7608_v20  ;;  %v1333_v43 = vsub.f32 %v1331_v54, %v1332_v34 }
  0xe9   :  { %1512 = vmatmul.f32.gmra.mxu2 %v1323_v52  ;;  %1832 = vmatpush.msra.mxu3 %v1831_v47  ;;  %v1326_v39 = vand.u32 4294901760, %v1325_v10  ;;  %v1860_v47 = vsub.f32 %v7642_v40, %v1859_v4 }
  0xea   :  { %1729 = vmatpush.msra.mxu2 %v7530_v15  ;;  %1613 = vmatpush.msra.mxu0 %v12247_v30  ;;  %v1848_v52 = vsub.f32 %v7608_v20, %v12248_v35  ;;  %v12253_v35 = vand.u32 4294901760, %v7259_v45 }
  0xeb   :  { %1568 = vmatmul.f32.gmra.mxu3 %v1324_v17  ;;  %1684 = vmatpush.msra.mxu1 %v7233_v19  ;;  %v1854_v19 = vsub.f32 %v7627_v8, %v1853_v26  ;;  %v12100_v17 = vand.u32 4294901760, %v7650_v38 }
  0xec   :  { %1731 = vmatpush.msra.mxu2 %v7544_v23  ;;  %1617 = vmatpush.msra.mxu0 %v12249_v59  ;;  %v1849_v32 = vand.u32 4294901760, %v1848_v52  ;;  %v12255_v59 = vand.u32 4294901760, %v7365_v44 }
  0xed   :  { %1838 = vmatpush.msra.mxu3 %v1837_v53  ;;  %1686 = vmatpush.msra.mxu1 %v7248_v5  ;;  %v1855_v5 = vand.u32 4294901760, %v1854_v19  ;;  %v1866_v10 = vsub.f32 %v7650_v38, %v12100_v17  ;;  %v6087_v53 = vsel %vm58_vm13, 1.0, %v12235_v56  ;;  %v12257_v19 = vand.u32 4294901760, %v7295_v12 }
  0xee   :  { %6150 = vmatmul.msk.f32.gmra.mxu1 %vm83_vm11, %v12234_v41  ;;  %1733 = vmatpush.msra.mxu2 %v7578_v7  ;;  %v7702_v52 = vsub.f32 %v6087_v53, %v6087_v53 }
  0xef   :  { %1327 = vmatmul.f32.gmra.mxu0 %v1326_v39  ;;  %1844 = vmatpush.msra.mxu3 %v1843_v9  ;;  %v1334_v9 = vand.u32 4294901760, %v1333_v43  ;;  %v1867_v3 = vand.u32 4294901760, %v1866_v10  ;;  %v12254_v39 = vand.u32 4294901760, %v7277_v60 }
  0xf0   :  { %1621 = vmatpush.msra.mxu0 %v12250_v51  ;;  %1688 = vmatpush.msra.mxu1 %v7267_v18  ;;  %v1743_v18 = vsub.f32 %v7654_v29, %v12101_v1  ;;  %v12097_v45 = vand.u32 4294901760, %v7702_v52  ;;  %v12260_v51 = vld [vmem:[#allocation7_spill] sm:$0xff] }
  0xf1   :  { %1517 = vmatmul.f32.gmra.mxu2 %v1331_v54  ;;  %1850 = vmatpush.msra.mxu3 %v1849_v32  ;;  %v1861_v54 = vand.u32 4294901760, %v1860_v47  ;;  %v6100_v47 = vsel %vm71_vm14, 1.0, %v12235_v56  ;;  %v12261_v43 = vand.u32 4294901760, %v12260_v51 }
  0xf2   :  { %1735 = vmatpush.msra.mxu2 %v7591_v11  ;;  %1625 = vmatpush.msra.mxu0 %v12252_v50  ;;  %v1751_v12 = vsub.f32 %v7702_v52, %v12097_v45  ;;  %v12265_v50 = vld [vmem:[#allocation8_spill] sm:$0xff] }
  0xf3   :  { %v7691_v30 = vpop.f32.mrf.mxu1  ;;  %1574 = vmatmul.f32.gmra.mxu3 %v1332_v34  ;;  %1690 = vmatpush.msra.mxu1 %v7285_v63  ;;  %v1744_v63 = vand.u32 4294901760, %v1743_v18  ;;  %v12266_v18 = vand.u32 4294901760, %v12265_v50 }
  0xf4   :  { %12251 = vst [vmem:[#allocation11_spill] sm:$0xff] %v7691_v30  ;;  %1737 = vmatpush.msra.mxu2 %v7610_v14  ;;  %1629 = vmatpush.msra.mxu0 %v12253_v35 }
  0xf5   :  { %1856 = vmatpush.msra.mxu3 %v1855_v5  ;;  %1956 = vmatpush.msrb.mxu1 %v7340_v36  ;;  %v12262_v5 = vld [vmem:[#allocation6_spill] sm:$0xff] }
  0xf6   :  { %6155 = vmatmul.msk.f32.vlgmr.msra.gmra.mxu1 %vm44_vm8, %v12234_v41  ;;  %1739 = vmatpush.msra.mxu2 %v7629_v13  ;;  %v12263_v10 = vand.u32 4294901760, %v12262_v5  ;;  %v276_v5 = vld [vmem:[%s12054_s1 + $0x270] sm:$0xff] }
  0xf7   :  { %1335 = vmatmul.f32.gmra.mxu0 %v1334_v9  ;;  %1862 = vmatpush.msra.mxu3 %v1861_v54  ;;  %v7749_v54 = vsub.f32 %v6100_v47, %v6100_v47  ;;  %v12267_v9 = vld [vmem:[#allocation9_spill] sm:$0xff]  ;;  %v12275_v47 = vand.u32 4294901760, %v7455_v37 }
  0xf8   :  { %1633 = vmatpush.msra.mxu0 %v12254_v39  ;;  %1958 = vmatpush.msrb.mxu1 %v7354_v16  ;;  %v12268_v35 = vand.u32 4294901760, %v12267_v9 }
  0xf9   :  { %1745 = vmatmul.f32.vlgmr.msra.gmra.mxu2 %v1744_v63  ;;  %1868 = vmatpush.msra.mxu3 %v1867_v3  ;;  %v12096_v3 = vand.u32 4294901760, %v7749_v54 }
  0xfa   :  { %2015 = vmatpush.msrb.mxu2 %v12255_v59  ;;  %1637 = vmatpush.msra.mxu0 %v12257_v19  ;;  %v6113_v19 = vsel %vm84_vm15, 1.0, %v12235_v56 }
  0xfb   :  { %v7718_v34 = vpop.f32.mrf.mxu1  ;;  %6159 = vmatmul.msk.f32.vlgmr.msra.gmra.mxu3 %vm45_vm12, %v12234_v41  ;;  %1960 = vmatpush.msrb.mxu1 %v7361_v58 }
  0xfc   :  { %12256 = vst [vmem:[#allocation12_spill] sm:$0xff] %v7718_v34  ;;  %v7727_v60 = vpop.f32.mrf.mxu0  ;;  %v7729_v32 = vpop.f32.mrf.mxu2  ;;  %2019 = vmatpush.msrb.mxu2 %v12261_v43  ;;  %2094 = vmatpush.msrb.mxu3 %v7340_v36  ;;  %v1752_v36 = vand.u32 4294901760, %v1751_v12  ;;  %v7801_v43 = vsub.f32 %v6113_v19, %v6113_v19  ;;  %v277_v12 = vld [vmem:[%s12054_s1 + $0x278] sm:$0xff] }
  0xfd   :  { %12258 = vst [vmem:[#allocation13_spill] sm:$0xff] %v7727_v60  ;;  %1641 = vmatpush.msra.mxu0 %v12263_v10  ;;  %1962 = vmatpush.msrb.mxu1 %v7391_v25  ;;  %v12278_v10 = vand.u32 4294901760, %v7505_v42 }
  0xfe   :  { %12259 = vst [vmem:[#allocation14_spill] sm:$0xff] %v7729_v32  ;;  %v7744_v53 = vpop.f32.mrf.mxu3  ;;  %2023 = vmatpush.msrb.mxu2 %v12266_v18  ;;  %2096 = vmatpush.msrb.mxu3 %v7354_v16 }
  0xff   :  { %12264 = vst [vmem:[#allocation7_spill] sm:$0xff] %v7744_v53  ;;  %6156 = vmatmul.msk.f32.gmra.mxu1 %vm57_vm9, %v12234_v41  ;;  %6151 = vmatmul.msk.f32.vlgmr.msra.gmra.mxu0 %vm44_vm8, %v12234_v41 }
 0x100   :  { %1888 = vmatpush.msrb.mxu0 %v7365_v44  ;;  %1964 = vmatpush.msrb.mxu1 %v7403_v31  ;;  %v12270_v44 = vld [vmem:[#allocation10_spill] sm:$0xff] }
 0x101   :  { %2027 = vmatpush.msrb.mxu2 %v12268_v35  ;;  %2098 = vmatpush.msrb.mxu3 %v7361_v58  ;;  %v12271_v63 = vand.u32 4294901760, %v12270_v44  ;;  %v275_v35 = vld [vmem:[%s12054_s1 + $0x268] sm:$0xff] }
 0x102   :  { %1753 = vmatmul.f32.gmra.mxu2 %v1752_v36  ;;  %1891 = vmatpush.msrb.mxu0 %v12260_v51  ;;  %v12276_v51 = vand.u32 4294901760, %v7483_v27  ;;  %v7828_v36 = vand.u32 4294901760, %v277_v12 }
 0x103   :  { %v7765_v16 = vpop.f32.mrf.mxu1  ;;  %1966 = vmatpush.msrb.mxu1 %v7421_v2  ;;  %2031 = vmatpush.msrb.mxu2 %v12271_v63  ;;  %v7840_v63 = vand.u32 4294901760, %v276_v5 }
 0x104   :  { %12269 = vst [vmem:[#allocation6_spill] sm:$0xff] %v7765_v16  ;;  %v7773_v39 = vpop.f32.mrf.mxu0  ;;  %v7775_v59 = vpop.f32.mrf.mxu2  ;;  %2100 = vmatpush.msrb.mxu3 %v7391_v25  ;;  %1894 = vmatpush.msrb.mxu0 %v12265_v50  ;;  %v1759_v25 = vsub.f32 %v7749_v54, %v12096_v3  ;;  %v7853_v19 = vsub.f32 %v277_v12, %v7828_v36  ;;  %v273_v12 = vld [vmem:[%s12054_s1 + $0x258] sm:$0xff] }
 0x105   :  { %12272 = vst [vmem:[#allocation8_spill] sm:$0xff] %v7773_v39  ;;  %6160 = vmatmul.msk.f32.gmra.mxu3 %vm58_vm13, %v12234_v41  ;;  %1968 = vmatpush.msrb.mxu1 %v7452_v55 }
 0x106   :  { %12273 = vst [vmem:[#allocation9_spill] sm:$0xff] %v7775_v59  ;;  %v7784_v58 = vpop.f32.mrf.mxu3  ;;  %2035 = vmatpush.msrb.mxu2 %v12275_v47  ;;  %2102 = vmatpush.msrb.mxu3 %v7403_v31  ;;  %v7855_v47 = vand.u32 4294901760, %v275_v35 }
 0x107   :  { %12274 = vst [vmem:[#allocation10_spill] sm:$0xff] %v7784_v58  ;;  %1897 = vmatpush.msrb.mxu0 %v12267_v9  ;;  %1970 = vmatpush.msrb.mxu1 %v7468_v62  ;;  %v12095_v9 = vand.u32 4294901760, %v7801_v43 }
 0x108   :  { %2039 = vmatpush.msrb.mxu2 %v12276_v51  ;;  %2104 = vmatpush.msrb.mxu3 %v7421_v2  ;;  %v1760_v2 = vand.u32 4294901760, %v1759_v25  ;;  %v7866_v25 = vsub.f32 %v276_v5, %v7840_v63 }
 0x109   :  { %6157 = vmatmul.msk.f32.gmra.mxu1 %vm70_vm10, %v12234_v41  ;;  %6152 = vmatmul.msk.f32.gmra.mxu0 %vm57_vm9, %v12234_v41 }
 0x10a   :  { %1900 = vmatpush.msrb.mxu0 %v12270_v44  ;;  %1972 = vmatpush.msrb.mxu1 %v7485_v61  ;;  %v12281_v44 = vand.u32 4294901760, %v7520_v33 }
 0x10b   :  { %v7816_v31 = vpop.f32.mrf.mxu1  ;;  %2043 = vmatpush.msrb.mxu2 %v12278_v10  ;;  %2106 = vmatpush.msrb.mxu3 %v7452_v55  ;;  %v12098_v10 = vand.u32 4294901760, %v7853_v19 }
 0x10c   :  { %12277 = vst [vmem:[#allocation15_spill] sm:$0xff] %v7816_v31  ;;  %v7824_v50 = vpop.f32.mrf.mxu0  ;;  %v7826_v18 = vpop.f32.mrf.mxu2  ;;  %1761 = vmatmul.f32.gmra.mxu2 %v1760_v2  ;;  %1903 = vmatpush.msrb.mxu0 %v7455_v37  ;;  %v274_v37 = vld [vmem:[%s12054_s1 + $0x260] sm:$0xff]  ;;  %v12284_v2 = vand.u32 4294901760, %v7564_v22 }
 0x10d   :  { %12279 = vst [vmem:[#allocation16_spill] sm:$0xff] %v7824_v50  ;;  %1974 = vmatpush.msrb.mxu1 %v7509_v6  ;;  %2047 = vmatpush.msrb.mxu2 %v12281_v44  ;;  %v7868_v51 = vand.u32 4294901760, %v274_v37 }
 0x10e   :  { %12280 = vst [vmem:[#allocation17_spill] sm:$0xff] %v7826_v18  ;;  %v7838_v55 = vpop.f32.mrf.mxu3  ;;  %2108 = vmatpush.msrb.mxu3 %v7468_v62  ;;  %1906 = vmatpush.msrb.mxu0 %v7483_v27  ;;  %v12283_v62 = vand.u32 4294901760, %v7537_v21  ;;  %v1767_v27 = vsub.f32 %v7801_v43, %v12095_v9  ;;  %v12288_v9 = vand.u32 4294901760, %v7581_v46 }
 0x10f   :  { %12282 = vst [vmem:[#allocation18_spill] sm:$0xff] %v7838_v55  ;;  %6161 = vmatmul.msk.f32.gmra.mxu3 %vm71_vm14, %v12234_v41  ;;  %1976 = vmatpush.msrb.mxu1 %v7530_v15 }
 0x110   :  { %2051 = vmatpush.msrb.mxu2 %v12283_v62  ;;  %2110 = vmatpush.msrb.mxu3 %v7485_v61  ;;  %v1768_v44 = vand.u32 4294901760, %v1767_v27  ;;  %v7896_v62 = vand.u32 4294901760, %v273_v12  ;;  %v271_v27 = vld [vmem:[%s12054_s1 + $0x248] sm:$0xff] }
 0x111   :  { %1909 = vmatpush.msrb.mxu0 %v7505_v42  ;;  %1978 = vmatpush.msrb.mxu1 %v7544_v23 }
 0x112   :  { %2055 = vmatpush.msrb.mxu2 %v12284_v2  ;;  %2112 = vmatpush.msrb.mxu3 %v7509_v6  ;;  %v7892_v6 = vsub.f32 %v275_v35, %v7855_v47  ;;  %v272_v2 = vld [vmem:[%s12054_s1 + $0x250] sm:$0xff]  ;;  %v12099_v35 = vand.u32 4294901760, %v7866_v25 }
 0x113   :  { %v7876_v61 = vpop.f32.mrf.mxu1  ;;  %6158 = vmatmul.msk.f32.gmra.mxu1 %vm83_vm11, %v12234_v41  ;;  %6153 = vmatmul.msk.f32.gmra.mxu0 %vm70_vm10, %v12234_v41 }
 0x114   :  { %12285 = vst [vmem:[#allocation19_spill] sm:$0xff] %v7876_v61  ;;  %v7886_v42 = vpop.f32.mrf.mxu0  ;;  %v7888_v5 = vpop.f32.mrf.mxu2  ;;  %1912 = vmatpush.msrb.mxu0 %v7520_v33  ;;  %1980 = vmatpush.msrb.mxu1 %v7578_v7  ;;  %v7908_v33 = vsub.f32 %v274_v37, %v7868_v51  ;;  %v12102_v45 = vand.u32 4294901760, %v7892_v6  ;;  %v7921_v37 = vand.u32 4294901760, %v272_v2 }
 0x115   :  { %12286 = vst [vmem:[#allocation20_spill] sm:$0xff] %v7886_v42  ;;  %2059 = vmatpush.msrb.mxu2 %v12288_v9  ;;  %2114 = vmatpush.msrb.mxu3 %v7530_v15  ;;  %v12290_v9 = vand.u32 4294901760, %v7608_v20  ;;  %v2210_v15 = vsub.f32 %v7853_v19, %v12098_v10 }
 0x116   :  { %12287 = vst [vmem:[#allocation21_spill] sm:$0xff] %v7888_v5  ;;  %v7904_v3 = vpop.f32.mrf.mxu3  ;;  %1769 = vmatmul.f32.gmra.mxu2 %v1768_v44  ;;  %1915 = vmatpush.msrb.mxu0 %v7537_v21  ;;  %v7926_v21 = vsub.f32 %v273_v12, %v7896_v62  ;;  %v270_v44 = vld [vmem:[%s12054_s1 + $0x240] sm:$0xff]  ;;  %v7957_v1 = vsub.f32 %v272_v2, %v7921_v37 }
 0x117   :  { %12289 = vst [vmem:[#allocation22_spill] sm:$0xff] %v7904_v3  ;;  %1982 = vmatpush.msrb.mxu1 %v7591_v11  ;;  %2063 = vmatpush.msrb.mxu2 %v12290_v9  ;;  %v7940_v9 = vand.u32 4294901760, %v271_v27  ;;  %v2211_v10 = vand.u32 4294901760, %v2210_v15  ;;  %v12294_v15 = vand.u32 4294901760, %v7654_v29 }
 0x118   :  { %2116 = vmatpush.msrb.mxu3 %v7544_v23  ;;  %1918 = vmatpush.msrb.mxu0 %v7564_v22  ;;  %v2216_v23 = vsub.f32 %v7866_v25, %v12099_v35  ;;  %v2222_v35 = vsub.f32 %v7892_v6, %v12102_v45  ;;  %v12295_v45 = vand.u32 4294901760, %v7908_v33 }
 0x119   :  { %6162 = vmatmul.msk.f32.gmra.mxu3 %vm84_vm15, %v12234_v41  ;;  %1984 = vmatpush.msrb.mxu1 %v7610_v14 }
 0x11a   :  { %2067 = vmatpush.msrb.mxu2 %v1853_v26  ;;  %2118 = vmatpush.msrb.mxu3 %v7578_v7  ;;  %v7959_v26 = vand.u32 4294901760, %v270_v44  ;;  %v269_v7 = vld [vmem:[%s12054_s1 + $0x238] sm:$0xff]  ;;  %v2217_v2 = vand.u32 4294901760, %v2216_v23  ;;  %v12104_v23 = vand.u32 4294901760, %v7957_v1 }
 0x11b   :  { %v7945_v12 = vpop.f32.mrf.mxu1  ;;  %1921 = vmatpush.msrb.mxu0 %v7581_v46  ;;  %1986 = vmatpush.msrb.mxu1 %v7629_v13  ;;  %v12103_v46 = vand.u32 4294901760, %v7926_v21 }
 0x11c   :  { %12291 = vst [vmem:[#allocation23_spill] sm:$0xff] %v7945_v12  ;;  %v7952_v17 = vpop.f32.mrf.mxu0  ;;  %v7954_v22 = vpop.f32.mrf.mxu2  ;;  %2071 = vmatpush.msrb.mxu2 %v1859_v4  ;;  %2120 = vmatpush.msrb.mxu3 %v7591_v11  ;;  %v2228_v12 = vsub.f32 %v7908_v33, %v12295_v45  ;;  %v7980_v4 = vsub.f32 %v271_v27, %v7940_v9  ;;  %v12297_v11 = vand.u32 4294901760, %v7650_v38  ;;  %v2223_v45 = vand.u32 4294901760, %v2222_v35 }
 0x11d   :  { %12292 = vst [vmem:[#allocation24_spill] sm:$0xff] %v7952_v17  ;;  %1990 = vmatmul.f32.vlgmr.msrb.gmra.mxu1 %v12294_v15  ;;  %6154 = vmatmul.msk.f32.gmra.mxu0 %vm83_vm11, %v12234_v41  ;;  %v7985_v15 = vand.u32 4294901760, %v269_v7  ;;  %v7993_v27 = vsub.f32 %v270_v44, %v7959_v26 }
 0x11e   :  { %12293 = vst [vmem:[#allocation25_spill] sm:$0xff] %v7954_v22  ;;  %v7977_v22 = vpop.f32.mrf.mxu3  ;;  %1924 = vmatpush.msrb.mxu0 %v7608_v20  ;;  %2075 = vmatpush.msrb.mxu2 %v12297_v11  ;;  %v2234_v20 = vsub.f32 %v7926_v21, %v12103_v46  ;;  %v266_v46 = vld [vmem:[%s12054_s1 + $0x220] sm:$0xff] }
 0x11f   :  { %12296 = vst [vmem:[#allocation26_spill] sm:$0xff] %v7977_v22  ;;  %2122 = vmatpush.msrb.mxu3 %v7610_v14  ;;  %2212 = vmatpush.msra.mxu1 %v2211_v10  ;;  %v267_v14 = vld [vmem:[%s12054_s1 + $0x228] sm:$0xff]  ;;  %v2229_v10 = vand.u32 4294901760, %v2228_v12  ;;  %v8015_v11 = vsub.f32 %v269_v7, %v7985_v15  ;;  %v8045_v7 = vand.u32 4294901760, %v266_v46 }
 0x120   :  { %1927 = vmatpush.msrb.mxu0 %v7627_v8  ;;  %6163 = vmatmul.msk.f32.vlgmr.msrb.gmra.mxu2 %vm45_vm12, %v12234_v41  ;;  %v8008_v8 = vand.u32 4294901760, %v268_v24  ;;  %v2235_v35 = vand.u32 4294901760, %v2234_v20  ;;  %v12303_v20 = vand.u32 4294901760, %v7702_v52 }
 0x121   :  { %2124 = vmatpush.msrb.mxu3 %v7629_v13  ;;  %2218 = vmatpush.msra.mxu1 %v2217_v2  ;;  %v2240_v13 = vsub.f32 %v7957_v1, %v12104_v23  ;;  %v8032_v2 = vand.u32 4294901760, %v267_v14 }
 0x122   :  { %2322 = vmatpush.msra.mxu2 %v7853_v19  ;;  %1930 = vmatpush.msrb.mxu0 %v7642_v40 }
 0x123   :  { %v8012_v44 = vpop.f32.mrf.mxu1  ;;  %6167 = vmatmul.msk.f32.vlgmr.msrb.gmra.mxu3 %vm45_vm12, %v12234_v41  ;;  %2224 = vmatpush.msra.mxu1 %v2223_v45  ;;  %v12301_v45 = vand.u32 4294901760, %v7980_v4 }
 0x124   :  { %12298 = vst [vmem:[#allocation27_spill] sm:$0xff] %v8012_v44  ;;  %v8027_v40 = vpop.f32.mrf.mxu0  ;;  %v8029_v12 = vpop.f32.mrf.mxu2  ;;  %2325 = vmatpush.msra.mxu2 %v7866_v25  ;;  %2390 = vmatpush.msra.mxu3 %v7828_v36 }
 0x125   :  { %12299 = vst [vmem:[#allocation28_spill] sm:$0xff] %v8027_v40  ;;  %1933 = vmatpush.msrb.mxu0 %v7650_v38  ;;  %2230 = vmatpush.msra.mxu1 %v2229_v10  ;;  %v2246_v23 = vsub.f32 %v7980_v4, %v12301_v45  ;;  %v265_v40 = vld [vmem:[%s12054_s1 + $0x218] sm:$0xff]  ;;  %v2241_v10 = vand.u32 4294901760, %v2240_v13  ;;  %v264_v38 = vld [vmem:[%s12054_s1 + $0x210] sm:$0xff] }
 0x126   :  { %12300 = vst [vmem:[#allocation29_spill] sm:$0xff] %v8029_v12  ;;  %v8040_v22 = vpop.f32.mrf.mxu3  ;;  %v8043_v12 = vsub.f32 %v268_v24, %v8008_v8  ;;  %2328 = vmatpush.msra.mxu2 %v7892_v6  ;;  %2392 = vmatpush.msra.mxu3 %v7840_v63  ;;  %v12304_v24 = vand.u32 4294901760, %v7993_v27  ;;  %v8063_v58 = vand.u32 4294901760, %v265_v40  ;;  %v8093_v59 = vand.u32 4294901760, %v264_v38 }
 0x127   :  { %12302 = vst [vmem:[#allocation30_spill] sm:$0xff] %v8040_v22  ;;  %1996 = vmatmul.f32.gmra.mxu1 %v12303_v20  ;;  %1936 = vmatmul.f32.vlgmr.msrb.gmra.mxu0 %v7654_v29  ;;  %v8060_v22 = vsub.f32 %v267_v14, %v8032_v2  ;;  %v2247_v29 = vand.u32 4294901760, %v2246_v23  ;;  %v8072_v20 = vsub.f32 %v266_v46, %v8045_v7  ;;  %v12305_v14 = vand.u32 4294901760, %v8015_v11  ;;  %v263_v23 = vld [vmem:[%s12054_s1 + $0x208] sm:$0xff] }
 0x128   :  { %v2252_v45 = vsub.f32 %v7993_v27, %v12304_v24  ;;  %2143 = vmatpush.msra.mxu0 %v7828_v36  ;;  %2236 = vmatpush.msra.mxu1 %v2235_v35 }
 0x129   :  { %2331 = vmatpush.msra.mxu2 %v7908_v33  ;;  %2394 = vmatpush.msra.mxu3 %v7855_v47  ;;  %v2258_v35 = vsub.f32 %v8015_v11, %v12305_v14  ;;  %v8098_v14 = vsub.f32 %v265_v40, %v8063_v58  ;;  %v8113_v40 = vand.u32 4294901760, %v263_v23  ;;  %v12313_v5 = vand.u32 4294901760, %v8072_v20 }
 0x12a   :  { %6164 = vmatmul.msk.f32.gmra.mxu2 %vm58_vm13, %v12234_v41  ;;  %2145 = vmatpush.msra.mxu0 %v7840_v63  ;;  %v2253_v46 = vand.u32 4294901760, %v2252_v45  ;;  %v12309_v45 = vand.u32 4294901760, %v8043_v12 }
 0x12b   :  { %v8082_v24 = vpop.f32.mrf.mxu1  ;;  %2242 = vmatpush.msra.mxu1 %v2241_v10  ;;  %2334 = vmatpush.msra.mxu2 %v7926_v21  ;;  %v262_v10 = vld [vmem:[%s12054_s1 + $0x200] sm:$0xff]  ;;  %v2259_v44 = vand.u32 4294901760, %v2258_v35  ;;  %v12312_v35 = vand.u32 4294901760, %v7749_v54 }
 0x12c   :  { %12306 = vst [vmem:[#allocation31_spill] sm:$0xff] %v8082_v24  ;;  %v8089_v61 = vpop.f32.mrf.mxu0  ;;  %v8091_v3 = vpop.f32.mrf.mxu2  ;;  %2396 = vmatpush.msra.mxu3 %v7868_v51  ;;  %2147 = vmatpush.msra.mxu0 %v7855_v47  ;;  %v2264_v13 = vsub.f32 %v8043_v12, %v12309_v45  ;;  %v8122_v45 = vsub.f32 %v264_v38, %v8093_v59  ;;  %v8124_v24 = vand.u32 4294901760, %v262_v10 }
 0x12d   :  { %12307 = vst [vmem:[#allocation32_spill] sm:$0xff] %v8089_v61  ;;  %6168 = vmatmul.msk.f32.gmra.mxu3 %vm58_vm13, %v12234_v41  ;;  %2248 = vmatpush.msra.mxu1 %v2247_v29  ;;  %v12311_v29 = vand.u32 4294901760, %v8060_v22  ;;  %v8136_v38 = vsub.f32 %v263_v23, %v8113_v40  ;;  %v12325_v61 = vand.u32 4294901760, %v7801_v43 }
 0x12e   :  { %12308 = vst [vmem:[#allocation33_spill] sm:$0xff] %v8091_v3  ;;  %v8111_v3 = vpop.f32.mrf.mxu3  ;;  %2337 = vmatpush.msra.mxu2 %v7957_v1  ;;  %2398 = vmatpush.msra.mxu3 %v7896_v62 }
 0x12f   :  { %12310 = vst [vmem:[#allocation34_spill] sm:$0xff] %v8111_v3  ;;  %2149 = vmatpush.msra.mxu0 %v7868_v51  ;;  %2254 = vmatpush.msra.mxu1 %v2253_v46  ;;  %v2270_v17 = vsub.f32 %v8060_v22, %v12311_v29  ;;  %v2265_v46 = vand.u32 4294901760, %v2264_v13  ;;  %v2276_v29 = vsub.f32 %v8072_v20, %v12313_v5 }
 0x130   :  { %2340 = vmatpush.msra.mxu2 %v7980_v4  ;;  %2400 = vmatpush.msra.mxu3 %v7921_v37  ;;  %12314 = vst [vmem:[#allocation35_spill] sm:$0xff] %v8136_v38  ;;  %v8149_v5 = vsub.f32 %v262_v10, %v8124_v24  ;;  %v293_v10 = vld [vmem:[%s12054_s1 + $0x2f8] sm:$0xff] }
 0x131   :  { %2002 = vmatmul.f32.gmra.mxu1 %v12312_v35  ;;  %1941 = vmatmul.f32.gmra.mxu0 %v7702_v52  ;;  %v2271_v35 = vand.u32 4294901760, %v2270_v17  ;;  %v2277_v23 = vand.u32 4294901760, %v2276_v29  ;;  %v12322_v52 = vld [vmem:[#allocation5_spill] sm:$0xff]  ;;  %v8184_v39 = vand.u32 4294901760, %v293_v10 }
 0x132   :  { %2151 = vmatpush.msra.mxu0 %v7896_v62  ;;  %2260 = vmatpush.msra.mxu1 %v2259_v44  ;;  %12318 = vst [vmem:[#allocation39_spill] sm:$0xff] %v8149_v5  ;;  %v12319_v44 = vand.u32 4294901760, %v8098_v14 }
 0x133   :  { %v8139_v34 = vpop.f32.mrf.mxu1  ;;  %2343 = vmatpush.msra.mxu2 %v7993_v27  ;;  %2402 = vmatpush.msra.mxu3 %v7940_v9  ;;  %v8213_v55 = vsub.f32 %v293_v10, %v8184_v39 }
 0x134   :  { %12315 = vst [vmem:[#allocation36_spill] sm:$0xff] %v8139_v34  ;;  %v8144_v13 = vpop.f32.mrf.mxu0  ;;  %v8146_v3 = vpop.f32.mrf.mxu2  ;;  %6165 = vmatmul.msk.f32.gmra.mxu2 %vm71_vm14, %v12234_v41  ;;  %2153 = vmatpush.msra.mxu0 %v7921_v37  ;;  %v2282_v17 = vsub.f32 %v8098_v14, %v12319_v44 }
 0x135   :  { %12316 = vst [vmem:[#allocation37_spill] sm:$0xff] %v8144_v13  ;;  %2266 = vmatpush.msra.mxu1 %v2265_v46  ;;  %2346 = vmatpush.msra.mxu2 %v8015_v11  ;;  %v12321_v46 = vand.u32 4294901760, %v8122_v45 }
 0x136   :  { %12317 = vst [vmem:[#allocation38_spill] sm:$0xff] %v8146_v3  ;;  %v8161_v34 = vpop.f32.mrf.mxu3  ;;  %2404 = vmatpush.msra.mxu3 %v7959_v26  ;;  %2155 = vmatpush.msra.mxu0 %v7940_v9  ;;  %v292_v3 = vld [vmem:[%s12054_s1 + $0x2f0] sm:$0xff]  ;;  %v2283_v13 = vand.u32 4294901760, %v2282_v17  ;;  %v291_v17 = vld [vmem:[%s12054_s1 + $0x2e8] sm:$0xff] }
 0x137   :  { %12320 = vst [vmem:[#allocation40_spill] sm:$0xff] %v8161_v34  ;;  %6169 = vmatmul.msk.f32.gmra.mxu3 %vm71_vm14, %v12234_v41  ;;  %2272 = vmatpush.msra.mxu1 %v2271_v35  ;;  %v2288_v29 = vsub.f32 %v8122_v45, %v12321_v46  ;;  %v8177_v34 = vadd.s32 512, %v12322_v52  ;;  %v12323_v35 = vand.u32 4294901760, %v8136_v38  ;;  %v8194_v53 = vand.u32 4294901760, %v292_v3 }
 0x138   :  { %2349 = vmatpush.msra.mxu2 %v8043_v12  ;;  %2406 = vmatpush.msra.mxu3 %v7985_v15 }
 0x139   :  { %2157 = vmatpush.msra.mxu0 %v7959_v26  ;;  %2278 = vmatpush.msra.mxu1 %v2277_v23  ;;  %v2294_v46 = vsub.f32 %v8136_v38, %v12323_v35  ;;  %v2289_v23 = vand.u32 4294901760, %v2288_v29  ;;  %v12326_v35 = vand.u32 4294901760, %v8149_v5  ;;  %vm46_vm0 = vcmp.eq.s32.totalorder %v8177_v34, %v6868_v0 }
 0x13a   :  { %2352 = vmatpush.msra.mxu2 %v8060_v22  ;;  %2408 = vmatpush.msra.mxu3 %v8008_v8  ;;  %v8234_v10 = vsub.f32 %v292_v3, %v8194_v53  ;;  %vm59_vm1 = vcmp.eq.s32.totalorder %v8177_v34, %v6896_v48  ;;  %vm72_vm2 = vcmp.eq.s32.totalorder %v8177_v34, %v6885_v57 }
 0x13b   :  { %v8192_v44 = vpop.f32.mrf.mxu1  ;;  %2008 = vmatmul.f32.gmra.mxu1 %v12325_v61  ;;  %1946 = vmatmul.f32.gmra.mxu0 %v7749_v54  ;;  %v2300_v31 = vsub.f32 %v8149_v5, %v12326_v35  ;;  %v2295_v54 = vand.u32 4294901760, %v2294_v46  ;;  %v8217_v61 = vand.u32 4294901760, %v291_v17  ;;  %v290_v35 = vld [vmem:[%s12054_s1 + $0x2e0] sm:$0xff]  ;;  %vm85_vm3 = vcmp.eq.s32.totalorder %v8177_v34, %v6917_v28  ;;  %v300_v34 = vld [vmem:[%s12054_s1 + $0x330] sm:$0xff] }
 0x13c   :  { %12324 = vst [vmem:[#allocation41_spill] sm:$0xff] %v8192_v44  ;;  %v8207_v44 = vpop.f32.mrf.mxu0  ;;  %v8209_v42 = vpop.f32.mrf.mxu2  ;;  %2159 = vmatpush.msra.mxu0 %v7985_v15  ;;  %2284 = vmatpush.msra.mxu1 %v2283_v13  ;;  %v6075_v13 = vsel %vm46_vm0, 1.0, %v12235_v56 }
 0x13d   :  { %12327 = vst [vmem:[#allocation42_spill] sm:$0xff] %v8207_v44  ;;  %2355 = vmatpush.msra.mxu2 %v8072_v20  ;;  %2410 = vmatpush.msra.mxu3 %v8032_v2  ;;  %v2301_v46 = vand.u32 4294901760, %v2300_v31  ;;  %v8243_v44 = vand.u32 4294901760, %v290_v35  ;;  %v2175_v3 = vsub.f32 %v6075_v13, %v6075_v13  ;;  %v8250_v31 = vsub.f32 %v291_v17, %v8217_v61 }
 0x13e   :  { %12328 = vst [vmem:[#allocation43_spill] sm:$0xff] %v8209_v42  ;;  %v8219_v29 = vpop.f32.mrf.mxu3  ;;  %6166 = vmatmul.msk.f32.gmra.mxu2 %vm84_vm15, %v12234_v41  ;;  %2161 = vmatpush.msra.mxu0 %v8008_v8 }
 0x13f   :  { %12329 = vst [vmem:[#allocation44_spill] sm:$0xff] %v8219_v29  ;;  %2290 = vmatpush.msra.mxu1 %v2289_v23  ;;  %2358 = vmatpush.msra.mxu2 %v8098_v14  ;;  %v289_v29 = vld [vmem:[%s12054_s1 + $0x2d8] sm:$0xff]  ;;  %v288_v23 = vld [vmem:[%s12054_s1 + $0x2d0] sm:$0xff]  ;;  %v8273_v42 = vsub.f32 %v290_v35, %v8243_v44  ;;  %v286_v35 = vld [vmem:[%s12054_s1 + $0x2c0] sm:$0xff]  ;;  %v12340_v50 = vand.u32 4294901760, %v8250_v31 }
 0x140   :  { %12330 = vst [vmem:[#allocation45_spill] sm:$0xff] %v8234_v10  ;;  %2412 = vmatpush.msra.mxu3 %v8045_v7  ;;  %2163 = vmatpush.msra.mxu0 %v8032_v2  ;;  %v8258_v32 = vand.u32 4294901760, %v289_v29  ;;  %v8275_v30 = vand.u32 4294901760, %v288_v23 }
 0x141   :  { %6170 = vmatmul.msk.f32.gmra.mxu3 %vm84_vm15, %v12234_v41  ;;  %2296 = vmatpush.msra.mxu1 %v2295_v54  ;;  %12331 = vst [vmem:[#allocation46_spill] sm:$0xff] %v8250_v31  ;;  %v12335_v54 = vand.u32 4294901760, %v8213_v55 }
 0x142   :  { %2361 = vmatpush.msra.mxu2 %v8122_v45  ;;  %2414 = vmatpush.msra.mxu3 %v8063_v58  ;;  %v8296_v60 = vsub.f32 %v289_v29, %v8258_v32  ;;  %v6088_v29 = vsel %vm59_vm1, 1.0, %v12235_v56  ;;  %v8312_v16 = vsub.f32 %v288_v23, %v8275_v30  ;;  %v12345_v23 = vand.u32 4294901760, %v8273_v42 }
 0x143   :  { %v8260_v18 = vpop.f32.mrf.mxu1  ;;  %2165 = vmatpush.msra.mxu0 %v8045_v7  ;;  %2302 = vmatpush.msra.mxu1 %v2301_v46  ;;  %v2644_v13 = vsub.f32 %v8213_v55, %v12335_v54  ;;  %v287_v46 = vld [vmem:[%s12054_s1 + $0x2c8] sm:$0xff] }
 0x144   :  { %12332 = vst [vmem:[#allocation47_spill] sm:$0xff] %v8260_v18  ;;  %v8263_v49 = vpop.f32.mrf.mxu0  ;;  %v8265_v17 = vpop.f32.mrf.mxu2  ;;  %2364 = vmatpush.msra.mxu2 %v8136_v38  ;;  %2416 = vmatpush.msra.mxu3 %v8093_v59 }
 0x145   :  { %12333 = vst [vmem:[#allocation48_spill] sm:$0xff] %v8263_v49  ;;  %6171 = vmatmul.msk.f32.vlgmr.msra.gmra.mxu1 %vm46_vm0, %v12234_v41  ;;  %1951 = vmatmul.f32.gmra.mxu0 %v7801_v43  ;;  %v12337_v49 = vand.u32 4294901760, %v8234_v10  ;;  %v8300_v43 = vand.u32 4294901760, %v287_v46 }
 0x146   :  { %12334 = vst [vmem:[#allocation49_spill] sm:$0xff] %v8265_v17  ;;  %v2176_v17 = vand.u32 4294901760, %v2175_v3  ;;  %v8288_v54 = vpop.f32.mrf.mxu3  ;;  %2167 = vmatpush.msra.mxu0 %v8063_v58  ;;  %2367 = vmatpush.msra.mxu2 %v8149_v5  ;;  %v2656_v5 = vsub.f32 %v8250_v31, %v12340_v50 }
 0x147   :  { %12336 = vst [vmem:[#allocation50_spill] sm:$0xff] %v8288_v54  ;;  %v2650_v18 = vsub.f32 %v8234_v10, %v12337_v49  ;;  %2418 = vmatpush.msra.mxu3 %v8113_v40  ;;  %2528 = vmatpush.msrb.mxu1 %v7828_v36  ;;  %v2645_v54 = vand.u32 4294901760, %v2644_v13  ;;  %v285_v13 = vld [vmem:[%s12054_s1 + $0x2b8] sm:$0xff]  ;;  %v8325_v10 = vand.u32 4294901760, %v286_v35  ;;  %v8331_v50 = vsub.f32 %v287_v46, %v8300_v43 }
 0x148   :  { %12338 = vst [vmem:[#allocation51_spill] sm:$0xff] %v8296_v60  ;;  %2169 = vmatpush.msra.mxu0 %v8093_v59  ;;  %2370 = vmatmul.f32.vlgmr.msra.gmra.mxu2 %v2175_v3  ;;  %v2177_v36 = vsub.f32 %v2175_v3, %v2176_v17  ;;  %v284_v3 = vld [vmem:[%s12054_s1 + $0x2b0] sm:$0xff] }
 0x149   :  { %12339 = vst [vmem:[#allocation52_spill] sm:$0xff] %v8312_v16  ;;  %2420 = vmatpush.msra.mxu3 %v8124_v24  ;;  %2530 = vmatpush.msrb.mxu1 %v7840_v63  ;;  %v2651_v49 = vand.u32 4294901760, %v2650_v18  ;;  %v2183_v63 = vsub.f32 %v6088_v29, %v6088_v29  ;;  %v8345_v29 = vand.u32 4294901760, %v285_v13 }
 0x14a   :  { %2577 = vmatpush.msrb.mxu2 %v8184_v39  ;;  %2171 = vmatpush.msra.mxu0 %v8113_v40  ;;  %12342 = vst [vmem:[#allocation54_spill] sm:$0xff] %v8331_v50  ;;  %v2178_v46 = vand.u32 4294901760, %v2177_v36 }
 0x14b   :  { %v8327_v38 = vpop.f32.mrf.mxu1  ;;  %2424 = vmatmul.f32.vlgmr.msra.gmra.mxu3 %v2176_v17  ;;  %2532 = vmatpush.msrb.mxu1 %v7855_v47  ;;  %v2662_v17 = vsub.f32 %v8273_v42, %v12345_v23  ;;  %v8356_v23 = vsub.f32 %v286_v35, %v8325_v10  ;;  %v8358_v47 = vand.u32 4294901760, %v284_v3  ;;  %v12348_v35 = vand.u32 4294901760, %v7853_v19  ;;  %v282_v19 = vld [vmem:[%s12054_s1 + $0x2a0] sm:$0xff] }
 0x14c   :  { %12341 = vst [vmem:[#allocation53_spill] sm:$0xff] %v8327_v38  ;;  %v8336_v31 = vpop.f32.mrf.mxu0  ;;  %v8338_v18 = vpop.f32.mrf.mxu2  ;;  %2579 = vmatpush.msrb.mxu2 %v8194_v53  ;;  %2646 = vmatpush.msrb.mxu3 %v2645_v54  ;;  %v2657_v38 = vand.u32 4294901760, %v2656_v5  ;;  %v12347_v54 = vand.u32 4294901760, %v8296_v60  ;;  %v2184_v5 = vand.u32 4294901760, %v2183_v63 }
 0x14d   :  { %12343 = vst [vmem:[#allocation55_spill] sm:$0xff] %v8336_v31  ;;  %2173 = vmatpush.msra.mxu0 %v8124_v24  ;;  %2534 = vmatpush.msrb.mxu1 %v7868_v51  ;;  %v283_v51 = vld [vmem:[%s12054_s1 + $0x2a8] sm:$0xff]  ;;  %v2663_v36 = vand.u32 4294901760, %v2662_v17 }
 0x14e   :  { %12344 = vst [vmem:[#allocation56_spill] sm:$0xff] %v8338_v18  ;;  %v8349_v31 = vpop.f32.mrf.mxu3  ;;  %2581 = vmatpush.msrb.mxu2 %v8217_v61  ;;  %2652 = vmatpush.msrb.mxu3 %v2651_v49  ;;  %v2668_v18 = vsub.f32 %v8296_v60, %v12347_v54  ;;  %v12349_v54 = vand.u32 4294901760, %v8312_v16  ;;  %v8377_v60 = vsub.f32 %v285_v13, %v8345_v29  ;;  %v6101_v13 = vsel %vm72_vm2, 1.0, %v12235_v56 }
 0x14f   :  { %12346 = vst [vmem:[#allocation57_spill] sm:$0xff] %v8349_v31  ;;  %6172 = vmatmul.msk.f32.gmra.mxu1 %vm59_vm1, %v12234_v41  ;;  %2179 = vmatmul.f32.vlgmr.msra.gmra.mxu0 %v2178_v46  ;;  %v8380_v46 = vand.u32 4294901760, %v283_v51  ;;  %v2185_v49 = vsub.f32 %v2183_v63, %v2184_v5 }
 0x150   :  { %2449 = vmatpush.msrb.mxu0 %v12348_v35  ;;  %2536 = vmatpush.msrb.mxu1 %v7896_v62  ;;  %v2674_v31 = vsub.f32 %v8312_v16, %v12349_v54  ;;  %v12350_v62 = vand.u32 4294901760, %v7866_v25  ;;  %v2669_v17 = vand.u32 4294901760, %v2668_v18  ;;  %v12352_v25 = vand.u32 4294901760, %v8331_v50 }
 0x151   :  { %2583 = vmatpush.msrb.mxu2 %v8243_v44  ;;  %2658 = vmatpush.msrb.mxu3 %v2657_v38  ;;  %v8393_v38 = vsub.f32 %v284_v3, %v8358_v47  ;;  %v12355_v3 = vand.u32 4294901760, %v7892_v6  ;;  %v12357_v6 = vand.u32 4294901760, %v8356_v23 }
 0x152   :  { %2375 = vmatmul.f32.gmra.mxu2 %v2183_v63  ;;  %2453 = vmatpush.msrb.mxu0 %v12350_v62  ;;  %v2680_v18 = vsub.f32 %v8331_v50, %v12352_v25  ;;  %v281_v62 = vld [vmem:[%s12054_s1 + $0x298] sm:$0xff]  ;;  %v8412_v63 = vand.u32 4294901760, %v282_v19  ;;  %v2191_v25 = vsub.f32 %v6101_v13, %v6101_v13  ;;  %v8416_v50 = vsub.f32 %v283_v51, %v8380_v46 }
 0x153   :  { %v8395_v54 = vpop.f32.mrf.mxu1  ;;  %2538 = vmatpush.msrb.mxu1 %v7921_v37  ;;  %2585 = vmatpush.msrb.mxu2 %v8258_v32  ;;  %v2675_v37 = vand.u32 4294901760, %v2674_v31  ;;  %v2686_v31 = vsub.f32 %v8356_v23, %v12357_v6  ;;  %v12358_v51 = vand.u32 4294901760, %v7908_v33  ;;  %v2186_v13 = vand.u32 4294901760, %v2185_v49  ;;  %v279_v33 = vld [vmem:[%s12054_s1 + $0x288] sm:$0xff] }
 0x154   :  { %12351 = vst [vmem:[#allocation58_spill] sm:$0xff] %v8395_v54  ;;  %v8405_v16 = vpop.f32.mrf.mxu0  ;;  %v8407_v35 = vpop.f32.mrf.mxu2  ;;  %2664 = vmatpush.msrb.mxu3 %v2663_v36  ;;  %2457 = vmatpush.msrb.mxu0 %v12355_v3  ;;  %v2681_v3 = vand.u32 4294901760, %v2680_v18  ;;  %v8434_v54 = vadd.s32 640, %v12322_v52  ;;  %v8468_v49 = vand.u32 4294901760, %v279_v33 }
 0x155   :  { %12353 = vst [vmem:[#allocation59_spill] sm:$0xff] %v8405_v16  ;;  %2430 = vmatmul.f32.gmra.mxu3 %v2184_v5  ;;  %2540 = vmatpush.msrb.mxu1 %v7940_v9  ;;  %v8428_v9 = vand.u32 4294901760, %v281_v62  ;;  %v8441_v5 = vsub.f32 %v282_v19, %v8412_v63  ;;  %v12360_v19 = vand.u32 4294901760, %v7926_v21  ;;  %v2687_v18 = vand.u32 4294901760, %v2686_v31 }
 0x156   :  { %12354 = vst [vmem:[#allocation60_spill] sm:$0xff] %v8407_v35  ;;  %v280_v35 = vld [vmem:[%s12054_s1 + $0x290] sm:$0xff]  ;;  %v8421_v36 = vpop.f32.mrf.mxu3  ;;  %2587 = vmatpush.msrb.mxu2 %v8275_v30  ;;  %2670 = vmatpush.msrb.mxu3 %v2669_v17  ;;  %v12359_v17 = vand.u32 4294901760, %v8377_v60  ;;  %vm47_vm4 = vcmp.eq.s32.totalorder %v8434_v54, %v6868_v0  ;;  %vm60_vm5 = vcmp.eq.s32.totalorder %v8434_v54, %v6896_v48 }
 0x157   :  { %12356 = vst [vmem:[#allocation61_spill] sm:$0xff] %v8421_v36  ;;  %2461 = vmatpush.msrb.mxu0 %v12358_v51  ;;  %2542 = vmatpush.msrb.mxu1 %v7959_v26  ;;  %v8443_v36 = vand.u32 4294901760, %v280_v35  ;;  %v2192_v26 = vand.u32 4294901760, %v2191_v25  ;;  %vm73_vm6 = vcmp.eq.s32.totalorder %v8434_v54, %v6885_v57  ;;  %vm86_vm7 = vcmp.eq.s32.totalorder %v8434_v54, %v6917_v28 }
 0x158   :  { %2589 = vmatpush.msrb.mxu2 %v8300_v43  ;;  %2676 = vmatpush.msrb.mxu3 %v2675_v37  ;;  %v2692_v6 = vsub.f32 %v8377_v60, %v12359_v17  ;;  %v12361_v37 = vand.u32 4294901760, %v8393_v38  ;;  %v8462_v17 = vsub.f32 %v281_v62, %v8428_v9  ;;  %v12364_v62 = vand.u32 4294901760, %v7957_v1 }
 0x159   :  { %6173 = vmatmul.msk.f32.gmra.mxu1 %vm72_vm2, %v12234_v41  ;;  %2187 = vmatmul.f32.gmra.mxu0 %v2186_v13  ;;  %v278_v13 = vld [vmem:[%s12054_s1 + $0x280] sm:$0xff]  ;;  %v12366_v1 = vand.u32 4294901760, %v8416_v50 }
 0x15a   :  { %2465 = vmatpush.msrb.mxu0 %v12360_v19  ;;  %2544 = vmatpush.msrb.mxu1 %v7985_v15  ;;  %v2698_v51 = vsub.f32 %v8393_v38, %v12361_v37  ;;  %v2693_v31 = vand.u32 4294901760, %v2692_v6  ;;  %v6114_v19 = vsel %vm85_vm3, 1.0, %v12235_v56  ;;  %v8484_v37 = vsub.f32 %v280_v35, %v8443_v36 }
 0x15b   :  { %2591 = vmatpush.msrb.mxu2 %v8325_v10  ;;  %2682 = vmatpush.msrb.mxu3 %v2681_v3  ;;  %v8486_v16 = vpop.f32.mrf.mxu1  ;;  %v2704_v6 = vsub.f32 %v8416_v50, %v12366_v1  ;;  %v12368_v3 = vand.u32 4294901760, %v7980_v4  ;;  %v6076_v1 = vsel %vm47_vm4, 1.0, %v12235_v56  ;;  %v12369_v4 = vand.u32 4294901760, %v8441_v5 }
 0x15c   :  { %v8472_v21 = vpop.f32.mrf.mxu0  ;;  %v8474_v15 = vpop.f32.mrf.mxu2  ;;  %2380 = vmatmul.f32.gmra.mxu2 %v2191_v25  ;;  %2469 = vmatpush.msrb.mxu0 %v12364_v62  ;;  %12365 = vst [vmem:[#allocation64_spill] sm:$0xff] %v8486_v16  ;;  %v8493_v62 = vand.u32 4294901760, %v278_v13  ;;  %v2699_v35 = vand.u32 4294901760, %v2698_v51  ;;  %v2715_v16 = vand.u32 4294901760, %v8462_v17 }
 0x15d   :  { %12362 = vst [vmem:[#allocation62_spill] sm:$0xff] %v8472_v21  ;;  %2546 = vmatpush.msrb.mxu1 %v8008_v8  ;;  %2593 = vmatpush.msrb.mxu2 %v8345_v29  ;;  %v2199_v8 = vsub.f32 %v6114_v19, %v6114_v19  ;;  %v2705_v51 = vand.u32 4294901760, %v2704_v6  ;;  %v12373_v6 = vand.u32 4294901760, %v8015_v11 }
 0x15e   :  { %12363 = vst [vmem:[#allocation63_spill] sm:$0xff] %v8474_v15  ;;  %v2193_v15 = vsub.f32 %v2191_v25, %v2192_v26  ;;  %v8495_v21 = vpop.f32.mrf.mxu3  ;;  %2688 = vmatpush.msrb.mxu3 %v2687_v18  ;;  %2473 = vmatpush.msrb.mxu0 %v12368_v3  ;;  %v8502_v25 = vsub.f32 %v279_v33, %v8468_v49 }
 0x15f   :  { %12367 = vst [vmem:[#allocation65_spill] sm:$0xff] %v8495_v21  ;;  %2436 = vmatmul.f32.gmra.mxu3 %v2192_v26  ;;  %2548 = vmatpush.msrb.mxu1 %v8032_v2  ;;  %v2710_v18 = vsub.f32 %v8441_v5, %v12369_v4  ;;  %v12123_v26 = vand.u32 4294901760, %v8484_v37  ;;  %v12370_v2 = vand.u32 4294901760, %v7993_v27  ;;  %v8517_v19 = vsub.f32 %v278_v13, %v8493_v62 }
 0x160   :  { %2595 = vmatpush.msrb.mxu2 %v8358_v47  ;;  %2694 = vmatpush.msrb.mxu3 %v2693_v31  ;;  %v2194_v33 = vand.u32 4294901760, %v2193_v15  ;;  %v2716_v31 = vsub.f32 %v8462_v17, %v2715_v16  ;;  %v8523_v3 = vsub.f32 %v6076_v1, %v6076_v1  ;;  %v2200_v27 = vand.u32 4294901760, %v2199_v8 }
 0x161   :  { %2477 = vmatpush.msrb.mxu0 %v12370_v2  ;;  %2550 = vmatpush.msrb.mxu1 %v8045_v7  ;;  %v12121_v7 = vand.u32 4294901760, %v8502_v25  ;;  %v2722_v1 = vsub.f32 %v8484_v37, %v12123_v26  ;;  %v12117_v4 = vand.u32 4294901760, %v8517_v19  ;;  %v12416_v26 = vand.u32 4294901760, %v8441_v5 }
 0x162   :  { %2597 = vmatpush.msrb.mxu2 %v8380_v46  ;;  %2700 = vmatpush.msrb.mxu3 %v2699_v35  ;;  %v2711_v35 = vand.u32 4294901760, %v2710_v18  ;;  %v2717_v11 = vand.u32 4294901760, %v2716_v31  ;;  %v2201_v18 = vsub.f32 %v2199_v8, %v2200_v27 }
 0x163   :  { %6174 = vmatmul.msk.f32.gmra.mxu1 %vm85_vm3, %v12234_v41  ;;  %2195 = vmatmul.f32.gmra.mxu0 %v2194_v33  ;;  %v12375_v33 = vand.u32 4294901760, %v8043_v12  ;;  %v12377_v12 = vand.u32 4294901760, %v8060_v22  ;;  %v2723_v31 = vand.u32 4294901760, %v2722_v1 }
 0x164   :  { %v8530_v13 = vpop.f32.mrf.mxu0  ;;  %v8532_v15 = vpop.f32.mrf.mxu2  ;;  %2481 = vmatpush.msrb.mxu0 %v12373_v6  ;;  %2552 = vmatpush.msrb.mxu1 %v8063_v58  ;;  %v12120_v6 = vand.u32 4294901760, %v8523_v3 }
 0x165   :  { %12371 = vst [vmem:[#allocation66_spill] sm:$0xff] %v8530_v13  ;;  %2599 = vmatpush.msrb.mxu2 %v8412_v63  ;;  %2706 = vmatpush.msrb.mxu3 %v2705_v51  ;;  %v8549_v58 = vpop.f32.mrf.mxu1  ;;  %v2728_v51 = vsub.f32 %v8502_v25, %v12121_v7 }
 0x166   :  { %12372 = vst [vmem:[#allocation67_spill] sm:$0xff] %v8532_v15  ;;  %v8542_v2 = vpop.f32.mrf.mxu3  ;;  %2385 = vmatmul.f32.gmra.mxu2 %v2199_v8  ;;  %2485 = vmatpush.msrb.mxu0 %v12375_v33  ;;  %v2734_v33 = vsub.f32 %v8517_v19, %v12117_v4  ;;  %v2611_v22 = vsub.f32 %v8523_v3, %v12120_v6  ;;  %v12378_v8 = vand.u32 4294901760, %v8072_v20 }
 0x167   :  { %12374 = vst [vmem:[#allocation68_spill] sm:$0xff] %v8542_v2  ;;  %2554 = vmatpush.msrb.mxu1 %v8093_v59  ;;  %2601 = vmatpush.msrb.mxu2 %v8428_v9  ;;  %v6089_v59 = vsel %vm60_vm5, 1.0, %v12235_v56 }
 0x168   :  { %12376 = vst [vmem:[#allocation69_spill] sm:$0xff] %v8549_v58  ;;  %2712 = vmatpush.msrb.mxu3 %v2711_v35  ;;  %2489 = vmatpush.msrb.mxu0 %v12377_v12  ;;  %v8578_v12 = vsub.f32 %v6089_v59, %v6089_v59  ;;  %v2735_v20 = vand.u32 4294901760, %v2734_v33  ;;  %v12386_v59 = vld [vmem:[#allocation35_spill] sm:$0xff] }
 0x169   :  { %2442 = vmatmul.f32.gmra.mxu3 %v2200_v27  ;;  %2556 = vmatpush.msrb.mxu1 %v8113_v40  ;;  %v2202_v40 = vand.u32 4294901760, %v2201_v18  ;;  %v2729_v27 = vand.u32 4294901760, %v2728_v51  ;;  %v2612_v18 = vand.u32 4294901760, %v2611_v22  ;;  %v12383_v51 = vand.u32 4294901760, %v8122_v45 }
 0x16a   :  { %2603 = vmatpush.msrb.mxu2 %v8443_v36  ;;  %2718 = vmatpush.msrb.mxu3 %v2717_v11  ;;  %v12387_v22 = vand.u32 4294901760, %v12386_v59  ;;  %v6102_v45 = vsel %vm73_vm6, 1.0, %v12235_v56  ;;  %v12395_v59 = vld [vmem:[#allocation46_spill] sm:$0xff] }
 0x16b   :  { %2493 = vmatpush.msrb.mxu0 %v12378_v8  ;;  %2558 = vmatpush.msrb.mxu1 %v8124_v24  ;;  %v12382_v24 = vand.u32 4294901760, %v8098_v14  ;;  %v12385_v14 = vand.u32 4294901760, %v8213_v55  ;;  %v8629_v4 = vsub.f32 %v6102_v45, %v6102_v45 }
 0x16c   :  { %v8573_v35 = vpop.f32.mrf.mxu0  ;;  %v8575_v1 = vpop.f32.mrf.mxu2  ;;  %2605 = vmatpush.msrb.mxu2 %v8468_v49  ;;  %2724 = vmatpush.msrb.mxu3 %v2723_v31  ;;  %v12119_v31 = vand.u32 4294901760, %v8578_v12 }
 0x16d   :  { %12379 = vst [vmem:[#allocation70_spill] sm:$0xff] %v8573_v35  ;;  %6179 = vmatmul.msk.f32.vlgmr.msrb.gmra.mxu1 %vm46_vm0, %v12234_v41  ;;  %2203 = vmatmul.f32.gmra.mxu0 %v2202_v40  ;;  %v8595_v33 = vpop.f32.mrf.mxu1 }
 0x16e   :  { %12380 = vst [vmem:[#allocation71_spill] sm:$0xff] %v8575_v1  ;;  %v8584_v11 = vpop.f32.mrf.mxu3  ;;  %2497 = vmatpush.msrb.mxu0 %v12382_v24  ;;  %2607 = vmatpush.msrb.mxu2 %v8493_v62  ;;  %v2619_v24 = vsub.f32 %v8578_v12, %v12119_v31 }
 0x16f   :  { %12381 = vst [vmem:[#allocation72_spill] sm:$0xff] %v8584_v11  ;;  %2730 = vmatpush.msrb.mxu3 %v2729_v27  ;;  %2824 = vmatpush.msra.mxu1 %v8184_v39  ;;  %v12390_v27 = vld [vmem:[#allocation45_spill] sm:$0xff] }
 0x170   :  { %2501 = vmatpush.msrb.mxu0 %v12383_v51  ;;  %2613 = vmatmul.f32.vlgmr.msrb.gmra.mxu2 %v2612_v18  ;;  %12384 = vst [vmem:[#allocation73_spill] sm:$0xff] %v8595_v33  ;;  %v12392_v18 = vld [vmem:[#allocation39_spill] sm:$0xff]  ;;  %v319_v33 = vld [vmem:[%s12054_s1 + $0x3c8] sm:$0xff] }
 0x171   :  { %2736 = vmatpush.msrb.mxu3 %v2735_v20  ;;  %2826 = vmatpush.msra.mxu1 %v8194_v53  ;;  %v12391_v20 = vand.u32 4294901760, %v12390_v27  ;;  %v12393_v51 = vand.u32 4294901760, %v12392_v18 }
 0x172   :  { %2883 = vmatpush.msra.mxu2 %v12385_v14  ;;  %2505 = vmatpush.msrb.mxu0 %v12387_v22  ;;  %v12396_v22 = vand.u32 4294901760, %v12395_v59 }
 0x173   :  { %6183 = vmatmul.msk.f32.vlgmr.msrb.gmra.mxu3 %vm47_vm4, %v12234_v41  ;;  %2828 = vmatpush.msra.mxu1 %v8217_v61 }
 0x174   :  { %v8611_v8 = vpop.f32.mrf.mxu0  ;;  %v8613_v40 = vpop.f32.mrf.mxu2  ;;  %2887 = vmatpush.msra.mxu2 %v12391_v20  ;;  %2962 = vmatpush.msra.mxu3 %v8184_v39  ;;  %v2620_v39 = vand.u32 4294901760, %v2619_v24  ;;  %v12397_v20 = vand.u32 4294901760, %v8273_v42 }
 0x175   :  { %12388 = vst [vmem:[#allocation35_spill] sm:$0xff] %v8611_v8  ;;  %2509 = vmatpush.msrb.mxu0 %v12393_v51  ;;  %2830 = vmatpush.msra.mxu1 %v8243_v44  ;;  %v8648_v45 = vpop.f32.mrf.mxu1  ;;  %v12403_v51 = vld [vmem:[#allocation52_spill] sm:$0xff] }
 0x176   :  { %12389 = vst [vmem:[#allocation74_spill] sm:$0xff] %v8613_v40  ;;  %v8624_v14 = vpop.f32.mrf.mxu3  ;;  %2891 = vmatpush.msra.mxu2 %v12396_v22  ;;  %2964 = vmatpush.msra.mxu3 %v8194_v53  ;;  %v12118_v53 = vand.u32 4294901760, %v8629_v4 }
 0x177   :  { %12394 = vst [vmem:[#allocation45_spill] sm:$0xff] %v8624_v14  ;;  %6180 = vmatmul.msk.f32.gmra.mxu1 %vm59_vm1, %v12234_v41  ;;  %6175 = vmatmul.msk.f32.vlgmr.msrb.gmra.mxu0 %vm46_vm0, %v12234_v41 }
 0x178   :  { %2756 = vmatpush.msra.mxu0 %v8213_v55  ;;  %2832 = vmatpush.msra.mxu1 %v8258_v32  ;;  %12398 = vst [vmem:[#allocation39_spill] sm:$0xff] %v8648_v45  ;;  %v12399_v55 = vld [vmem:[#allocation51_spill] sm:$0xff] }
 0x179   :  { %2895 = vmatpush.msra.mxu2 %v12397_v20  ;;  %2966 = vmatpush.msra.mxu3 %v8217_v61  ;;  %v12400_v18 = vand.u32 4294901760, %v12399_v55 }
 0x17a   :  { %2621 = vmatmul.f32.gmra.mxu2 %v2620_v39  ;;  %2759 = vmatpush.msra.mxu0 %v12390_v27  ;;  %v6115_v27 = vsel %vm86_vm7, 1.0, %v12235_v56  ;;  %v12406_v39 = vld [vmem:[#allocation54_spill] sm:$0xff] }
 0x17b   :  { %2834 = vmatpush.msra.mxu1 %v8275_v30  ;;  %2899 = vmatpush.msra.mxu2 %v12400_v18  ;;  %v12407_v20 = vand.u32 4294901760, %v12406_v39  ;;  %v8681_v18 = vsub.f32 %v6115_v27, %v6115_v27  ;;  %v12408_v27 = vand.u32 4294901760, %v8356_v23 }
 0x17c   :  { %2968 = vmatpush.msra.mxu3 %v8243_v44  ;;  %2762 = vmatpush.msra.mxu0 %v12395_v59  ;;  %v8655_v61 = vpop.f32.mrf.mxu0  ;;  %v8666_v24 = vpop.f32.mrf.mxu2  ;;  %v12404_v44 = vand.u32 4294901760, %v12403_v51  ;;  %v2627_v59 = vsub.f32 %v8629_v4, %v12118_v53  ;;  %v12410_v53 = vand.u32 4294901760, %v8377_v60 }
 0x17d   :  { %12401 = vst [vmem:[#allocation46_spill] sm:$0xff] %v8655_v61  ;;  %6184 = vmatmul.msk.f32.gmra.mxu3 %vm60_vm5, %v12234_v41  ;;  %2836 = vmatpush.msra.mxu1 %v8300_v43  ;;  %v12454_v40 = vand.u32 4294901760, %v8681_v18 }
 0x17e   :  { %12402 = vst [vmem:[#allocation51_spill] sm:$0xff] %v8666_v24  ;;  %2903 = vmatpush.msra.mxu2 %v12404_v44  ;;  %2970 = vmatpush.msra.mxu3 %v8258_v32  ;;  %v8674_v22 = vpop.f32.mrf.mxu3  ;;  %v309_v32 = vld [vmem:[%s12054_s1 + $0x378] sm:$0xff] }
 0x17f   :  { %12405 = vst [vmem:[#allocation52_spill] sm:$0xff] %v8674_v22  ;;  %2765 = vmatpush.msra.mxu0 %v8273_v42  ;;  %2838 = vmatpush.msra.mxu1 %v8325_v10  ;;  %v308_v42 = vld [vmem:[%s12054_s1 + $0x370] sm:$0xff]  ;;  %v8702_v44 = vand.u32 4294901760, %v309_v32 }
 0x180   :  { %2907 = vmatpush.msra.mxu2 %v12407_v20  ;;  %2972 = vmatpush.msra.mxu3 %v8275_v30  ;;  %v2628_v30 = vand.u32 4294901760, %v2627_v59  ;;  %v12122_v20 = vand.u32 4294901760, %v8681_v18  ;;  %v307_v59 = vld [vmem:[%s12054_s1 + $0x368] sm:$0xff] }
 0x181   :  { %6181 = vmatmul.msk.f32.gmra.mxu1 %vm72_vm2, %v12234_v41  ;;  %6176 = vmatmul.msk.f32.gmra.mxu0 %vm59_vm1, %v12234_v41 }
 0x182   :  { %2768 = vmatpush.msra.mxu0 %v12399_v55  ;;  %2840 = vmatpush.msra.mxu1 %v8345_v29  ;;  %v8706_v55 = vpop.f32.mrf.mxu1  ;;  %v2635_v31 = vsub.f32 %v8681_v18, %v12122_v20  ;;  %v304_v20 = vld [vmem:[%s12054_s1 + $0x350] sm:$0xff] }
 0x183   :  { %2911 = vmatpush.msra.mxu2 %v12408_v27  ;;  %2974 = vmatpush.msra.mxu3 %v8300_v43  ;;  %12409 = vst [vmem:[#allocation54_spill] sm:$0xff] %v8706_v55  ;;  %v8714_v27 = vand.u32 4294901760, %v308_v42  ;;  %v306_v43 = vld [vmem:[%s12054_s1 + $0x360] sm:$0xff] }
 0x184   :  { %2629 = vmatmul.f32.gmra.mxu2 %v2628_v30  ;;  %2771 = vmatpush.msra.mxu0 %v12403_v51  ;;  %v8731_v30 = vand.u32 4294901760, %v307_v59  ;;  %v8748_v7 = vand.u32 4294901760, %v306_v43 }
 0x185   :  { %2842 = vmatpush.msra.mxu1 %v8358_v47  ;;  %2915 = vmatpush.msra.mxu2 %v12410_v53  ;;  %v8729_v53 = vsub.f32 %v309_v32, %v8702_v44  ;;  %v8746_v32 = vsub.f32 %v308_v42, %v8714_v27 }
 0x186   :  { %2976 = vmatpush.msra.mxu3 %v8325_v10  ;;  %2774 = vmatpush.msra.mxu0 %v12406_v39  ;;  %v8721_v51 = vpop.f32.mrf.mxu0  ;;  %v8733_v10 = vpop.f32.mrf.mxu2  ;;  %v12413_v39 = vand.u32 4294901760, %v8393_v38  ;;  %v8766_v42 = vsub.f32 %v307_v59, %v8731_v30  ;;  %v8780_v59 = vsub.f32 %v306_v43, %v8748_v7 }
 0x187   :  { %12411 = vst [vmem:[#allocation75_spill] sm:$0xff] %v8721_v51  ;;  %6185 = vmatmul.msk.f32.gmra.mxu3 %vm73_vm6, %v12234_v41  ;;  %2844 = vmatpush.msra.mxu1 %v8380_v46 }
 0x188   :  { %12412 = vst [vmem:[#allocation76_spill] sm:$0xff] %v8733_v10  ;;  %2919 = vmatpush.msra.mxu2 %v12413_v39  ;;  %2978 = vmatpush.msra.mxu3 %v8345_v29  ;;  %v8741_v6 = vpop.f32.mrf.mxu3  ;;  %v305_v39 = vld [vmem:[%s12054_s1 + $0x358] sm:$0xff]  ;;  %v12415_v29 = vand.u32 4294901760, %v8416_v50 }
 0x189   :  { %12414 = vst [vmem:[#allocation77_spill] sm:$0xff] %v8741_v6  ;;  %2777 = vmatpush.msra.mxu0 %v8356_v23  ;;  %2846 = vmatpush.msra.mxu1 %v8412_v63  ;;  %v302_v23 = vld [vmem:[%s12054_s1 + $0x340] sm:$0xff]  ;;  %v12422_v6 = vand.u32 4294901760, %v8484_v37 }
 0x18a   :  { %2923 = vmatpush.msra.mxu2 %v12415_v29  ;;  %2980 = vmatpush.msra.mxu3 %v8358_v47  ;;  %v2636_v47 = vand.u32 4294901760, %v2635_v31  ;;  %v8770_v29 = vand.u32 4294901760, %v305_v39  ;;  %v303_v31 = vld [vmem:[%s12054_s1 + $0x348] sm:$0xff]  ;;  %v8833_v51 = vand.u32 4294901760, %v302_v23 }
 0x18b   :  { %6182 = vmatmul.msk.f32.gmra.mxu1 %vm85_vm3, %v12234_v41  ;;  %6177 = vmatmul.msk.f32.gmra.mxu0 %vm72_vm2, %v12234_v41 }
 0x18c   :  { %2780 = vmatpush.msra.mxu0 %v8377_v60  ;;  %2848 = vmatpush.msra.mxu1 %v8428_v9  ;;  %v8783_v60 = vpop.f32.mrf.mxu1 }
 0x18d   :  { %2927 = vmatpush.msra.mxu2 %v12416_v26  ;;  %2982 = vmatpush.msra.mxu3 %v8380_v46  ;;  %12417 = vst [vmem:[#allocation78_spill] sm:$0xff] %v8783_v60  ;;  %v12418_v46 = vand.u32 4294901760, %v8729_v53 }
 0x18e   :  { %2637 = vmatmul.f32.gmra.mxu2 %v2636_v47  ;;  %2783 = vmatpush.msra.mxu0 %v8393_v38  ;;  %v8795_v47 = vand.u32 4294901760, %v304_v20  ;;  %v8800_v38 = vsub.f32 %v305_v39, %v8770_v29 }
 0x18f   :  { %2850 = vmatpush.msra.mxu1 %v8443_v36  ;;  %2931 = vmatpush.msra.mxu2 %v2715_v16  ;;  %v3078_v26 = vsub.f32 %v8729_v53, %v12418_v46  ;;  %v8816_v46 = vand.u32 4294901760, %v303_v31  ;;  %v8818_v43 = vpop.f32.mrf.mxu2 }
 0x190   :  { %2984 = vmatpush.msra.mxu3 %v8412_v63  ;;  %2786 = vmatpush.msra.mxu0 %v8416_v50  ;;  %v8805_v16 = vpop.f32.mrf.mxu0  ;;  %v12420_v63 = vand.u32 4294901760, %v8746_v32  ;;  %12421 = vst [vmem:[#allocation80_spill] sm:$0xff] %v8818_v43  ;;  %v8831_v22 = vsub.f32 %v304_v20, %v8795_v47 }
 0x191   :  { %12419 = vst [vmem:[#allocation79_spill] sm:$0xff] %v8805_v16  ;;  %6186 = vmatmul.msk.f32.gmra.mxu3 %vm86_vm7, %v12234_v41  ;;  %2852 = vmatpush.msra.mxu1 %v8468_v49  ;;  %v3079_v55 = vand.u32 4294901760, %v3078_v26  ;;  %v12426_v26 = vand.u32 4294901760, %v8523_v3  ;;  %v8852_v24 = vsub.f32 %v303_v31, %v8816_v46  ;;  %v8865_v31 = vsub.f32 %v302_v23, %v8833_v51  ;;  %v321_v16 = vld [vmem:[%s12054_s1 + $0x3d8] sm:$0xff] }
 0x192   :  { %v3084_v50 = vsub.f32 %v8746_v32, %v12420_v63  ;;  %2935 = vmatpush.msra.mxu2 %v12422_v6  ;;  %2986 = vmatpush.msra.mxu3 %v8428_v9  ;;  %v8823_v10 = vpop.f32.mrf.mxu3  ;;  %v12424_v63 = vand.u32 4294901760, %v8766_v42  ;;  %v301_v9 = vld [vmem:[%s12054_s1 + $0x338] sm:$0xff]  ;;  %v12425_v6 = vand.u32 4294901760, %v8502_v25  ;;  %v8882_v23 = vand.u32 4294901760, %v300_v34 }
 0x193   :  { %12423 = vst [vmem:[#allocation81_spill] sm:$0xff] %v8823_v10  ;;  %2789 = vmatpush.msra.mxu0 %v8441_v5  ;;  %2854 = vmatpush.msra.mxu1 %v8493_v62  ;;  %v12124_v5 = vand.u32 4294901760, %v8800_v38 }
 0x194   :  { %v3090_v39 = vsub.f32 %v8766_v42, %v12424_v63  ;;  %2939 = vmatpush.msra.mxu2 %v12425_v6  ;;  %2988 = vmatpush.msra.mxu3 %v8443_v36  ;;  %v3085_v20 = vand.u32 4294901760, %v3084_v50  ;;  %v12427_v63 = vand.u32 4294901760, %v8780_v59  ;;  %v12428_v36 = vand.u32 4294901760, %v8517_v19 }
 0x195   :  { %2858 = vmatmul.f32.vlgmr.msra.gmra.mxu1 %v12426_v26  ;;  %6178 = vmatmul.msk.f32.gmra.mxu0 %vm85_vm3, %v12234_v41  ;;  %v8857_v6 = vand.u32 4294901760, %v301_v9  ;;  %v12125_v26 = vand.u32 4294901760, %v8831_v22 }
 0x196   :  { %v3096_v10 = vsub.f32 %v8780_v59, %v12427_v63  ;;  %2792 = vmatpush.msra.mxu0 %v8462_v17  ;;  %2943 = vmatpush.msra.mxu2 %v12428_v36  ;;  %v3091_v50 = vand.u32 4294901760, %v3090_v39  ;;  %v3102_v17 = vsub.f32 %v8800_v38, %v12124_v5  ;;  %v8875_v63 = vpop.f32.mrf.mxu1  ;;  %v298_v36 = vld [vmem:[%s12054_s1 + $0x320] sm:$0xff] }
 0x197   :  { %2990 = vmatpush.msra.mxu3 %v8468_v49  ;;  %3080 = vmatpush.msrb.mxu1 %v3079_v55  ;;  %12429 = vst [vmem:[#allocation82_spill] sm:$0xff] %v8875_v63  ;;  %v299_v49 = vld [vmem:[%s12054_s1 + $0x328] sm:$0xff]  ;;  %v8887_v39 = vsub.f32 %v301_v9, %v8857_v6  ;;  %v8917_v63 = vand.u32 4294901760, %v298_v36 }
 0x198   :  { %2795 = vmatpush.msra.mxu0 %v8484_v37  ;;  %6187 = vmatmul.msk.f32.vlgmr.msra.gmra.mxu2 %vm47_vm4, %v12234_v41  ;;  %v3097_v55 = vand.u32 4294901760, %v3096_v10  ;;  %v8902_v10 = vand.u32 4294901760, %v299_v49 }
 0x199   :  { %2992 = vmatpush.msra.mxu3 %v8493_v62  ;;  %3086 = vmatpush.msrb.mxu1 %v3085_v20  ;;  %v3108_v62 = vsub.f32 %v8831_v22, %v12125_v26  ;;  %v8904_v9 = vpop.f32.mrf.mxu2  ;;  %v3103_v20 = vand.u32 4294901760, %v3102_v17  ;;  %v12434_v17 = vand.u32 4294901760, %v8578_v12 }
 0x19a   :  { %3190 = vmatpush.msrb.mxu2 %v8729_v53  ;;  %2798 = vmatpush.msra.mxu0 %v8502_v25  ;;  %v8892_v5 = vpop.f32.mrf.mxu0  ;;  %12431 = vst [vmem:[#allocation84_spill] sm:$0xff] %v8904_v9  ;;  %v8915_v25 = vsub.f32 %v300_v34, %v8882_v23  ;;  %v297_v9 = vld [vmem:[%s12054_s1 + $0x318] sm:$0xff]  ;;  %v12435_v34 = vand.u32 4294901760, %v8865_v31 }
 0x19b   :  { %12430 = vst [vmem:[#allocation83_spill] sm:$0xff] %v8892_v5  ;;  %6191 = vmatmul.msk.f32.vlgmr.msra.gmra.mxu3 %vm47_vm4, %v12234_v41  ;;  %3092 = vmatpush.msrb.mxu1 %v3091_v50  ;;  %v12433_v50 = vand.u32 4294901760, %v8852_v24  ;;  %v8935_v2 = vand.u32 4294901760, %v297_v9 }
 0x19c   :  { %3193 = vmatpush.msrb.mxu2 %v8746_v32  ;;  %3258 = vmatpush.msrb.mxu3 %v8702_v44  ;;  %v8908_v37 = vpop.f32.mrf.mxu3 }
 0x19d   :  { %12432 = vst [vmem:[#allocation85_spill] sm:$0xff] %v8908_v37  ;;  %2801 = vmatpush.msra.mxu0 %v8517_v19  ;;  %3098 = vmatpush.msrb.mxu1 %v3097_v55  ;;  %v3114_v26 = vsub.f32 %v8852_v24, %v12433_v50  ;;  %v3109_v55 = vand.u32 4294901760, %v3108_v62  ;;  %v3120_v50 = vsub.f32 %v8865_v31, %v12435_v34  ;;  %v296_v19 = vld [vmem:[%s12054_s1 + $0x310] sm:$0xff] }
 0x19e   :  { %3196 = vmatpush.msrb.mxu2 %v8766_v42  ;;  %3260 = vmatpush.msrb.mxu3 %v8714_v27  ;;  %v8932_v37 = vsub.f32 %v299_v49, %v8902_v10  ;;  %v12436_v49 = vand.u32 4294901760, %v8887_v39  ;;  %v8954_v34 = vpop.f32.mrf.mxu1  ;;  %v8961_v5 = vand.u32 4294901760, %v296_v19 }
 0x19f   :  { %2864 = vmatmul.f32.gmra.mxu1 %v12434_v17  ;;  %2804 = vmatmul.f32.vlgmr.msra.gmra.mxu0 %v8523_v3  ;;  %v3115_v3 = vand.u32 4294901760, %v3114_v26  ;;  %v8944_v17 = vsub.f32 %v298_v36, %v8917_v63  ;;  %12437 = vst [vmem:[#allocation86_spill] sm:$0xff] %v8954_v34  ;;  %v295_v26 = vld [vmem:[%s12054_s1 + $0x308] sm:$0xff]  ;;  %v3121_v36 = vand.u32 4294901760, %v3120_v50  ;;  %v294_v34 = vld [vmem:[%s12054_s1 + $0x300] sm:$0xff] }
 0x1a0   :  { %3011 = vmatpush.msrb.mxu0 %v8702_v44  ;;  %3104 = vmatpush.msrb.mxu1 %v3103_v20  ;;  %v3126_v20 = vsub.f32 %v8887_v39, %v12436_v49  ;;  %v8966_v49 = vsub.f32 %v297_v9, %v8935_v2  ;;  %v8981_v9 = vand.u32 4294901760, %v295_v26  ;;  %v8994_v62 = vsub.f32 %v296_v19, %v8961_v5 }
 0x1a1   :  { %3199 = vmatpush.msrb.mxu2 %v8780_v59  ;;  %3262 = vmatpush.msrb.mxu3 %v8731_v30  ;;  %v8996_v15 = vand.u32 4294901760, %v294_v34 }
 0x1a2   :  { %6188 = vmatmul.msk.f32.gmra.mxu2 %vm60_vm5, %v12234_v41  ;;  %3013 = vmatpush.msrb.mxu0 %v8714_v27  ;;  %v9008_v19 = vsub.f32 %v295_v26, %v8981_v9 }
 0x1a3   :  { %3110 = vmatpush.msrb.mxu1 %v3109_v55  ;;  %3202 = vmatpush.msrb.mxu2 %v8800_v38  ;;  %v12439_v55 = vand.u32 4294901760, %v8915_v25  ;;  %v8983_v45 = vpop.f32.mrf.mxu2 }
 0x1a4   :  { %3264 = vmatpush.msrb.mxu3 %v8748_v7  ;;  %3015 = vmatpush.msrb.mxu0 %v8731_v30  ;;  %v8971_v43 = vpop.f32.mrf.mxu0  ;;  %12440 = vst [vmem:[#allocation88_spill] sm:$0xff] %v8983_v45  ;;  %v12444_v45 = vand.u32 4294901760, %v8944_v17 }
 0x1a5   :  { %12438 = vst [vmem:[#allocation87_spill] sm:$0xff] %v8971_v43  ;;  %6192 = vmatmul.msk.f32.gmra.mxu3 %vm60_vm5, %v12234_v41  ;;  %3116 = vmatpush.msrb.mxu1 %v3115_v3  ;;  %v3132_v50 = vsub.f32 %v8915_v25, %v12439_v55  ;;  %v3127_v43 = vand.u32 4294901760, %v3126_v20  ;;  %v12442_v3 = vand.u32 4294901760, %v8932_v37 }
 0x1a6   :  { %3205 = vmatpush.msrb.mxu2 %v8831_v22  ;;  %3266 = vmatpush.msrb.mxu3 %v8770_v29  ;;  %v8987_v14 = vpop.f32.mrf.mxu3  ;;  %12445 = vst [vmem:[#allocation90_spill] sm:$0xff] %v9008_v19  ;;  %v9025_v26 = vpop.f32.mrf.mxu1 }
 0x1a7   :  { %12441 = vst [vmem:[#allocation89_spill] sm:$0xff] %v8987_v14  ;;  %3017 = vmatpush.msrb.mxu0 %v8748_v7  ;;  %3122 = vmatpush.msrb.mxu1 %v3121_v36  ;;  %v3138_v55 = vsub.f32 %v8932_v37, %v12442_v3  ;;  %v12443_v14 = vand.u32 4294901760, %v8629_v4  ;;  %v3133_v36 = vand.u32 4294901760, %v3132_v50  ;;  %v3144_v3 = vsub.f32 %v8944_v17, %v12444_v45 }
 0x1a8   :  { %3208 = vmatpush.msrb.mxu2 %v8852_v24  ;;  %3268 = vmatpush.msrb.mxu3 %v8795_v47  ;;  %v12447_v45 = vand.u32 4294901760, %v8966_v49  ;;  %12448 = vst [vmem:[#allocation92_spill] sm:$0xff] %v9025_v26  ;;  %v324_v26 = vld [vmem:[%s12054_s1 + $0x3f0] sm:$0xff] }
 0x1a9   :  { %2870 = vmatmul.f32.gmra.mxu1 %v12443_v14  ;;  %2809 = vmatmul.f32.gmra.mxu0 %v8578_v12  ;;  %v3139_v20 = vand.u32 4294901760, %v3138_v55  ;;  %v9015_v12 = vsub.f32 %v294_v34, %v8996_v15  ;;  %v3145_v50 = vand.u32 4294901760, %v3144_v3  ;;  %v325_v55 = vld [vmem:[%s12054_s1 + $0x3f8] sm:$0xff]  ;;  %v9045_v34 = vadd.s32 768, %v12322_v52 }
 0x1aa   :  { %3019 = vmatpush.msrb.mxu0 %v8770_v29  ;;  %3128 = vmatpush.msrb.mxu1 %v3127_v43  ;;  %v3150_v43 = vsub.f32 %v8966_v49, %v12447_v45  ;;  %v9054_v60 = vand.u32 4294901760, %v325_v55 }
 0x1ab   :  { %3211 = vmatpush.msrb.mxu2 %v8865_v31  ;;  %3270 = vmatpush.msrb.mxu3 %v8816_v46  ;;  %12446 = vst [vmem:[#allocation91_spill] sm:$0xff] %v9015_v12  ;;  %vm48_vm8 = vcmp.eq.s32.totalorder %v9045_v34, %v6868_v0  ;;  %vm61_vm9 = vcmp.eq.s32.totalorder %v9045_v34, %v6896_v48 }
 0x1ac   :  { %6189 = vmatmul.msk.f32.gmra.mxu2 %vm73_vm6, %v12234_v41  ;;  %3021 = vmatpush.msrb.mxu0 %v8795_v47  ;;  %v9079_v21 = vsub.f32 %v325_v55, %v9054_v60  ;;  %v6077_v55 = vsel %vm48_vm8, 1.0, %v12235_v56  ;;  %vm74_vm10 = vcmp.eq.s32.totalorder %v9045_v34, %v6885_v57  ;;  %vm87_vm11 = vcmp.eq.s32.totalorder %v9045_v34, %v6917_v28  ;;  %v332_v34 = vld [vmem:[%s12054_s1 + $0x430] sm:$0xff] }
 0x1ad   :  { %3134 = vmatpush.msrb.mxu1 %v3133_v36  ;;  %3214 = vmatpush.msrb.mxu2 %v8887_v39  ;;  %v12450_v36 = vand.u32 4294901760, %v8994_v62 }
 0x1ae   :  { %3272 = vmatpush.msrb.mxu3 %v8833_v51  ;;  %3023 = vmatpush.msrb.mxu0 %v8816_v46  ;;  %v9034_v14 = vpop.f32.mrf.mxu0 }
 0x1af   :  { %12449 = vst [vmem:[#allocation93_spill] sm:$0xff] %v9034_v14  ;;  %6193 = vmatmul.msk.f32.gmra.mxu3 %vm73_vm6, %v12234_v41  ;;  %3140 = vmatpush.msrb.mxu1 %v3139_v20  ;;  %v3156_v3 = vsub.f32 %v8994_v62, %v12450_v36  ;;  %v9050_v14 = vpop.f32.mrf.mxu2  ;;  %v3151_v20 = vand.u32 4294901760, %v3150_v43  ;;  %v12453_v36 = vand.u32 4294901760, %v9008_v19  ;;  %v323_v43 = vld [vmem:[%s12054_s1 + $0x3e8] sm:$0xff] }
 0x1b0   :  { %12451 = vst [vmem:[#allocation94_spill] sm:$0xff] %v9050_v14  ;;  %3217 = vmatpush.msrb.mxu2 %v8915_v25  ;;  %3274 = vmatpush.msrb.mxu3 %v8857_v6  ;;  %v9056_v61 = vpop.f32.mrf.mxu3  ;;  %v9064_v14 = vand.u32 4294901760, %v324_v26 }
 0x1b1   :  { %12452 = vst [vmem:[#allocation95_spill] sm:$0xff] %v9056_v61  ;;  %3025 = vmatpush.msrb.mxu0 %v8833_v51  ;;  %3146 = vmatpush.msrb.mxu1 %v3145_v50  ;;  %v3162_v45 = vsub.f32 %v9008_v19, %v12453_v36  ;;  %v3157_v50 = vand.u32 4294901760, %v3156_v3  ;;  %v12455_v61 = vand.u32 4294901760, %v9015_v12 }
 0x1b2   :  { %3220 = vmatpush.msrb.mxu2 %v8932_v37  ;;  %3276 = vmatpush.msrb.mxu3 %v8882_v23  ;;  %v9098_v3 = vsub.f32 %v324_v26, %v9064_v14 }
 0x1b3   :  { %2876 = vmatmul.f32.gmra.mxu1 %v12454_v40  ;;  %2814 = vmatmul.f32.gmra.mxu0 %v8629_v4  ;;  %v3168_v36 = vsub.f32 %v9015_v12, %v12455_v61  ;;  %v3163_v40 = vand.u32 4294901760, %v3162_v45  ;;  %v9083_v4 = vand.u32 4294901760, %v323_v43  ;;  %v322_v61 = vld [vmem:[%s12054_s1 + $0x3e0] sm:$0xff]  ;;  %v9100_v45 = vpop.f32.mrf.mxu1 }
 0x1b4   :  { %3027 = vmatpush.msrb.mxu0 %v8857_v6  ;;  %3152 = vmatpush.msrb.mxu1 %v3151_v20  ;;  %12456 = vst [vmem:[#allocation96_spill] sm:$0xff] %v9098_v3  ;;  %v9109_v11 = vand.u32 4294901760, %v322_v61 }
 0x1b5   :  { %3223 = vmatpush.msrb.mxu2 %v8944_v17  ;;  %3278 = vmatpush.msrb.mxu3 %v8902_v10  ;;  %12457 = vst [vmem:[#allocation97_spill] sm:$0xff] %v9100_v45  ;;  %v3169_v20 = vand.u32 4294901760, %v3168_v36  ;;  %v9118_v36 = vsub.f32 %v323_v43, %v9083_v4  ;;  %v320_v45 = vld [vmem:[%s12054_s1 + $0x3d0] sm:$0xff]  ;;  %v12462_v43 = vand.u32 4294901760, %v9079_v21 }
 0x1b6   :  { %6190 = vmatmul.msk.f32.gmra.mxu2 %vm86_vm7, %v12234_v41  ;;  %3029 = vmatpush.msrb.mxu0 %v8882_v23 }
 0x1b7   :  { %3158 = vmatpush.msrb.mxu1 %v3157_v50  ;;  %3226 = vmatpush.msrb.mxu2 %v8966_v49  ;;  %v3043_v50 = vsub.f32 %v6077_v55, %v6077_v55  ;;  %12459 = vst [vmem:[#allocation99_spill] sm:$0xff] %v9118_v36  ;;  %v9123_v13 = vpop.f32.mrf.mxu2  ;;  %v9139_v55 = vsub.f32 %v322_v61, %v9109_v11  ;;  %v318_v61 = vld [vmem:[%s12054_s1 + $0x3c0] sm:$0xff] }
 0x1b8   :  { %3280 = vmatpush.msrb.mxu3 %v8917_v63  ;;  %3031 = vmatpush.msrb.mxu0 %v8902_v10  ;;  %v9111_v26 = vpop.f32.mrf.mxu0  ;;  %12460 = vst [vmem:[#allocation100_spill] sm:$0xff] %v9123_v13  ;;  %v9141_v13 = vand.u32 4294901760, %v320_v45 }
 0x1b9   :  { %12458 = vst [vmem:[#allocation98_spill] sm:$0xff] %v9111_v26  ;;  %6194 = vmatmul.msk.f32.gmra.mxu3 %vm86_vm7, %v12234_v41  ;;  %3164 = vmatpush.msrb.mxu1 %v3163_v40  ;;  %v9128_v26 = vand.u32 4294901760, %v321_v16  ;;  %v3512_v40 = vsub.f32 %v9079_v21, %v12462_v43  ;;  %v12463_v43 = vand.u32 4294901760, %v9098_v3 }
 0x1ba   :  { %3229 = vmatpush.msrb.mxu2 %v8994_v62  ;;  %3282 = vmatpush.msrb.mxu3 %v8935_v2  ;;  %v9130_v54 = vpop.f32.mrf.mxu3  ;;  %v9176_v58 = vsub.f32 %v320_v45, %v9141_v13 }
 0x1bb   :  { %12461 = vst [vmem:[#allocation101_spill] sm:$0xff] %v9130_v54  ;;  %3033 = vmatpush.msrb.mxu0 %v8917_v63  ;;  %3170 = vmatpush.msrb.mxu1 %v3169_v20  ;;  %v3044_v20 = vand.u32 4294901760, %v3043_v50  ;;  %v3518_v54 = vsub.f32 %v9098_v3, %v12463_v43  ;;  %v9160_v8 = vsub.f32 %v321_v16, %v9128_v26  ;;  %v3513_v1 = vand.u32 4294901760, %v3512_v40  ;;  %v317_v3 = vld [vmem:[%s12054_s1 + $0x3b8] sm:$0xff] }
 0x1bc   :  { %3232 = vmatpush.msrb.mxu2 %v9008_v19  ;;  %3284 = vmatpush.msrb.mxu3 %v8961_v5  ;;  %v6090_v16 = vsel %vm61_vm9, 1.0, %v12235_v56  ;;  %12465 = vst [vmem:[#allocation103_spill] sm:$0xff] %v9176_v58 }
 0x1bd   :  { %6195 = vmatmul.msk.f32.vlgmr.msrb.gmra.mxu1 %vm48_vm8, %v12234_v41  ;;  %2819 = vmatmul.f32.gmra.mxu0 %v8681_v18  ;;  %12464 = vst [vmem:[#allocation102_spill] sm:$0xff] %v9160_v8  ;;  %v9164_v18 = vand.u32 4294901760, %v319_v33  ;;  %v3045_v35 = vsub.f32 %v3043_v50, %v3044_v20  ;;  %v3519_v45 = vand.u32 4294901760, %v3518_v54  ;;  %v12470_v54 = vand.u32 4294901760, %v9139_v55 }
 0x1be   :  { %3035 = vmatpush.msrb.mxu0 %v8935_v2  ;;  %3235 = vmatpush.msrb.mxu2 %v9015_v12  ;;  %v12467_v12 = vand.u32 4294901760, %v9118_v36 }
 0x1bf   :  { %3286 = vmatpush.msrb.mxu3 %v8981_v9  ;;  %3396 = vmatpush.msra.mxu1 %v8702_v44  ;;  %v9178_v44 = vpop.f32.mrf.mxu1  ;;  %v3530_v43 = vsub.f32 %v9139_v55, %v12470_v54 }
 0x1c0   :  { %3037 = vmatpush.msrb.mxu0 %v8961_v5  ;;  %3238 = vmatmul.f32.vlgmr.msrb.gmra.mxu2 %v3043_v50  ;;  %12466 = vst [vmem:[#allocation104_spill] sm:$0xff] %v9178_v44  ;;  %v3524_v40 = vsub.f32 %v9118_v36, %v12467_v12  ;;  %v9191_v44 = vand.u32 4294901760, %v318_v61  ;;  %v9197_v12 = vsub.f32 %v319_v33, %v9164_v18  ;;  %v316_v50 = vld [vmem:[%s12054_s1 + $0x3b0] sm:$0xff]  ;;  %v3046_v33 = vand.u32 4294901760, %v3045_v35 }
 0x1c1   :  { %3288 = vmatpush.msrb.mxu3 %v8996_v15  ;;  %3398 = vmatpush.msra.mxu1 %v8714_v27  ;;  %v3051_v27 = vsub.f32 %v6090_v16, %v6090_v16  ;;  %v9202_v36 = vpop.f32.mrf.mxu2 }
 0x1c2   :  { %3445 = vmatpush.msra.mxu2 %v9054_v60  ;;  %3039 = vmatpush.msrb.mxu0 %v8981_v9  ;;  %v9193_v19 = vpop.f32.mrf.mxu0  ;;  %12469 = vst [vmem:[#allocation106_spill] sm:$0xff] %v9202_v36  ;;  %v9220_v54 = vsub.f32 %v318_v61, %v9191_v44  ;;  %v12473_v61 = vand.u32 4294901760, %v8729_v53  ;;  %v314_v53 = vld [vmem:[%s12054_s1 + $0x3a0] sm:$0xff] }
 0x1c3   :  { %12468 = vst [vmem:[#allocation105_spill] sm:$0xff] %v9193_v19  ;;  %3292 = vmatmul.f32.vlgmr.msrb.gmra.mxu3 %v3044_v20  ;;  %3400 = vmatpush.msra.mxu1 %v8731_v30  ;;  %v9209_v30 = vand.u32 4294901760, %v317_v3  ;;  %v3525_v19 = vand.u32 4294901760, %v3524_v40  ;;  %v9222_v20 = vand.u32 4294901760, %v316_v50  ;;  %v3531_v40 = vand.u32 4294901760, %v3530_v43 }
 0x1c4   :  { %3447 = vmatpush.msra.mxu2 %v9064_v14  ;;  %3514 = vmatpush.msra.mxu3 %v3513_v1  ;;  %v9211_v16 = vpop.f32.mrf.mxu3  ;;  %v12472_v1 = vand.u32 4294901760, %v9160_v8 }
 0x1c5   :  { %12471 = vst [vmem:[#allocation107_spill] sm:$0xff] %v9211_v16  ;;  %3041 = vmatpush.msrb.mxu0 %v8996_v15  ;;  %3402 = vmatpush.msra.mxu1 %v8748_v7  ;;  %v315_v16 = vld [vmem:[%s12054_s1 + $0x3a8] sm:$0xff]  ;;  %v3052_v7 = vand.u32 4294901760, %v3051_v27 }
 0x1c6   :  { %3449 = vmatpush.msra.mxu2 %v9083_v4  ;;  %3520 = vmatpush.msra.mxu3 %v3519_v45  ;;  %v3536_v36 = vsub.f32 %v9160_v8, %v12472_v1  ;;  %v12474_v45 = vand.u32 4294901760, %v9176_v58  ;;  %v9241_v8 = vsub.f32 %v317_v3, %v9209_v30  ;;  %v6103_v3 = vsel %vm74_vm10, 1.0, %v12235_v56 }
 0x1c7   :  { %6196 = vmatmul.msk.f32.gmra.mxu1 %vm61_vm9, %v12234_v41  ;;  %3047 = vmatmul.f32.vlgmr.msrb.gmra.mxu0 %v3046_v33  ;;  %v9244_v33 = vand.u32 4294901760, %v315_v16  ;;  %v3053_v35 = vsub.f32 %v3051_v27, %v3052_v7 }
 0x1c8   :  { %3317 = vmatpush.msra.mxu0 %v12473_v61  ;;  %3404 = vmatpush.msra.mxu1 %v8770_v29  ;;  %v3542_v1 = vsub.f32 %v9176_v58, %v12474_v45  ;;  %v12475_v29 = vand.u32 4294901760, %v8746_v32  ;;  %v3537_v43 = vand.u32 4294901760, %v3536_v36  ;;  %v9259_v45 = vpop.f32.mrf.mxu1  ;;  %v12478_v32 = vand.u32 4294901760, %v9197_v12 }
 0x1c9   :  { %3451 = vmatpush.msra.mxu2 %v9109_v11  ;;  %3526 = vmatpush.msra.mxu3 %v3525_v19  ;;  %v9257_v19 = vsub.f32 %v316_v50, %v9222_v20  ;;  %12477 = vst [vmem:[#allocation109_spill] sm:$0xff] %v9259_v45  ;;  %v12479_v61 = vand.u32 4294901760, %v8766_v42  ;;  %v9272_v58 = vand.u32 4294901760, %v314_v53  ;;  %v3054_v45 = vand.u32 4294901760, %v3053_v35 }
 0x1ca   :  { %3243 = vmatmul.f32.gmra.mxu2 %v3051_v27  ;;  %3321 = vmatpush.msra.mxu0 %v12475_v29  ;;  %v3548_v36 = vsub.f32 %v9197_v12, %v12478_v32  ;;  %v313_v29 = vld [vmem:[%s12054_s1 + $0x398] sm:$0xff]  ;;  %v3543_v50 = vand.u32 4294901760, %v3542_v1  ;;  %v3059_v27 = vsub.f32 %v6103_v3, %v6103_v3  ;;  %v9278_v32 = vsub.f32 %v315_v16, %v9244_v33 }
 0x1cb   :  { %12476 = vst [vmem:[#allocation108_spill] sm:$0xff] %v9257_v19  ;;  %3406 = vmatpush.msra.mxu1 %v8795_v47  ;;  %3453 = vmatpush.msra.mxu2 %v9128_v26  ;;  %v9283_v42 = vpop.f32.mrf.mxu2  ;;  %v12482_v1 = vand.u32 4294901760, %v9220_v54  ;;  %v12484_v16 = vand.u32 4294901760, %v8780_v59  ;;  %v9307_v59 = vsub.f32 %v314_v53, %v9272_v58 }
 0x1cc   :  { %3532 = vmatpush.msra.mxu3 %v3531_v40  ;;  %3325 = vmatpush.msra.mxu0 %v12479_v61  ;;  %v9274_v47 = vpop.f32.mrf.mxu0  ;;  %v312_v40 = vld [vmem:[%s12054_s1 + $0x390] sm:$0xff]  ;;  %12481 = vst [vmem:[#allocation111_spill] sm:$0xff] %v9283_v42  ;;  %v3549_v42 = vand.u32 4294901760, %v3548_v36  ;;  %v3060_v35 = vand.u32 4294901760, %v3059_v27 }
 0x1cd   :  { %12480 = vst [vmem:[#allocation110_spill] sm:$0xff] %v9274_v47  ;;  %3298 = vmatmul.f32.gmra.mxu3 %v3052_v7  ;;  %3408 = vmatpush.msra.mxu1 %v8816_v46  ;;  %v3554_v61 = vsub.f32 %v9220_v54, %v12482_v1  ;;  %v12136_v7 = vand.u32 4294901760, %v9257_v19  ;;  %v9290_v46 = vand.u32 4294901760, %v313_v29  ;;  %v9298_v47 = vadd.s32 896, %v12322_v52 }
 0x1ce   :  { %3455 = vmatpush.msra.mxu2 %v9141_v13  ;;  %3538 = vmatpush.msra.mxu3 %v3537_v43  ;;  %v9292_v3 = vpop.f32.mrf.mxu3  ;;  %v12485_v43 = vand.u32 4294901760, %v9241_v8  ;;  %v3061_v36 = vsub.f32 %v3059_v27, %v3060_v35  ;;  %v12489_v52 = vand.u32 4294901760, %v9278_v32 }
 0x1cf   :  { %12483 = vst [vmem:[#allocation112_spill] sm:$0xff] %v9292_v3  ;;  %3329 = vmatpush.msra.mxu0 %v12484_v16  ;;  %3410 = vmatpush.msra.mxu1 %v8833_v51  ;;  %v9309_v16 = vand.u32 4294901760, %v312_v40  ;;  %v311_v51 = vld [vmem:[%s12054_s1 + $0x388] sm:$0xff]  ;;  %v3555_v53 = vand.u32 4294901760, %v3554_v61  ;;  %v9326_v3 = vsub.f32 %v313_v29, %v9290_v46  ;;  %v12487_v61 = vand.u32 4294901760, %v8831_v22 }
 0x1d0   :  { %3457 = vmatpush.msra.mxu2 %v9164_v18  ;;  %3544 = vmatpush.msra.mxu3 %v3543_v50  ;;  %v3560_v1 = vsub.f32 %v9241_v8, %v12485_v43  ;;  %v12486_v50 = vand.u32 4294901760, %v8800_v38  ;;  %v3566_v43 = vsub.f32 %v9257_v19, %v12136_v7  ;;  %v6116_v38 = vsel %vm87_vm11, 1.0, %v12235_v56 }
 0x1d1   :  { %6197 = vmatmul.msk.f32.gmra.mxu1 %vm74_vm10, %v12234_v41  ;;  %3055 = vmatmul.f32.gmra.mxu0 %v3054_v45  ;;  %v310_v45 = vld [vmem:[%s12054_s1 + $0x380] sm:$0xff]  ;;  %v9342_v7 = vsub.f32 %v312_v40, %v9309_v16  ;;  %vm49_vm12 = vcmp.eq.s32.totalorder %v9298_v47, %v6868_v0  ;;  %v3572_v22 = vsub.f32 %v9278_v32, %v12489_v52  ;;  %v12490_v40 = vand.u32 4294901760, %v8852_v24 }
 0x1d2   :  { %3333 = vmatpush.msra.mxu0 %v12486_v50  ;;  %3412 = vmatpush.msra.mxu1 %v8857_v6  ;;  %v9336_v6 = vand.u32 4294901760, %v311_v51  ;;  %v3561_v29 = vand.u32 4294901760, %v3560_v1  ;;  %v9353_v1 = vand.u32 4294901760, %v310_v45  ;;  %v6078_v52 = vsel %vm49_vm12, 1.0, %v12235_v56 }
 0x1d3   :  { %3459 = vmatpush.msra.mxu2 %v9191_v44  ;;  %3550 = vmatpush.msra.mxu3 %v3549_v42  ;;  %v9346_v42 = vpop.f32.mrf.mxu1  ;;  %v12493_v24 = vand.u32 4294901760, %v9307_v59  ;;  %vm62_vm13 = vcmp.eq.s32.totalorder %v9298_v47, %v6896_v48  ;;  %vm75_vm14 = vcmp.eq.s32.totalorder %v9298_v47, %v6885_v57  ;;  %vm88_vm15 = vcmp.eq.s32.totalorder %v9298_v47, %v6917_v28 }
 0x1d4   :  { %3248 = vmatmul.f32.gmra.mxu2 %v3059_v27  ;;  %3337 = vmatpush.msra.mxu0 %v12487_v61  ;;  %12488 = vst [vmem:[#allocation113_spill] sm:$0xff] %v9346_v42  ;;  %v3567_v61 = vand.u32 4294901760, %v3566_v43  ;;  %v9362_v27 = vsub.f32 %v311_v51, %v9336_v6  ;;  %v12495_v51 = vand.u32 4294901760, %v8865_v31  ;;  %v9381_v50 = vsub.f32 %v310_v45, %v9353_v1 }
 0x1d5   :  { %3414 = vmatpush.msra.mxu1 %v8882_v23  ;;  %3461 = vmatpush.msra.mxu2 %v9209_v30  ;;  %v3067_v23 = vsub.f32 %v6116_v38, %v6116_v38  ;;  %v3062_v38 = vand.u32 4294901760, %v3061_v36  ;;  %v12497_v36 = vand.u32 4294901760, %v8887_v39 }
 0x1d6   :  { %3556 = vmatpush.msra.mxu3 %v3555_v53  ;;  %3341 = vmatpush.msra.mxu0 %v12490_v40  ;;  %v9358_v19 = vpop.f32.mrf.mxu0  ;;  %v9368_v53 = vpop.f32.mrf.mxu2  ;;  %v3573_v40 = vand.u32 4294901760, %v3572_v22  ;;  %v12498_v22 = vand.u32 4294901760, %v9342_v7 }
 0x1d7   :  { %12491 = vst [vmem:[#allocation114_spill] sm:$0xff] %v9358_v19  ;;  %3304 = vmatmul.f32.gmra.mxu3 %v3060_v35  ;;  %3416 = vmatpush.msra.mxu1 %v8902_v10  ;;  %v3578_v35 = vsub.f32 %v9307_v59, %v12493_v24  ;;  %v9387_v10 = vsub.f32 %v6078_v52, %v6078_v52  ;;  %v3068_v31 = vand.u32 4294901760, %v3067_v23  ;;  %v12143_v52 = vand.u32 4294901760, %v9381_v50 }
 0x1d8   :  { %12492 = vst [vmem:[#allocation115_spill] sm:$0xff] %v9368_v53  ;;  %3463 = vmatpush.msra.mxu2 %v9222_v20  ;;  %3562 = vmatpush.msra.mxu3 %v3561_v29  ;;  %v9375_v43 = vpop.f32.mrf.mxu3  ;;  %v12496_v29 = vand.u32 4294901760, %v9326_v3  ;;  %v356_v53 = vld [vmem:[%s12054_s1 + $0x4f0] sm:$0xff] }
 0x1d9   :  { %12494 = vst [vmem:[#allocation116_spill] sm:$0xff] %v9375_v43  ;;  %3345 = vmatpush.msra.mxu0 %v12495_v51  ;;  %3418 = vmatpush.msra.mxu1 %v8917_v63  ;;  %v12145_v63 = vand.u32 4294901760, %v9362_v27  ;;  %v3579_v45 = vand.u32 4294901760, %v3578_v35  ;;  %v12499_v51 = vand.u32 4294901760, %v8915_v25  ;;  %v12144_v39 = vand.u32 4294901760, %v9387_v10 }
 0x1da   :  { %3465 = vmatpush.msra.mxu2 %v9244_v33  ;;  %3568 = vmatpush.msra.mxu3 %v3567_v61  ;;  %v3584_v24 = vsub.f32 %v9326_v3, %v12496_v29  ;;  %v3590_v61 = vsub.f32 %v9342_v7, %v12498_v22  ;;  %v3069_v35 = vsub.f32 %v3067_v23, %v3068_v31  ;;  %v12501_v25 = vand.u32 4294901760, %v8932_v37 }
 0x1db   :  { %6198 = vmatmul.msk.f32.gmra.mxu1 %vm87_vm11, %v12234_v41  ;;  %3063 = vmatmul.f32.gmra.mxu0 %v3062_v38  ;;  %v3479_v37 = vsub.f32 %v9387_v10, %v12144_v39 }
 0x1dc   :  { %3349 = vmatpush.msra.mxu0 %v12497_v36  ;;  %3420 = vmatpush.msra.mxu1 %v8935_v2  ;;  %v3585_v38 = vand.u32 4294901760, %v3584_v24  ;;  %v9407_v2 = vpop.f32.mrf.mxu1  ;;  %v3591_v29 = vand.u32 4294901760, %v3590_v61 }
 0x1dd   :  { %3467 = vmatpush.msra.mxu2 %v9272_v58  ;;  %3574 = vmatpush.msra.mxu3 %v3573_v40  ;;  %12500 = vst [vmem:[#allocation117_spill] sm:$0xff] %v9407_v2  ;;  %v3596_v40 = vsub.f32 %v9362_v27, %v12145_v63  ;;  %v334_v63 = vld [vmem:[%s12054_s1 + $0x440] sm:$0xff] }
 0x1de   :  { %3253 = vmatmul.f32.gmra.mxu2 %v3067_v23  ;;  %3353 = vmatpush.msra.mxu0 %v12499_v51  ;;  %v6091_v23 = vsel %vm62_vm13, 1.0, %v12235_v56 }
 0x1df   :  { %3422 = vmatpush.msra.mxu1 %v8961_v5  ;;  %3469 = vmatpush.msra.mxu2 %v9290_v46  ;;  %v3602_v5 = vsub.f32 %v9381_v50, %v12143_v52  ;;  %v9426_v36 = vpop.f32.mrf.mxu2  ;;  %v3597_v22 = vand.u32 4294901760, %v3596_v40  ;;  %v9438_v61 = vsub.f32 %v6091_v23, %v6091_v23  ;;  %v12540_v52 = vand.u32 4294901760, %v9307_v59 }
 0x1e0   :  { %3580 = vmatpush.msra.mxu3 %v3579_v45  ;;  %3357 = vmatpush.msra.mxu0 %v12501_v25  ;;  %v9416_v24 = vpop.f32.mrf.mxu0  ;;  %12503 = vst [vmem:[#allocation119_spill] sm:$0xff] %v9426_v36  ;;  %v3070_v45 = vand.u32 4294901760, %v3069_v35  ;;  %v12510_v25 = vld [vmem:[#allocation90_spill] sm:$0xff] }
 0x1e1   :  { %12502 = vst [vmem:[#allocation118_spill] sm:$0xff] %v9416_v24  ;;  %3310 = vmatmul.f32.gmra.mxu3 %v3068_v31  ;;  %3424 = vmatpush.msra.mxu1 %v8981_v9  ;;  %v12505_v9 = vand.u32 4294901760, %v8944_v17  ;;  %v3603_v51 = vand.u32 4294901760, %v3602_v5  ;;  %v12507_v17 = vand.u32 4294901760, %v8994_v62  ;;  %v12141_v35 = vand.u32 4294901760, %v9438_v61 }
 0x1e2   :  { %3471 = vmatpush.msra.mxu2 %v9309_v16  ;;  %3586 = vmatpush.msra.mxu3 %v3585_v38  ;;  %v9432_v31 = vpop.f32.mrf.mxu3  ;;  %v12506_v38 = vand.u32 4294901760, %v8966_v49  ;;  %v12509_v49 = vand.u32 4294901760, %v9079_v21  ;;  %v6104_v62 = vsel %vm75_vm14, 1.0, %v12235_v56 }
 0x1e3   :  { %12504 = vst [vmem:[#allocation120_spill] sm:$0xff] %v9432_v31  ;;  %3361 = vmatpush.msra.mxu0 %v12505_v9  ;;  %3426 = vmatpush.msra.mxu1 %v8996_v15  ;;  %v3480_v15 = vand.u32 4294901760, %v3479_v37  ;;  %v12514_v37 = vld [vmem:[#allocation96_spill] sm:$0xff] }
 0x1e4   :  { %3473 = vmatpush.msra.mxu2 %v9336_v6  ;;  %3592 = vmatpush.msra.mxu3 %v3591_v29  ;;  %v9453_v40 = vpop.f32.mrf.mxu1  ;;  %v12511_v29 = vand.u32 4294901760, %v12510_v25  ;;  %v12515_v9 = vand.u32 4294901760, %v12514_v37  ;;  %v12521_v25 = vand.u32 4294901760, %v9139_v55 }
 0x1e5   :  { %6203 = vmatmul.msk.f32.vlgmr.msra.gmra.mxu1 %vm48_vm8, %v12234_v41  ;;  %3071 = vmatmul.f32.gmra.mxu0 %v3070_v45  ;;  %12508 = vst [vmem:[#allocation121_spill] sm:$0xff] %v9453_v40  ;;  %v3487_v45 = vsub.f32 %v9438_v61, %v12141_v35  ;;  %v351_v40 = vld [vmem:[%s12054_s1 + $0x4c8] sm:$0xff] }
 0x1e6   :  { %3365 = vmatpush.msra.mxu0 %v12506_v38  ;;  %3475 = vmatpush.msra.mxu2 %v9353_v1 }
 0x1e7   :  { %3598 = vmatpush.msra.mxu3 %v3597_v22  ;;  %3692 = vmatpush.msrb.mxu1 %v9054_v60 }
 0x1e8   :  { %3369 = vmatpush.msra.mxu0 %v12507_v17  ;;  %3481 = vmatmul.f32.vlgmr.msra.gmra.mxu2 %v3480_v15  ;;  %v12519_v15 = vld [vmem:[#allocation99_spill] sm:$0xff] }
 0x1e9   :  { %3604 = vmatpush.msra.mxu3 %v3603_v51  ;;  %3694 = vmatpush.msrb.mxu1 %v9064_v14  ;;  %v9471_v23 = vpop.f32.mrf.mxu2  ;;  %v12517_v51 = vld [vmem:[#allocation91_spill] sm:$0xff]  ;;  %v12520_v17 = vand.u32 4294901760, %v12519_v15 }
 0x1ea   :  { %3751 = vmatpush.msrb.mxu2 %v12509_v49  ;;  %3373 = vmatpush.msra.mxu0 %v12511_v29  ;;  %v9460_v5 = vpop.f32.mrf.mxu0  ;;  %12513 = vst [vmem:[#allocation122_spill] sm:$0xff] %v9471_v23  ;;  %v12518_v38 = vand.u32 4294901760, %v12517_v51  ;;  %v9487_v49 = vsub.f32 %v6104_v62, %v6104_v62 }
 0x1eb   :  { %12512 = vst [vmem:[#allocation90_spill] sm:$0xff] %v9460_v5  ;;  %6207 = vmatmul.msk.f32.vlgmr.msra.gmra.mxu3 %vm49_vm12, %v12234_v41  ;;  %3696 = vmatpush.msrb.mxu1 %v9083_v4 }
 0x1ec   :  { %3755 = vmatpush.msrb.mxu2 %v12515_v9  ;;  %3830 = vmatpush.msrb.mxu3 %v9054_v60  ;;  %v9479_v22 = vpop.f32.mrf.mxu3  ;;  %v3488_v60 = vand.u32 4294901760, %v3487_v45  ;;  %v9506_v29 = vpop.f32.mrf.mxu1  ;;  %v12527_v45 = vld [vmem:[#allocation103_spill] sm:$0xff] }
 0x1ed   :  { %12516 = vst [vmem:[#allocation96_spill] sm:$0xff] %v9479_v22  ;;  %3377 = vmatpush.msra.mxu0 %v12518_v38  ;;  %3698 = vmatpush.msrb.mxu1 %v9109_v11 }
 0x1ee   :  { %3759 = vmatpush.msrb.mxu2 %v12520_v17  ;;  %3832 = vmatpush.msrb.mxu3 %v9064_v14  ;;  %v12140_v14 = vand.u32 4294901760, %v9487_v49  ;;  %12522 = vst [vmem:[#allocation91_spill] sm:$0xff] %v9506_v29 }
 0x1ef   :  { %6204 = vmatmul.msk.f32.gmra.mxu1 %vm61_vm9, %v12234_v41  ;;  %6199 = vmatmul.msk.f32.vlgmr.msra.gmra.mxu0 %vm48_vm8, %v12234_v41 }
 0x1f0   :  { %3624 = vmatpush.msrb.mxu0 %v9079_v21  ;;  %3700 = vmatpush.msrb.mxu1 %v9128_v26  ;;  %v12523_v21 = vld [vmem:[#allocation102_spill] sm:$0xff]  ;;  %v3495_v51 = vsub.f32 %v9487_v49, %v12140_v14 }
 0x1f1   :  { %3763 = vmatpush.msrb.mxu2 %v12521_v25  ;;  %3834 = vmatpush.msrb.mxu3 %v9083_v4  ;;  %v12524_v62 = vand.u32 4294901760, %v12523_v21 }
 0x1f2   :  { %3489 = vmatmul.f32.gmra.mxu2 %v3488_v60  ;;  %3627 = vmatpush.msrb.mxu0 %v12514_v37  ;;  %v6117_v37 = vsel %vm88_vm15, 1.0, %v12235_v56  ;;  %v12531_v60 = vand.u32 4294901760, %v9220_v54 }
 0x1f3   :  { %3702 = vmatpush.msrb.mxu1 %v9141_v13  ;;  %3767 = vmatpush.msrb.mxu2 %v12524_v62  ;;  %v9524_v9 = vpop.f32.mrf.mxu2  ;;  %v9539_v17 = vsub.f32 %v6117_v37, %v6117_v37  ;;  %v339_v37 = vld [vmem:[%s12054_s1 + $0x468] sm:$0xff] }
 0x1f4   :  { %3836 = vmatpush.msrb.mxu3 %v9109_v11  ;;  %3630 = vmatpush.msrb.mxu0 %v12519_v15  ;;  %v9513_v4 = vpop.f32.mrf.mxu0  ;;  %12526 = vst [vmem:[#allocation102_spill] sm:$0xff] %v9524_v9  ;;  %v12528_v11 = vand.u32 4294901760, %v12527_v45  ;;  %v12530_v15 = vand.u32 4294901760, %v9197_v12 }
 0x1f5   :  { %12525 = vst [vmem:[#allocation99_spill] sm:$0xff] %v9513_v4  ;;  %6208 = vmatmul.msk.f32.gmra.mxu3 %vm62_vm13, %v12234_v41  ;;  %3704 = vmatpush.msrb.mxu1 %v9164_v18  ;;  %v12142_v62 = vand.u32 4294901760, %v9539_v17  ;;  %v12578_v23 = vand.u32 4294901760, %v9539_v17 }
 0x1f6   :  { %3771 = vmatpush.msrb.mxu2 %v12528_v11  ;;  %3838 = vmatpush.msrb.mxu3 %v9128_v26  ;;  %v9532_v38 = vpop.f32.mrf.mxu3  ;;  %v341_v26 = vld [vmem:[%s12054_s1 + $0x478] sm:$0xff]  ;;  %v12533_v11 = vand.u32 4294901760, %v9241_v8 }
 0x1f7   :  { %12529 = vst [vmem:[#allocation103_spill] sm:$0xff] %v9532_v38  ;;  %3633 = vmatpush.msrb.mxu0 %v9139_v55  ;;  %3706 = vmatpush.msrb.mxu1 %v9191_v44  ;;  %v340_v55 = vld [vmem:[%s12054_s1 + $0x470] sm:$0xff]  ;;  %v9560_v25 = vand.u32 4294901760, %v341_v26  ;;  %v9691_v38 = vand.u32 4294901760, %v334_v63 }
 0x1f8   :  { %3775 = vmatpush.msrb.mxu2 %v12530_v15  ;;  %3840 = vmatpush.msrb.mxu3 %v9141_v13  ;;  %v3496_v13 = vand.u32 4294901760, %v3495_v51  ;;  %v9572_v51 = vand.u32 4294901760, %v340_v55 }
 0x1f9   :  { %6205 = vmatmul.msk.f32.gmra.mxu1 %vm74_vm10, %v12234_v41  ;;  %6200 = vmatmul.msk.f32.gmra.mxu0 %vm61_vm9, %v12234_v41  ;;  %v9587_v15 = vsub.f32 %v341_v26, %v9560_v25 }
 0x1fa   :  { %3636 = vmatpush.msrb.mxu0 %v12523_v21  ;;  %3708 = vmatpush.msrb.mxu1 %v9209_v30  ;;  %v9564_v21 = vpop.f32.mrf.mxu1  ;;  %v9604_v26 = vsub.f32 %v340_v55, %v9572_v51 }
 0x1fb   :  { %3779 = vmatpush.msrb.mxu2 %v12531_v60  ;;  %3842 = vmatpush.msrb.mxu3 %v9164_v18  ;;  %12532 = vst [vmem:[#allocation123_spill] sm:$0xff] %v9564_v21  ;;  %v338_v18 = vld [vmem:[%s12054_s1 + $0x460] sm:$0xff] }
 0x1fc   :  { %3497 = vmatmul.f32.gmra.mxu2 %v3496_v13  ;;  %3639 = vmatpush.msrb.mxu0 %v12527_v45  ;;  %v9589_v13 = vand.u32 4294901760, %v339_v37  ;;  %v9606_v35 = vand.u32 4294901760, %v338_v18  ;;  %v12147_v39 = vand.u32 4294901760, %v9604_v26 }
 0x1fd   :  { %3710 = vmatpush.msrb.mxu1 %v9222_v20  ;;  %3783 = vmatpush.msrb.mxu2 %v12533_v11  ;;  %v3503_v11 = vsub.f32 %v9539_v17, %v12142_v62  ;;  %v336_v62 = vld [vmem:[%s12054_s1 + $0x450] sm:$0xff] }
 0x1fe   :  { %3844 = vmatpush.msrb.mxu3 %v9191_v44  ;;  %3642 = vmatpush.msrb.mxu0 %v9197_v12  ;;  %v9579_v45 = vpop.f32.mrf.mxu0  ;;  %v9591_v44 = vpop.f32.mrf.mxu2  ;;  %v12536_v12 = vld [vmem:[#allocation108_spill] sm:$0xff]  ;;  %v9624_v55 = vsub.f32 %v339_v37, %v9589_v13  ;;  %v9638_v37 = vsub.f32 %v338_v18, %v9606_v35  ;;  %v12545_v18 = vand.u32 4294901760, %v9342_v7 }
 0x1ff   :  { %12534 = vst [vmem:[#allocation124_spill] sm:$0xff] %v9579_v45  ;;  %6209 = vmatmul.msk.f32.gmra.mxu3 %vm75_vm14, %v12234_v41  ;;  %3712 = vmatpush.msrb.mxu1 %v9244_v33  ;;  %v12537_v60 = vand.u32 4294901760, %v12536_v12 }
 0x200   :  { %12535 = vst [vmem:[#allocation125_spill] sm:$0xff] %v9591_v44  ;;  %3846 = vmatpush.msrb.mxu3 %v9209_v30  ;;  %v9599_v14 = vpop.f32.mrf.mxu3  ;;  %3645 = vmatpush.msrb.mxu0 %v9220_v54  ;;  %v12539_v30 = vand.u32 4294901760, %v9278_v32  ;;  %v12146_v54 = vand.u32 4294901760, %v9587_v15 }
 0x201   :  { %3787 = vmatpush.msrb.mxu2 %v12537_v60  ;;  %12538 = vst [vmem:[#allocation108_spill] sm:$0xff] %v9599_v14  ;;  %3714 = vmatpush.msrb.mxu1 %v9272_v58  ;;  %v337_v60 = vld [vmem:[%s12054_s1 + $0x458] sm:$0xff] }
 0x202   :  { %3848 = vmatpush.msrb.mxu3 %v9222_v20  ;;  %6206 = vmatmul.msk.f32.gmra.mxu1 %vm87_vm11, %v12234_v41  ;;  %v3504_v20 = vand.u32 4294901760, %v3503_v11  ;;  %v335_v11 = vld [vmem:[%s12054_s1 + $0x448] sm:$0xff] }
 0x203   :  { %3791 = vmatpush.msrb.mxu2 %v12539_v30  ;;  %6201 = vmatmul.msk.f32.gmra.mxu0 %vm74_vm10, %v12234_v41  ;;  %v9628_v30 = vand.u32 4294901760, %v337_v60 }
 0x204   :  { %3648 = vmatpush.msrb.mxu0 %v9241_v8  ;;  %3716 = vmatpush.msrb.mxu1 %v9290_v46  ;;  %v9641_v8 = vpop.f32.mrf.mxu1 }
 0x205   :  { %3795 = vmatpush.msrb.mxu2 %v12540_v52  ;;  %3850 = vmatpush.msrb.mxu3 %v9244_v33  ;;  %12541 = vst [vmem:[#allocation126_spill] sm:$0xff] %v9641_v8  ;;  %v12542_v52 = vand.u32 4294901760, %v9326_v3  ;;  %v3946_v33 = vsub.f32 %v9587_v15, %v12146_v54 }
 0x206   :  { %3505 = vmatmul.f32.gmra.mxu2 %v3504_v20  ;;  %3651 = vmatpush.msrb.mxu0 %v12536_v12  ;;  %v9653_v20 = vand.u32 4294901760, %v336_v62  ;;  %v9658_v12 = vsub.f32 %v337_v60, %v9628_v30  ;;  %v9674_v60 = vand.u32 4294901760, %v335_v11 }
 0x207   :  { %3718 = vmatpush.msrb.mxu1 %v9309_v16  ;;  %3799 = vmatpush.msrb.mxu2 %v12542_v52  ;;  %v9676_v54 = vpop.f32.mrf.mxu2  ;;  %v3947_v44 = vand.u32 4294901760, %v3946_v33  ;;  %v12549_v33 = vand.u32 4294901760, %v9387_v10 }
 0x208   :  { %3852 = vmatpush.msrb.mxu3 %v9272_v58  ;;  %3654 = vmatpush.msrb.mxu0 %v9278_v32  ;;  %v9663_v52 = vpop.f32.mrf.mxu0  ;;  %v3952_v58 = vsub.f32 %v9604_v26, %v12147_v39  ;;  %12544 = vst [vmem:[#allocation128_spill] sm:$0xff] %v9676_v54  ;;  %v12547_v39 = vand.u32 4294901760, %v9624_v55  ;;  %v9689_v21 = vsub.f32 %v336_v62, %v9653_v20  ;;  %v12550_v62 = vand.u32 4294901760, %v9638_v37 }
 0x209   :  { %12543 = vst [vmem:[#allocation127_spill] sm:$0xff] %v9663_v52  ;;  %6210 = vmatmul.msk.f32.gmra.mxu3 %vm88_vm15, %v12234_v41  ;;  %3720 = vmatpush.msrb.mxu1 %v9336_v6  ;;  %v9710_v45 = vsub.f32 %v335_v11, %v9674_v60  ;;  %v9723_v11 = vsub.f32 %v334_v63, %v9691_v38  ;;  %v353_v52 = vld [vmem:[%s12054_s1 + $0x4d8] sm:$0xff] }
 0x20a   :  { %3803 = vmatpush.msrb.mxu2 %v12545_v18  ;;  %3854 = vmatpush.msrb.mxu3 %v9290_v46  ;;  %v9681_v14 = vpop.f32.mrf.mxu3  ;;  %v3958_v32 = vsub.f32 %v9624_v55, %v12547_v39  ;;  %v333_v46 = vld [vmem:[%s12054_s1 + $0x438] sm:$0xff]  ;;  %v12548_v18 = vand.u32 4294901760, %v9362_v27  ;;  %v3953_v39 = vand.u32 4294901760, %v3952_v58 }
 0x20b   :  { %12546 = vst [vmem:[#allocation129_spill] sm:$0xff] %v9681_v14  ;;  %3657 = vmatpush.msrb.mxu0 %v9307_v59  ;;  %3722 = vmatpush.msrb.mxu1 %v9353_v1  ;;  %v12148_v59 = vand.u32 4294901760, %v9658_v12  ;;  %v3964_v14 = vsub.f32 %v9638_v37, %v12550_v62 }
 0x20c   :  { %3807 = vmatpush.msrb.mxu2 %v12548_v18  ;;  %3856 = vmatpush.msrb.mxu3 %v9309_v16  ;;  %v12551_v16 = vand.u32 4294901760, %v9381_v50  ;;  %v9715_v18 = vand.u32 4294901760, %v333_v46  ;;  %v3959_v58 = vand.u32 4294901760, %v3958_v32  ;;  %v9733_v62 = vpop.f32.mrf.mxu1 }
 0x20d   :  { %3726 = vmatmul.f32.vlgmr.msrb.gmra.mxu1 %v12549_v33  ;;  %6202 = vmatmul.msk.f32.gmra.mxu0 %vm87_vm11, %v12234_v41  ;;  %v12149_v33 = vand.u32 4294901760, %v9689_v21  ;;  %12552 = vst [vmem:[#allocation130_spill] sm:$0xff] %v9733_v62  ;;  %v3965_v63 = vand.u32 4294901760, %v3964_v14 }
 0x20e   :  { %3660 = vmatpush.msrb.mxu0 %v9326_v3  ;;  %3811 = vmatpush.msrb.mxu2 %v12551_v16  ;;  %v3970_v3 = vsub.f32 %v9658_v12, %v12148_v59  ;;  %v9745_v32 = vsub.f32 %v333_v46, %v9715_v18  ;;  %v330_v16 = vld [vmem:[%s12054_s1 + $0x420] sm:$0xff] }
 0x20f   :  { %3858 = vmatpush.msrb.mxu3 %v9336_v6  ;;  %3948 = vmatpush.msra.mxu1 %v3947_v44  ;;  %v331_v6 = vld [vmem:[%s12054_s1 + $0x428] sm:$0xff]  ;;  %v9740_v44 = vand.u32 4294901760, %v332_v34  ;;  %v9775_v62 = vand.u32 4294901760, %v330_v16 }
 0x210   :  { %3663 = vmatpush.msrb.mxu0 %v9342_v7  ;;  %6211 = vmatmul.msk.f32.vlgmr.msrb.gmra.mxu2 %vm49_vm12, %v12234_v41  ;;  %v9760_v14 = vand.u32 4294901760, %v331_v6 }
 0x211   :  { %3860 = vmatpush.msrb.mxu3 %v9353_v1  ;;  %3954 = vmatpush.msra.mxu1 %v3953_v39  ;;  %v3976_v1 = vsub.f32 %v9689_v21, %v12149_v33  ;;  %v9762_v46 = vpop.f32.mrf.mxu2  ;;  %v3971_v39 = vand.u32 4294901760, %v3970_v3  ;;  %v12557_v3 = vand.u32 4294901760, %v9438_v61 }
 0x212   :  { %4058 = vmatpush.msra.mxu2 %v9587_v15  ;;  %3666 = vmatpush.msrb.mxu0 %v9362_v27  ;;  %v9750_v59 = vpop.f32.mrf.mxu0  ;;  %12554 = vst [vmem:[#allocation132_spill] sm:$0xff] %v9762_v46  ;;  %v9773_v27 = vsub.f32 %v332_v34, %v9740_v44  ;;  %v329_v46 = vld [vmem:[%s12054_s1 + $0x418] sm:$0xff]  ;;  %v12558_v34 = vand.u32 4294901760, %v9723_v11 }
 0x213   :  { %12553 = vst [vmem:[#allocation131_spill] sm:$0xff] %v9750_v59  ;;  %6215 = vmatmul.msk.f32.vlgmr.msrb.gmra.mxu3 %vm49_vm12, %v12234_v41  ;;  %3960 = vmatpush.msra.mxu1 %v3959_v58  ;;  %v12556_v58 = vand.u32 4294901760, %v9710_v45  ;;  %v9793_v9 = vand.u32 4294901760, %v329_v46 }
 0x214   :  { %4061 = vmatpush.msra.mxu2 %v9604_v26  ;;  %4126 = vmatpush.msra.mxu3 %v9560_v25  ;;  %v9766_v7 = vpop.f32.mrf.mxu3 }
 0x215   :  { %12555 = vst [vmem:[#allocation133_spill] sm:$0xff] %v9766_v7  ;;  %3669 = vmatpush.msrb.mxu0 %v9381_v50  ;;  %3966 = vmatpush.msra.mxu1 %v3965_v63  ;;  %v3982_v33 = vsub.f32 %v9710_v45, %v12556_v58  ;;  %v3977_v63 = vand.u32 4294901760, %v3976_v1  ;;  %v3988_v58 = vsub.f32 %v9723_v11, %v12558_v34  ;;  %v328_v50 = vld [vmem:[%s12054_s1 + $0x410] sm:$0xff]  ;;  %v9812_v34 = vpop.f32.mrf.mxu1 }
 0x216   :  { %4064 = vmatpush.msra.mxu2 %v9624_v55  ;;  %4128 = vmatpush.msra.mxu3 %v9572_v51  ;;  %v9790_v7 = vsub.f32 %v331_v6, %v9760_v14  ;;  %v12559_v6 = vand.u32 4294901760, %v9745_v32  ;;  %12560 = vst [vmem:[#allocation134_spill] sm:$0xff] %v9812_v34  ;;  %v9819_v43 = vand.u32 4294901760, %v328_v50  ;;  %v326_v34 = vld [vmem:[%s12054_s1 + $0x400] sm:$0xff] }
 0x217   :  { %3732 = vmatmul.f32.gmra.mxu1 %v12557_v3  ;;  %3672 = vmatmul.f32.vlgmr.msrb.gmra.mxu0 %v9387_v10  ;;  %v3983_v10 = vand.u32 4294901760, %v3982_v33  ;;  %v9802_v3 = vsub.f32 %v330_v16, %v9775_v62  ;;  %v327_v33 = vld [vmem:[%s12054_s1 + $0x408] sm:$0xff]  ;;  %v3989_v16 = vand.u32 4294901760, %v3988_v58  ;;  %v9854_v22 = vand.u32 4294901760, %v326_v34 }
 0x218   :  { %3879 = vmatpush.msra.mxu0 %v9560_v25  ;;  %3972 = vmatpush.msra.mxu1 %v3971_v39  ;;  %v3994_v39 = vsub.f32 %v9745_v32, %v12559_v6  ;;  %v9824_v6 = vsub.f32 %v329_v46, %v9793_v9  ;;  %v9839_v46 = vand.u32 4294901760, %v327_v33  ;;  %v9852_v1 = vsub.f32 %v328_v50, %v9819_v43 }
 0x219   :  { %4067 = vmatpush.msra.mxu2 %v9638_v37  ;;  %4130 = vmatpush.msra.mxu3 %v9589_v13 }
 0x21a   :  { %6212 = vmatmul.msk.f32.gmra.mxu2 %vm62_vm13, %v12234_v41  ;;  %3881 = vmatpush.msra.mxu0 %v9572_v51  ;;  %v9866_v50 = vsub.f32 %v327_v33, %v9839_v46 }
 0x21b   :  { %3978 = vmatpush.msra.mxu1 %v3977_v63  ;;  %4070 = vmatpush.msra.mxu2 %v9658_v12  ;;  %v12562_v63 = vand.u32 4294901760, %v9773_v27  ;;  %v9841_v54 = vpop.f32.mrf.mxu2 }
 0x21c   :  { %4132 = vmatpush.msra.mxu3 %v9606_v35  ;;  %3883 = vmatpush.msra.mxu0 %v9589_v13  ;;  %v9829_v59 = vpop.f32.mrf.mxu0  ;;  %12563 = vst [vmem:[#allocation136_spill] sm:$0xff] %v9841_v54  ;;  %v12567_v54 = vand.u32 4294901760, %v9802_v3 }
 0x21d   :  { %12561 = vst [vmem:[#allocation135_spill] sm:$0xff] %v9829_v59  ;;  %6216 = vmatmul.msk.f32.gmra.mxu3 %vm62_vm13, %v12234_v41  ;;  %3984 = vmatpush.msra.mxu1 %v3983_v10  ;;  %v4000_v58 = vsub.f32 %v9773_v27, %v12562_v63  ;;  %v3995_v59 = vand.u32 4294901760, %v3994_v39  ;;  %v12565_v10 = vand.u32 4294901760, %v9790_v7  ;;  %v9883_v33 = vpop.f32.mrf.mxu1 }
 0x21e   :  { %4073 = vmatpush.msra.mxu2 %v9689_v21  ;;  %4134 = vmatpush.msra.mxu3 %v9628_v30  ;;  %v9845_v29 = vpop.f32.mrf.mxu3  ;;  %12568 = vst [vmem:[#allocation138_spill] sm:$0xff] %v9866_v50 }
 0x21f   :  { %12564 = vst [vmem:[#allocation137_spill] sm:$0xff] %v9845_v29  ;;  %3885 = vmatpush.msra.mxu0 %v9606_v35  ;;  %3990 = vmatpush.msra.mxu1 %v3989_v16  ;;  %v4006_v63 = vsub.f32 %v9790_v7, %v12565_v10  ;;  %v12566_v29 = vand.u32 4294901760, %v9487_v49  ;;  %v4001_v16 = vand.u32 4294901760, %v4000_v58  ;;  %v4012_v10 = vsub.f32 %v9802_v3, %v12567_v54 }
 0x220   :  { %4076 = vmatpush.msra.mxu2 %v9710_v45  ;;  %4136 = vmatpush.msra.mxu3 %v9653_v20  ;;  %v12570_v54 = vand.u32 4294901760, %v9824_v6  ;;  %12571 = vst [vmem:[#allocation140_spill] sm:$0xff] %v9883_v33 }
 0x221   :  { %3738 = vmatmul.f32.gmra.mxu1 %v12566_v29  ;;  %3677 = vmatmul.f32.gmra.mxu0 %v9438_v61  ;;  %v4007_v39 = vand.u32 4294901760, %v4006_v63  ;;  %v9873_v61 = vsub.f32 %v326_v34, %v9854_v22  ;;  %v4013_v58 = vand.u32 4294901760, %v4012_v10  ;;  %v357_v63 = vld [vmem:[%s12054_s1 + $0x4f8] sm:$0xff]  ;;  %v12574_v34 = vld [vmem:[#allocation5_spill] sm:$0xff] }
 0x222   :  { %3887 = vmatpush.msra.mxu0 %v9628_v30  ;;  %3996 = vmatpush.msra.mxu1 %v3995_v59  ;;  %v4018_v59 = vsub.f32 %v9824_v6, %v12570_v54  ;;  %v9903_v33 = vadd.s32 1024, %v12574_v34  ;;  %v9912_v8 = vand.u32 4294901760, %v357_v63 }
 0x223   :  { %4079 = vmatpush.msra.mxu2 %v9723_v11  ;;  %4138 = vmatpush.msra.mxu3 %v9674_v60  ;;  %12569 = vst [vmem:[#allocation139_spill] sm:$0xff] %v9873_v61 }
 0x224   :  { %6213 = vmatmul.msk.f32.gmra.mxu2 %vm75_vm14, %v12234_v41  ;;  %3889 = vmatpush.msra.mxu0 %v9653_v20  ;;  %vm50_vm0 = vcmp.eq.s32.totalorder %v9903_v33, %v6868_v0  ;;  %v9937_v42 = vsub.f32 %v357_v63, %v9912_v8  ;;  %vm63_vm1 = vcmp.eq.s32.totalorder %v9903_v33, %v6896_v48 }
 0x225   :  { %4002 = vmatpush.msra.mxu1 %v4001_v16  ;;  %4082 = vmatpush.msra.mxu2 %v9745_v32  ;;  %v12573_v16 = vand.u32 4294901760, %v9852_v1  ;;  %v6079_v63 = vsel %vm50_vm0, 1.0, %v12235_v56  ;;  %vm76_vm2 = vcmp.eq.s32.totalorder %v9903_v33, %v6885_v57  ;;  %vm89_vm3 = vcmp.eq.s32.totalorder %v9903_v33, %v6917_v28 }
 0x226   :  { %4140 = vmatpush.msra.mxu3 %v9691_v38  ;;  %3891 = vmatpush.msra.mxu0 %v9674_v60  ;;  %v9892_v29 = vpop.f32.mrf.mxu0 }
 0x227   :  { %12572 = vst [vmem:[#allocation141_spill] sm:$0xff] %v9892_v29  ;;  %6217 = vmatmul.msk.f32.gmra.mxu3 %vm75_vm14, %v12234_v41  ;;  %4008 = vmatpush.msra.mxu1 %v4007_v39  ;;  %v4024_v10 = vsub.f32 %v9852_v1, %v12573_v16  ;;  %v9908_v29 = vpop.f32.mrf.mxu2  ;;  %v4019_v39 = vand.u32 4294901760, %v4018_v59  ;;  %v12577_v16 = vand.u32 4294901760, %v9866_v50  ;;  %v355_v59 = vld [vmem:[%s12054_s1 + $0x4e8] sm:$0xff] }
 0x228   :  { %12575 = vst [vmem:[#allocation142_spill] sm:$0xff] %v9908_v29  ;;  %4085 = vmatpush.msra.mxu2 %v9773_v27  ;;  %4142 = vmatpush.msra.mxu3 %v9715_v18  ;;  %v9914_v4 = vpop.f32.mrf.mxu3  ;;  %v9922_v29 = vand.u32 4294901760, %v356_v53 }
 0x229   :  { %12576 = vst [vmem:[#allocation143_spill] sm:$0xff] %v9914_v4  ;;  %3893 = vmatpush.msra.mxu0 %v9691_v38  ;;  %4014 = vmatpush.msra.mxu1 %v4013_v58  ;;  %v4030_v54 = vsub.f32 %v9866_v50, %v12577_v16  ;;  %v4025_v58 = vand.u32 4294901760, %v4024_v10  ;;  %v12579_v4 = vand.u32 4294901760, %v9873_v61 }
 0x22a   :  { %4088 = vmatpush.msra.mxu2 %v9790_v7  ;;  %4144 = vmatpush.msra.mxu3 %v9740_v44  ;;  %v9956_v10 = vsub.f32 %v356_v53, %v9922_v29 }
 0x22b   :  { %3744 = vmatmul.f32.gmra.mxu1 %v12578_v23  ;;  %3682 = vmatmul.f32.gmra.mxu0 %v9487_v49  ;;  %v4036_v16 = vsub.f32 %v9873_v61, %v12579_v4  ;;  %v4031_v23 = vand.u32 4294901760, %v4030_v54  ;;  %v9941_v49 = vand.u32 4294901760, %v355_v59  ;;  %v354_v4 = vld [vmem:[%s12054_s1 + $0x4e0] sm:$0xff]  ;;  %v9958_v54 = vpop.f32.mrf.mxu1 }
 0x22c   :  { %3895 = vmatpush.msra.mxu0 %v9715_v18  ;;  %4020 = vmatpush.msra.mxu1 %v4019_v39  ;;  %12580 = vst [vmem:[#allocation144_spill] sm:$0xff] %v9956_v10  ;;  %v9967_v31 = vand.u32 4294901760, %v354_v4 }
 0x22d   :  { %4091 = vmatpush.msra.mxu2 %v9802_v3  ;;  %4146 = vmatpush.msra.mxu3 %v9760_v14  ;;  %12581 = vst [vmem:[#allocation145_spill] sm:$0xff] %v9958_v54  ;;  %v4037_v39 = vand.u32 4294901760, %v4036_v16  ;;  %v9976_v16 = vsub.f32 %v355_v59, %v9941_v49  ;;  %v352_v54 = vld [vmem:[%s12054_s1 + $0x4d0] sm:$0xff]  ;;  %v12586_v59 = vand.u32 4294901760, %v9937_v42 }
 0x22e   :  { %6214 = vmatmul.msk.f32.gmra.mxu2 %vm88_vm15, %v12234_v41  ;;  %3897 = vmatpush.msra.mxu0 %v9740_v44 }
 0x22f   :  { %4026 = vmatpush.msra.mxu1 %v4025_v58  ;;  %4094 = vmatpush.msra.mxu2 %v9824_v6  ;;  %v3911_v58 = vsub.f32 %v6079_v63, %v6079_v63  ;;  %12583 = vst [vmem:[#allocation147_spill] sm:$0xff] %v9976_v16  ;;  %v9981_v19 = vpop.f32.mrf.mxu2  ;;  %v9997_v63 = vsub.f32 %v354_v4, %v9967_v31  ;;  %v350_v4 = vld [vmem:[%s12054_s1 + $0x4c0] sm:$0xff] }
 0x230   :  { %4148 = vmatpush.msra.mxu3 %v9775_v62  ;;  %3899 = vmatpush.msra.mxu0 %v9760_v14  ;;  %v9969_v53 = vpop.f32.mrf.mxu0  ;;  %12584 = vst [vmem:[#allocation148_spill] sm:$0xff] %v9981_v19  ;;  %v9999_v19 = vand.u32 4294901760, %v352_v54 }
 0x231   :  { %12582 = vst [vmem:[#allocation146_spill] sm:$0xff] %v9969_v53  ;;  %6218 = vmatmul.msk.f32.gmra.mxu3 %vm88_vm15, %v12234_v41  ;;  %4032 = vmatpush.msra.mxu1 %v4031_v23  ;;  %v9986_v53 = vand.u32 4294901760, %v353_v52  ;;  %v4380_v23 = vsub.f32 %v9937_v42, %v12586_v59  ;;  %v12588_v59 = vand.u32 4294901760, %v9956_v10 }
 0x232   :  { %4097 = vmatpush.msra.mxu2 %v9852_v1  ;;  %4150 = vmatpush.msra.mxu3 %v9793_v9  ;;  %v9988_v47 = vpop.f32.mrf.mxu3  ;;  %12587 = vst [vmem:[#allocation150_spill] sm:$0xff] %v9997_v63  ;;  %v10034_v2 = vsub.f32 %v352_v54, %v9999_v19 }
 0x233   :  { %12585 = vst [vmem:[#allocation149_spill] sm:$0xff] %v9988_v47  ;;  %3901 = vmatpush.msra.mxu0 %v9775_v62  ;;  %4038 = vmatpush.msra.mxu1 %v4037_v39  ;;  %v3912_v39 = vand.u32 4294901760, %v3911_v58  ;;  %v4386_v47 = vsub.f32 %v9956_v10, %v12588_v59  ;;  %v10018_v5 = vsub.f32 %v353_v52, %v9986_v53  ;;  %v4381_v36 = vand.u32 4294901760, %v4380_v23  ;;  %v349_v10 = vld [vmem:[%s12054_s1 + $0x4b8] sm:$0xff] }
 0x234   :  { %4100 = vmatpush.msra.mxu2 %v9866_v50  ;;  %4152 = vmatpush.msra.mxu3 %v9819_v43  ;;  %v6092_v52 = vsel %vm63_vm1, 1.0, %v12235_v56  ;;  %12590 = vst [vmem:[#allocation152_spill] sm:$0xff] %v10034_v2 }
 0x235   :  { %6219 = vmatmul.msk.f32.vlgmr.msra.gmra.mxu1 %vm50_vm0, %v12234_v41  ;;  %3687 = vmatmul.f32.gmra.mxu0 %v9539_v17  ;;  %12589 = vst [vmem:[#allocation151_spill] sm:$0xff] %v10018_v5  ;;  %v10022_v17 = vand.u32 4294901760, %v351_v40  ;;  %v3913_v24 = vsub.f32 %v3911_v58, %v3912_v39  ;;  %v4387_v54 = vand.u32 4294901760, %v4386_v47  ;;  %v12596_v47 = vand.u32 4294901760, %v9997_v63 }
 0x236   :  { %3903 = vmatpush.msra.mxu0 %v9793_v9  ;;  %4103 = vmatpush.msra.mxu2 %v9873_v61  ;;  %v12592_v61 = vand.u32 4294901760, %v9976_v16 }
 0x237   :  { %4154 = vmatpush.msra.mxu3 %v9839_v46  ;;  %4264 = vmatpush.msrb.mxu1 %v9560_v25  ;;  %v10036_v25 = vpop.f32.mrf.mxu1  ;;  %v4398_v59 = vsub.f32 %v9997_v63, %v12596_v47 }
 0x238   :  { %3905 = vmatpush.msra.mxu0 %v9819_v43  ;;  %4106 = vmatmul.f32.vlgmr.msra.gmra.mxu2 %v3911_v58  ;;  %12591 = vst [vmem:[#allocation153_spill] sm:$0xff] %v10036_v25  ;;  %v4392_v23 = vsub.f32 %v9976_v16, %v12592_v61  ;;  %v10049_v25 = vand.u32 4294901760, %v350_v4  ;;  %v10055_v61 = vsub.f32 %v351_v40, %v10022_v17  ;;  %v348_v58 = vld [vmem:[%s12054_s1 + $0x4b0] sm:$0xff]  ;;  %v3914_v40 = vand.u32 4294901760, %v3913_v24  ;;  %v347_v24 = vld [vmem:[%s12054_s1 + $0x4a8] sm:$0xff] }
 0x239   :  { %4156 = vmatpush.msra.mxu3 %v9854_v22  ;;  %4266 = vmatpush.msrb.mxu1 %v9572_v51  ;;  %v3919_v51 = vsub.f32 %v6092_v52, %v6092_v52  ;;  %v10060_v16 = vpop.f32.mrf.mxu2 }
 0x23a   :  { %4313 = vmatpush.msrb.mxu2 %v9912_v8  ;;  %3907 = vmatpush.msra.mxu0 %v9839_v46  ;;  %v10051_v50 = vpop.f32.mrf.mxu0  ;;  %12594 = vst [vmem:[#allocation155_spill] sm:$0xff] %v10055_v61  ;;  %v10080_v47 = vsub.f32 %v350_v4, %v10049_v25  ;;  %v4399_v4 = vand.u32 4294901760, %v4398_v59  ;;  %v12604_v59 = vand.u32 4294901760, %v9604_v26  ;;  %v345_v26 = vld [vmem:[%s12054_s1 + $0x498] sm:$0xff] }
 0x23b   :  { %12593 = vst [vmem:[#allocation154_spill] sm:$0xff] %v10051_v50  ;;  %4160 = vmatmul.f32.vlgmr.msra.gmra.mxu3 %v3912_v39  ;;  %4268 = vmatpush.msrb.mxu1 %v9589_v13  ;;  %v10067_v13 = vand.u32 4294901760, %v349_v10  ;;  %v4393_v50 = vand.u32 4294901760, %v4392_v23  ;;  %v10082_v39 = vand.u32 4294901760, %v348_v58 }
 0x23c   :  { %12595 = vst [vmem:[#allocation156_spill] sm:$0xff] %v10060_v16  ;;  %4315 = vmatpush.msrb.mxu2 %v9922_v29  ;;  %4382 = vmatpush.msrb.mxu3 %v4381_v36  ;;  %v10069_v52 = vpop.f32.mrf.mxu3  ;;  %v12599_v36 = vand.u32 4294901760, %v10018_v5 }
 0x23d   :  { %12597 = vst [vmem:[#allocation157_spill] sm:$0xff] %v10067_v13  ;;  %3909 = vmatpush.msra.mxu0 %v9854_v22  ;;  %4270 = vmatpush.msrb.mxu1 %v9606_v35  ;;  %v3920_v35 = vand.u32 4294901760, %v3919_v51 }
 0x23e   :  { %12598 = vst [vmem:[#allocation158_spill] sm:$0xff] %v10069_v52  ;;  %4317 = vmatpush.msrb.mxu2 %v9941_v49  ;;  %4388 = vmatpush.msrb.mxu3 %v4387_v54  ;;  %v4404_v16 = vsub.f32 %v10018_v5, %v12599_v36  ;;  %v12601_v54 = vand.u32 4294901760, %v9587_v15  ;;  %v12602_v36 = vand.u32 4294901760, %v10034_v2  ;;  %v10099_v5 = vsub.f32 %v349_v10, %v10067_v13 }
 0x23f   :  { %12600 = vst [vmem:[#allocation159_spill] sm:$0xff] %v10080_v47  ;;  %6220 = vmatmul.msk.f32.gmra.mxu1 %vm63_vm1, %v12234_v41  ;;  %3915 = vmatmul.f32.vlgmr.msra.gmra.mxu0 %v3914_v40  ;;  %v6105_v40 = vsel %vm76_vm2, 1.0, %v12235_v56  ;;  %v10106_v15 = vand.u32 4294901760, %v347_v24  ;;  %v3921_v23 = vsub.f32 %v3919_v51, %v3920_v35 }
 0x240   :  { %4185 = vmatpush.msrb.mxu0 %v12601_v54  ;;  %4272 = vmatpush.msrb.mxu1 %v9628_v30  ;;  %v4410_v52 = vsub.f32 %v10034_v2, %v12602_v36  ;;  %12603 = vst [vmem:[#allocation160_spill] sm:$0xff] %v10099_v5  ;;  %v346_v30 = vld [vmem:[%s12054_s1 + $0x4a0] sm:$0xff]  ;;  %v4405_v10 = vand.u32 4294901760, %v4404_v16  ;;  %v10117_v36 = vpop.f32.mrf.mxu1  ;;  %v12607_v2 = vand.u32 4294901760, %v10055_v61  ;;  %v12608_v16 = vand.u32 4294901760, %v9624_v55  ;;  %v344_v55 = vld [vmem:[%s12054_s1 + $0x490] sm:$0xff] }
 0x241   :  { %4319 = vmatpush.msrb.mxu2 %v9967_v31  ;;  %4394 = vmatpush.msrb.mxu3 %v4393_v50  ;;  %v10115_v50 = vsub.f32 %v348_v58, %v10082_v39  ;;  %12606 = vst [vmem:[#allocation162_spill] sm:$0xff] %v10117_v36  ;;  %v10132_v54 = vand.u32 4294901760, %v346_v30  ;;  %v10155_v36 = vand.u32 4294901760, %v345_v26 }
 0x242   :  { %4111 = vmatmul.f32.gmra.mxu2 %v3919_v51  ;;  %4189 = vmatpush.msrb.mxu0 %v12604_v59  ;;  %v4416_v63 = vsub.f32 %v10055_v61, %v12607_v2  ;;  %v4411_v58 = vand.u32 4294901760, %v4410_v52  ;;  %v10129_v59 = vsub.f32 %v6105_v40, %v6105_v40  ;;  %v10138_v2 = vsub.f32 %v347_v24, %v10106_v15  ;;  %v12612_v40 = vld [vmem:[#allocation16_spill] sm:$0xff] }
 0x243   :  { %12605 = vst [vmem:[#allocation161_spill] sm:$0xff] %v10115_v50  ;;  %4274 = vmatpush.msrb.mxu1 %v9653_v20  ;;  %4321 = vmatpush.msrb.mxu2 %v9986_v53  ;;  %v10144_v52 = vadd.s32 1152, %v12574_v34  ;;  %v12616_v34 = vand.u32 4294901760, %v9638_v37  ;;  %v10172_v37 = vand.u32 4294901760, %v344_v55 }
 0x244   :  { %4400 = vmatpush.msrb.mxu3 %v4399_v4  ;;  %4193 = vmatpush.msrb.mxu0 %v12608_v16  ;;  %v10134_v51 = vpop.f32.mrf.mxu0  ;;  %12610 = vst [vmem:[#allocation164_spill] sm:$0xff] %v10138_v2  ;;  %v10146_v4 = vpop.f32.mrf.mxu2  ;;  %v12613_v16 = vld [vmem:[#allocation6_spill] sm:$0xff] }
 0x245   :  { %12609 = vst [vmem:[#allocation163_spill] sm:$0xff] %v10134_v51  ;;  %4166 = vmatmul.f32.gmra.mxu3 %v3920_v35  ;;  %4276 = vmatpush.msrb.mxu1 %v9674_v60  ;;  %v578_v20 = vadd.f32 %v12613_v16, %v12612_v40  ;;  %v12614_v60 = vand.u32 4294901760, %v10080_v47  ;;  %v4417_v40 = vand.u32 4294901760, %v4416_v63  ;;  %v12617_v16 = vand.u32 4294901760, %v10099_v5  ;;  %v12619_v63 = vld [vmem:[#allocation11_spill] sm:$0xff] }
 0x246   :  { %12611 = vst [vmem:[#allocation165_spill] sm:$0xff] %v10146_v4  ;;  %4323 = vmatpush.msrb.mxu2 %v9999_v19  ;;  %4406 = vmatpush.msrb.mxu3 %v4405_v10  ;;  %v10157_v51 = vpop.f32.mrf.mxu3  ;;  %v3922_v4 = vand.u32 4294901760, %v3921_v23  ;;  %v3928_v10 = vand.u32 4294901760, %v10129_v59  ;;  %v10170_v35 = vsub.f32 %v346_v30, %v10132_v54  ;;  %vm51_vm4 = vcmp.eq.s32.totalorder %v10144_v52, %v6868_v0  ;;  %v12620_v30 = vld [vmem:[#allocation17_spill] sm:$0xff] }
 0x247   :  { %v4422_v24 = vsub.f32 %v10080_v47, %v12614_v60  ;;  %12615 = vst [vmem:[#allocation16_spill] sm:$0xff] %v10157_v51  ;;  %4197 = vmatpush.msrb.mxu0 %v12616_v34  ;;  %4278 = vmatpush.msrb.mxu1 %v9691_v38  ;;  %v4428_v60 = vsub.f32 %v10099_v5, %v12617_v16  ;;  %v343_v38 = vld [vmem:[%s12054_s1 + $0x488] sm:$0xff]  ;;  %v12618_v34 = vld [vmem:[#allocation13_spill] sm:$0xff]  ;;  %v12621_v51 = vand.u32 4294901760, %v9658_v12  ;;  %v6118_v12 = vsel %vm89_vm3, 1.0, %v12235_v56 }
 0x248   :  { %4325 = vmatpush.msrb.mxu2 %v10022_v17  ;;  %4412 = vmatpush.msrb.mxu3 %v4411_v58  ;;  %v570_v23 = vadd.f32 %v12619_v63, %v12618_v34  ;;  %v646_v16 = vadd.f32 %v12620_v30, %v578_v20  ;;  %v12622_v34 = vand.u32 4294901760, %v10115_v50  ;;  %v10194_v47 = vsub.f32 %v345_v26, %v10155_v36 }
 0x249   :  { %6221 = vmatmul.msk.f32.gmra.mxu1 %vm76_vm2, %v12234_v41  ;;  %3923 = vmatmul.f32.gmra.mxu0 %v3922_v4  ;;  %v4423_v5 = vand.u32 4294901760, %v4422_v24  ;;  %v342_v4 = vld [vmem:[%s12054_s1 + $0x480] sm:$0xff]  ;;  %v12623_v20 = vand.u32 4294901760, %v9689_v21  ;;  %v4429_v26 = vand.u32 4294901760, %v4428_v60  ;;  %v10212_v30 = vsub.f32 %v344_v55, %v10172_v37  ;;  %v12627_v55 = vld [vmem:[#allocation18_spill] sm:$0xff]  ;;  %v12628_v24 = vld [vmem:[#allocation20_spill] sm:$0xff] }
 0x24a   :  { %4201 = vmatpush.msrb.mxu0 %v12621_v51  ;;  %4280 = vmatpush.msrb.mxu1 %v9715_v18  ;;  %v4434_v63 = vsub.f32 %v10115_v50, %v12622_v34  ;;  %v10204_v18 = vand.u32 4294901760, %v343_v38  ;;  %v3929_v51 = vsub.f32 %v10129_v59, %v3928_v10  ;;  %v12625_v34 = vld [vmem:[#allocation14_spill] sm:$0xff]  ;;  %v12626_v50 = vand.u32 4294901760, %v10138_v2 }
 0x24b   :  { %4327 = vmatpush.msrb.mxu2 %v10049_v25  ;;  %4418 = vmatpush.msrb.mxu3 %v4417_v40  ;;  %v10214_v40 = vpop.f32.mrf.mxu1  ;;  %v636_v58 = vadd.f32 %v12625_v34, %v570_v23  ;;  %v10222_v60 = vand.u32 4294901760, %v342_v4  ;;  %vm64_vm5 = vcmp.eq.s32.totalorder %v10144_v52, %v6896_v48  ;;  %vm77_vm6 = vcmp.eq.s32.totalorder %v10144_v52, %v6885_v57 }
 0x24c   :  { %4116 = vmatmul.f32.gmra.mxu2 %v10129_v59  ;;  %4205 = vmatpush.msrb.mxu0 %v12623_v20  ;;  %12624 = vst [vmem:[#allocation6_spill] sm:$0xff] %v10214_v40  ;;  %v4440_v21 = vsub.f32 %v10138_v2, %v12626_v50  ;;  %v6080_v59 = vsel %vm51_vm4, 1.0, %v12235_v56  ;;  %v702_v20 = vadd.f32 %v12627_v55, %v646_v16  ;;  %v12629_v40 = vld [vmem:[#allocation15_spill] sm:$0xff]  ;;  %v4435_v34 = vand.u32 4294901760, %v4434_v63  ;;  %v12633_v55 = vld [vmem:[#allocation32_spill] sm:$0xff] }
 0x24d   :  { %4282 = vmatpush.msrb.mxu1 %v9740_v44  ;;  %4329 = vmatpush.msrb.mxu2 %v10067_v13  ;;  %v582_v23 = vadd.f32 %v12629_v40, %v12628_v24  ;;  %v12630_v44 = vand.u32 4294901760, %v9710_v45  ;;  %v3935_v2 = vsub.f32 %v6118_v12, %v6118_v12  ;;  %v10238_v61 = vsub.f32 %v343_v38, %v10204_v18  ;;  %v10240_v16 = vpop.f32.mrf.mxu2  ;;  %v12640_v13 = vld [vmem:[#allocation21_spill] sm:$0xff] }
 0x24e   :  { %4424 = vmatpush.msrb.mxu3 %v4423_v5  ;;  %v10234_v50 = vpop.f32.mrf.mxu0  ;;  %12632 = vst [vmem:[#allocation11_spill] sm:$0xff] %v10240_v16  ;;  %v785_v24 = vadd.f32 %v12633_v55, %v702_v20  ;;  %v3930_v5 = vand.u32 4294901760, %v3929_v51  ;;  %v12634_v45 = vand.u32 4294901760, %v10170_v35  ;;  %v12637_v38 = vand.u32 4294901760, %v9723_v11  ;;  %v12638_v51 = vld [vmem:[#allocation8_spill] sm:$0xff]  ;;  %v12761_v16 = vld [vmem:[#allocation81_spill] sm:$0xff] }
 0x24f   :  { %4209 = vmatpush.msrb.mxu0 %v12630_v44  ;;  %12631 = vst [vmem:[#allocation13_spill] sm:$0xff] %v10234_v50  ;;  %4172 = vmatmul.f32.gmra.mxu3 %v3928_v10  ;;  %v4441_v20 = vand.u32 4294901760, %v4440_v21  ;;  %v10254_v44 = vsub.f32 %v6080_v59, %v6080_v59  ;;  %v12639_v55 = vld [vmem:[#allocation12_spill] sm:$0xff]  ;;  %v651_v10 = vadd.f32 %v12640_v13, %v582_v23  ;;  %v12176_v21 = vand.u32 4294901760, %v10238_v61  ;;  %v12643_v59 = vld [vmem:[#allocation27_spill] sm:$0xff] }
 0x250   :  { %4284 = vmatpush.msrb.mxu1 %v9760_v14  ;;  %4331 = vmatpush.msrb.mxu2 %v10082_v39  ;;  %v4446_v63 = vsub.f32 %v10170_v35, %v12634_v45  ;;  %v10248_v40 = vpop.f32.mrf.mxu3  ;;  %v12636_v14 = vld [vmem:[#allocation7_spill] sm:$0xff]  ;;  %v574_v45 = vadd.f32 %v12639_v55, %v12638_v51  ;;  %v834_v13 = vadd.f32 %v12643_v59, %v785_v24  ;;  %v12644_v23 = vand.u32 4294901760, %v9745_v32  ;;  %v12646_v51 = vld [vmem:[#allocation9_spill] sm:$0xff]  ;;  %v12647_v55 = vld [vmem:[#allocation22_spill] sm:$0xff] }
 0x251   :  { %4430 = vmatpush.msrb.mxu3 %v4429_v26  ;;  %12635 = vst [vmem:[#allocation17_spill] sm:$0xff] %v10248_v40  ;;  %v690_v12 = vadd.f32 %v12636_v14, %v636_v58  ;;  %4213 = vmatpush.msrb.mxu0 %v12637_v38  ;;  %v10257_v26 = vsub.f32 %v342_v4, %v10222_v60  ;;  %v12641_v58 = vand.u32 4294901760, %v10194_v47  ;;  %v12642_v14 = vld [vmem:[#allocation24_spill] sm:$0xff]  ;;  %v3936_v4 = vand.u32 4294901760, %v3935_v2  ;;  %v12649_v59 = vld [vmem:[#allocation19_spill] sm:$0xff] }
 0x252   :  { %4286 = vmatpush.msrb.mxu1 %v9775_v62  ;;  %4333 = vmatpush.msrb.mxu2 %v10106_v15  ;;  %v12645_v38 = vand.u32 4294901760, %v10212_v30  ;;  %v641_v24 = vadd.f32 %v12646_v51, %v574_v45  ;;  %v708_v32 = vadd.f32 %v12647_v55, %v651_v10  ;;  %v4464_v10 = vsub.f32 %v10238_v61, %v12176_v21  ;;  %v12650_v45 = vld [vmem:[#allocation33_spill] sm:$0xff] }
 0x253   :  { %4436 = vmatpush.msrb.mxu3 %v4435_v34  ;;  %v4452_v11 = vsub.f32 %v10194_v47, %v12641_v58  ;;  %v777_v62 = vadd.f32 %v12642_v14, %v690_v12  ;;  %6222 = vmatmul.msk.f32.gmra.mxu1 %vm89_vm3, %v12234_v41  ;;  %v4447_v34 = vand.u32 4294901760, %v4446_v63  ;;  %v12179_v58 = vand.u32 4294901760, %v10254_v44  ;;  %v10288_v14 = vpop.f32.mrf.mxu1 }
 0x254   :  { %3931 = vmatmul.f32.gmra.mxu0 %v3930_v5  ;;  %4288 = vmatpush.msrb.mxu1 %v9793_v9  ;;  %v4458_v12 = vsub.f32 %v10212_v30, %v12645_v38  ;;  %v12175_v5 = vand.u32 4294901760, %v10257_v26  ;;  %v12648_v9 = vand.u32 4294901760, %v9773_v27  ;;  %v895_v38 = vadd.f32 %v12650_v45, %v834_v13  ;;  %v12651_v27 = vld [vmem:[#allocation37_spill] sm:$0xff] }
 0x255   :  { %4217 = vmatpush.msrb.mxu0 %v12644_v23  ;;  %4335 = vmatpush.msrb.mxu2 %v10132_v54  ;;  %v4453_v63 = vand.u32 4294901760, %v4452_v11  ;;  %v3937_v23 = vsub.f32 %v3935_v2, %v3936_v4  ;;  %v789_v51 = vadd.f32 %v12651_v27, %v708_v32  ;;  %v12652_v11 = vand.u32 4294901760, %v9790_v7 }
 0x256   :  { %4442 = vmatpush.msrb.mxu3 %v4441_v20  ;;  %4121 = vmatmul.f32.gmra.mxu2 %v3935_v2  ;;  %v826_v20 = vadd.f32 %v12649_v59, %v777_v62  ;;  %v4459_v55 = vand.u32 4294901760, %v4458_v12  ;;  %v4470_v2 = vsub.f32 %v10257_v26, %v12175_v5  ;;  %v4347_v12 = vsub.f32 %v10254_v44, %v12179_v58  ;;  %v12660_v5 = vld [vmem:[#allocation31_spill] sm:$0xff]  ;;  %v12727_v58 = vld [vmem:[#allocation73_spill] sm:$0xff] }
 0x257   :  { %4221 = vmatpush.msrb.mxu0 %v12648_v9  ;;  %4290 = vmatpush.msrb.mxu1 %v9819_v43  ;;  %v6093_v43 = vsel %vm64_vm5, 1.0, %v12235_v56  ;;  %v10310_v13 = vpop.f32.mrf.mxu2  ;;  %v3938_v59 = vand.u32 4294901760, %v3937_v23  ;;  %v4465_v45 = vand.u32 4294901760, %v4464_v10  ;;  %v838_v21 = vadd.f32 %v12660_v5, %v789_v51  ;;  %v12664_v51 = vld [vmem:[#allocation23_spill] sm:$0xff] }
 0x258   :  { %4337 = vmatpush.msrb.mxu2 %v10155_v36  ;;  %4448 = vmatpush.msrb.mxu3 %v4447_v34  ;;  %v10304_v62 = vpop.f32.mrf.mxu0  ;;  %12653 = vst [vmem:[#allocation14_spill] sm:$0xff] %v10310_v13  ;;  %v12654_v34 = vld [vmem:[#allocation10_spill] sm:$0xff]  ;;  %v10323_v27 = vsub.f32 %v6093_v43, %v6093_v43  ;;  %v12662_v23 = vand.u32 4294901760, %v9824_v6  ;;  %v4348_v10 = vand.u32 4294901760, %v4347_v12  ;;  %vm90_vm7 = vcmp.eq.s32.totalorder %v10144_v52, %v6917_v28  ;;  %v12841_v13 = vld [vmem:[#allocation99_spill] sm:$0xff] }
 0x259   :  { %4225 = vmatpush.msrb.mxu0 %v12652_v11  ;;  %4178 = vmatmul.f32.gmra.mxu3 %v3936_v4  ;;  %v696_v7 = vadd.f32 %v12654_v34, %v641_v24  ;;  %v12656_v4 = vld [vmem:[#allocation25_spill] sm:$0xff]  ;;  %v12658_v24 = vld [vmem:[#allocation28_spill] sm:$0xff]  ;;  %v12665_v43 = vld [vmem:[#allocation38_spill] sm:$0xff]  ;;  %v12751_v40 = vand.u32 4294901760, %v10212_v30 }
 0x25a   :  { %4292 = vmatpush.msrb.mxu1 %v9839_v46  ;;  %4339 = vmatpush.msrb.mxu2 %v10172_v37  ;;  %v10317_v32 = vpop.f32.mrf.mxu3  ;;  %v879_v9 = vadd.f32 %v12656_v4, %v826_v20  ;;  %v12657_v46 = vand.u32 4294901760, %v9802_v3  ;;  %v12661_v3 = vld [vmem:[#allocation55_spill] sm:$0xff]  ;;  %v12666_v4 = vand.u32 4294901760, %v9852_v1  ;;  %v12668_v12 = vld [vmem:[#allocation42_spill] sm:$0xff] }
 0x25b   :  { %4454 = vmatpush.msrb.mxu3 %v4453_v63  ;;  %12655 = vst [vmem:[#allocation18_spill] sm:$0xff] %v10317_v32  ;;  %v781_v11 = vadd.f32 %v12658_v24, %v696_v7  ;;  %v12659_v63 = vld [vmem:[#allocation34_spill] sm:$0xff]  ;;  %v903_v7 = vadd.f32 %v12665_v43, %v838_v21  ;;  %v10346_v6 = vpop.f32.mrf.mxu1  ;;  %v12670_v21 = vand.u32 4294901760, %v9937_v42 }
 0x25c   :  { %4229 = vmatpush.msrb.mxu0 %v12657_v46  ;;  %4294 = vmatpush.msrb.mxu1 %v9854_v22  ;;  %v1012_v34 = vadd.f32 %v12659_v63, %v895_v38  ;;  %v4471_v22 = vand.u32 4294901760, %v4470_v2  ;;  %v12663_v38 = vld [vmem:[#allocation26_spill] sm:$0xff]  ;;  %v12178_v2 = vand.u32 4294901760, %v10323_v27  ;;  %12667 = vst [vmem:[#allocation20_spill] sm:$0xff] %v10346_v6  ;;  %v12669_v46 = vld [vmem:[#allocation47_spill] sm:$0xff]  ;;  %v12804_v6 = vld [vmem:[#allocation92_spill] sm:$0xff] }
 0x25d   :  { %4341 = vmatpush.msrb.mxu2 %v10204_v18  ;;  %4460 = vmatpush.msrb.mxu3 %v4459_v55  ;;  %v1004_v5 = vadd.f32 %v12663_v38, %v879_v9  ;;  %v830_v55 = vadd.f32 %v12664_v51, %v781_v11  ;;  %v12671_v1 = vld [vmem:[#allocation138_spill] sm:$0xff]  ;;  %v6106_v11 = vsel %vm77_vm6, 1.0, %v12235_v56  ;;  %v12680_v51 = vld [vmem:[#allocation36_spill] sm:$0xff] }
 0x25e   :  { %6227 = vmatmul.msk.f32.vlgmr.msrb.gmra.mxu1 %vm50_vm0, %v12234_v41  ;;  %3939 = vmatmul.f32.gmra.mxu0 %v3938_v59  ;;  %v1080_v20 = vadd.f32 %v12661_v3, %v1012_v34  ;;  %v12675_v34 = vld [vmem:[#allocation29_spill] sm:$0xff]  ;;  %v12676_v3 = vld [vmem:[#allocation40_spill] sm:$0xff]  ;;  %v4355_v38 = vsub.f32 %v10323_v27, %v12178_v2  ;;  %v12721_v2 = vld [vmem:[#allocation50_spill] sm:$0xff] }
 0x25f   :  { %4233 = vmatpush.msrb.mxu0 %v12662_v23  ;;  %4343 = vmatpush.msrb.mxu2 %v10222_v60  ;;  %v1070_v9 = vadd.f32 %v12668_v12, %v1004_v5  ;;  %v12677_v23 = vld [vmem:[#allocation144_spill] sm:$0xff] }
 0x260   :  { %4466 = vmatpush.msrb.mxu3 %v4465_v45  ;;  %4560 = vmatpush.msra.mxu1 %v9912_v8  ;;  %v1136_v59 = vadd.f32 %v12669_v46, %v1080_v20  ;;  %v12672_v45 = vand.u32 4294901760, %v12671_v1  ;;  %v1016_v20 = vadd.f32 %v12676_v3, %v903_v7  ;;  %v12684_v46 = vld [vmem:[#allocation59_spill] sm:$0xff]  ;;  %v12689_v3 = vld [vmem:[#allocation150_spill] sm:$0xff] }
 0x261   :  { %4237 = vmatpush.msrb.mxu0 %v12666_v4  ;;  %4349 = vmatmul.f32.vlgmr.msrb.gmra.mxu2 %v4348_v10  ;;  %v10366_v63 = vpop.f32.mrf.mxu2  ;;  %v12678_v10 = vand.u32 4294901760, %v12677_v23  ;;  %v1124_v43 = vadd.f32 %v12680_v51, %v1070_v9  ;;  %v12681_v4 = vld [vmem:[#allocation139_spill] sm:$0xff]  ;;  %v12687_v9 = vld [vmem:[#allocation30_spill] sm:$0xff] }
 0x262   :  { %4472 = vmatpush.msrb.mxu3 %v4471_v22  ;;  %4562 = vmatpush.msra.mxu1 %v9922_v29  ;;  %v10355_v24 = vpop.f32.mrf.mxu0  ;;  %12674 = vst [vmem:[#allocation32_spill] sm:$0xff] %v10366_v63  ;;  %v887_v22 = vadd.f32 %v12675_v34, %v830_v55  ;;  %v12682_v12 = vand.u32 4294901760, %v12681_v4  ;;  %v12683_v55 = vld [vmem:[#allocation56_spill] sm:$0xff]  ;;  %v12685_v1 = vld [vmem:[#allocation147_spill] sm:$0xff]  ;;  %v4356_v34 = vand.u32 4294901760, %v4355_v38  ;;  %v12692_v4 = vld [vmem:[#allocation57_spill] sm:$0xff] }
 0x263   :  { %4619 = vmatpush.msra.mxu2 %v12670_v21  ;;  %4241 = vmatpush.msrb.mxu0 %v12672_v45  ;;  %12673 = vst [vmem:[#allocation15_spill] sm:$0xff] %v10355_v24  ;;  %v1219_v7 = vadd.f32 %v12683_v55, %v1136_v59  ;;  %v1085_v21 = vadd.f32 %v12684_v46, %v1016_v20  ;;  %v12686_v45 = vand.u32 4294901760, %v12685_v1  ;;  %v12690_v20 = vand.u32 4294901760, %v12689_v3  ;;  %v10411_v38 = vpop.f32.mrf.mxu1  ;;  %v12697_v46 = vld [vmem:[#allocation70_spill] sm:$0xff]  ;;  %v12793_v63 = vld [vmem:[#allocation101_spill] sm:$0xff] }
 0x264   :  { %6231 = vmatmul.msk.f32.vlgmr.msrb.gmra.mxu3 %vm51_vm4, %v12234_v41  ;;  %4564 = vmatpush.msra.mxu1 %v9941_v49  ;;  %v10376_v5 = vpop.f32.mrf.mxu3  ;;  %v1008_v59 = vadd.f32 %v12687_v9, %v887_v22  ;;  %v12693_v22 = vld [vmem:[#allocation53_spill] sm:$0xff]  ;;  %12694 = vst [vmem:[#allocation8_spill] sm:$0xff] %v10411_v38 }
 0x265   :  { %4623 = vmatpush.msra.mxu2 %v12678_v10  ;;  %4698 = vmatpush.msra.mxu3 %v9912_v8  ;;  %12679 = vst [vmem:[#allocation7_spill] sm:$0xff] %v10376_v5  ;;  %v10387_v8 = vsub.f32 %v6106_v11, %v6106_v11  ;;  %v12691_v10 = vld [vmem:[#allocation48_spill] sm:$0xff]  ;;  %v1142_v55 = vadd.f32 %v12693_v22, %v1085_v21 }
 0x266   :  { %4245 = vmatpush.msrb.mxu0 %v12682_v12  ;;  %4566 = vmatpush.msra.mxu1 %v9967_v31  ;;  %v1075_v51 = vadd.f32 %v12691_v10, %v1008_v59  ;;  %v1268_v12 = vadd.f32 %v12692_v4, %v1219_v7  ;;  %v12699_v21 = vld [vmem:[#allocation44_spill] sm:$0xff] }
 0x267   :  { %4627 = vmatpush.msra.mxu2 %v12686_v45  ;;  %4700 = vmatpush.msra.mxu3 %v9922_v29  ;;  %v12688_v29 = vld [vmem:[#allocation43_spill] sm:$0xff] }
 0x268   :  { %6228 = vmatmul.msk.f32.gmra.mxu1 %vm63_vm1, %v12234_v41  ;;  %6223 = vmatmul.msk.f32.vlgmr.msrb.gmra.mxu0 %vm50_vm0, %v12234_v41  ;;  %v1211_v11 = vadd.f32 %v12688_v29, %v1124_v43  ;;  %v12695_v43 = vld [vmem:[#allocation151_spill] sm:$0xff]  ;;  %v1329_v45 = vadd.f32 %v12697_v46, %v1268_v12  ;;  %v12706_v12 = vld [vmem:[#allocation62_spill] sm:$0xff] }
 0x269   :  { %4492 = vmatpush.msra.mxu0 %v9937_v42  ;;  %4568 = vmatpush.msra.mxu1 %v9986_v53  ;;  %v12177_v42 = vand.u32 4294901760, %v10387_v8  ;;  %v12708_v46 = vld [vmem:[#allocation155_spill] sm:$0xff] }
 0x26a   :  { %4631 = vmatpush.msra.mxu2 %v12690_v20  ;;  %4702 = vmatpush.msra.mxu3 %v9941_v49  ;;  %v12696_v49 = vand.u32 4294901760, %v12695_v43  ;;  %v1260_v9 = vadd.f32 %v12699_v21, %v1211_v11  ;;  %v12703_v20 = vld [vmem:[#allocation152_spill] sm:$0xff]  ;;  %v12709_v21 = vand.u32 4294901760, %v12708_v46 }
 0x26b   :  { %4357 = vmatmul.f32.gmra.mxu2 %v4356_v34  ;;  %4495 = vmatpush.msra.mxu0 %v12677_v23  ;;  %v6119_v23 = vsel %vm90_vm7, 1.0, %v12235_v56  ;;  %v10431_v59 = vpop.f32.mrf.mxu2  ;;  %v12702_v34 = vld [vmem:[#allocation60_spill] sm:$0xff]  ;;  %v12704_v10 = vand.u32 4294901760, %v12703_v20  ;;  %v4363_v11 = vsub.f32 %v10387_v8, %v12177_v42 }
 0x26c   :  { %4570 = vmatpush.msra.mxu1 %v9999_v19  ;;  %4635 = vmatpush.msra.mxu2 %v12696_v49  ;;  %v10423_v7 = vpop.f32.mrf.mxu0  ;;  %12700 = vst [vmem:[#allocation21_spill] sm:$0xff] %v10431_v59  ;;  %v1223_v29 = vadd.f32 %v12702_v34, %v1142_v55  ;;  %v1313_v22 = vadd.f32 %v12706_v12, %v1260_v9  ;;  %v12707_v55 = vld [vmem:[#allocation69_spill] sm:$0xff]  ;;  %v372_v34 = vld [vmem:[%s12054_s1 + $0x570] sm:$0xff] }
 0x26d   :  { %4704 = vmatpush.msra.mxu3 %v9967_v31  ;;  %4498 = vmatpush.msra.mxu0 %v12685_v1  ;;  %12698 = vst [vmem:[#allocation12_spill] sm:$0xff] %v10423_v7  ;;  %v12701_v31 = vld [vmem:[#allocation41_spill] sm:$0xff]  ;;  %v1446_v49 = vadd.f32 %v12707_v55, %v1329_v45  ;;  %v12714_v55 = vld [vmem:[#allocation159_spill] sm:$0xff] }
 0x26e   :  { %6232 = vmatmul.msk.f32.gmra.mxu3 %vm64_vm5, %v12234_v41  ;;  %4572 = vmatpush.msra.mxu1 %v10022_v17  ;;  %v1130_v1 = vadd.f32 %v12701_v31, %v1075_v51  ;;  %v10441_v4 = vpop.f32.mrf.mxu3  ;;  %v10446_v51 = vsub.f32 %v6119_v23, %v6119_v23  ;;  %v12711_v23 = vld [vmem:[#allocation61_spill] sm:$0xff]  ;;  %v4364_v31 = vand.u32 4294901760, %v4363_v11  ;;  %v10480_v11 = vpop.f32.mrf.mxu1 }
 0x26f   :  { %4639 = vmatpush.msra.mxu2 %v12704_v10  ;;  %4706 = vmatpush.msra.mxu3 %v9986_v53  ;;  %12705 = vst [vmem:[#allocation24_spill] sm:$0xff] %v10441_v4  ;;  %v373_v53 = vld [vmem:[%s12054_s1 + $0x578] sm:$0xff]  ;;  %v1272_v9 = vadd.f32 %v12711_v23, %v1223_v29  ;;  %v12713_v10 = vld [vmem:[#allocation58_spill] sm:$0xff]  ;;  %v12716_v29 = vld [vmem:[#allocation71_spill] sm:$0xff] }
 0x270   :  { %4501 = vmatpush.msra.mxu0 %v12689_v3  ;;  %4574 = vmatpush.msra.mxu1 %v10049_v25  ;;  %v12710_v3 = vld [vmem:[#allocation49_spill] sm:$0xff]  ;;  %v1438_v12 = vadd.f32 %v12713_v10, %v1313_v22  ;;  %v12717_v23 = vld [vmem:[#allocation35_spill] sm:$0xff]  ;;  %12718 = vst [vmem:[#allocation27_spill] sm:$0xff] %v10480_v11  ;;  %v371_v22 = vld [vmem:[%s12054_s1 + $0x568] sm:$0xff] }
 0x271   :  { %4643 = vmatpush.msra.mxu2 %v12709_v21  ;;  %4708 = vmatpush.msra.mxu3 %v9999_v19  ;;  %v1215_v45 = vadd.f32 %v12710_v3, %v1130_v1  ;;  %v12712_v19 = vld [vmem:[#allocation157_spill] sm:$0xff]  ;;  %v12715_v21 = vand.u32 4294901760, %v12714_v55  ;;  %v12180_v1 = vand.u32 4294901760, %v10446_v51  ;;  %v10475_v3 = vand.u32 4294901760, %v373_v53 }
 0x272   :  { %6229 = vmatmul.msk.f32.gmra.mxu1 %vm76_vm2, %v12234_v41  ;;  %6224 = vmatmul.msk.f32.gmra.mxu0 %vm63_vm1, %v12234_v41  ;;  %v1337_v42 = vadd.f32 %v12717_v23, %v1272_v9  ;;  %v12725_v23 = vld [vmem:[#allocation66_spill] sm:$0xff]  ;;  %v12728_v4 = vld [vmem:[#allocation161_spill] sm:$0xff] }
 0x273   :  { %4504 = vmatpush.msra.mxu0 %v12695_v43  ;;  %4576 = vmatpush.msra.mxu1 %v12712_v19  ;;  %v1514_v43 = vadd.f32 %v12716_v29, %v1446_v49  ;;  %v1264_v49 = vadd.f32 %v12721_v2, %v1215_v45  ;;  %v10508_v2 = vsub.f32 %v373_v53, %v10475_v3  ;;  %v12792_v7 = vld [vmem:[#allocation93_spill] sm:$0xff] }
 0x274   :  { %4647 = vmatpush.msra.mxu2 %v12715_v21  ;;  %4710 = vmatpush.msra.mxu3 %v10022_v17  ;;  %v12719_v17 = vld [vmem:[#allocation160_spill] sm:$0xff]  ;;  %v10488_v21 = vand.u32 4294901760, %v372_v34  ;;  %v1450_v11 = vadd.f32 %v12727_v58, %v1337_v42  ;;  %v12731_v42 = vld [vmem:[#allocation79_spill] sm:$0xff] }
 0x275   :  { %4365 = vmatmul.f32.gmra.mxu2 %v4364_v31  ;;  %4507 = vmatpush.msra.mxu0 %v12703_v20  ;;  %v12720_v10 = vand.u32 4294901760, %v12719_v17  ;;  %v370_v20 = vld [vmem:[%s12054_s1 + $0x560] sm:$0xff]  ;;  %v12723_v31 = vld [vmem:[#allocation63_spill] sm:$0xff]  ;;  %v10512_v45 = vpop.f32.mrf.mxu2  ;;  %v369_v58 = vld [vmem:[%s12054_s1 + $0x558] sm:$0xff] }
 0x276   :  { %4578 = vmatpush.msra.mxu1 %v10082_v39  ;;  %4712 = vmatpush.msra.mxu3 %v10049_v25  ;;  %v10496_v9 = vpop.f32.mrf.mxu0  ;;  %v1504_v29 = vadd.f32 %v12723_v31, %v1438_v12  ;;  %v4371_v25 = vsub.f32 %v10446_v51, %v12180_v1  ;;  %12724 = vst [vmem:[#allocation22_spill] sm:$0xff] %v10512_v45  ;;  %v10527_v1 = vand.u32 4294901760, %v370_v20 }
 0x277   :  { %4651 = vmatpush.msra.mxu2 %v12720_v10  ;;  %4510 = vmatpush.msra.mxu0 %v12708_v46  ;;  %12722 = vst [vmem:[#allocation9_spill] sm:$0xff] %v10496_v9  ;;  %v10510_v46 = vand.u32 4294901760, %v371_v22  ;;  %v1321_v12 = vadd.f32 %v12725_v23, %v1264_v49  ;;  %v12726_v10 = vld [vmem:[#allocation72_spill] sm:$0xff]  ;;  %v12729_v9 = vand.u32 4294901760, %v12728_v4  ;;  %v10525_v53 = vsub.f32 %v372_v34, %v10488_v21 }
 0x278   :  { %6233 = vmatmul.msk.f32.gmra.mxu3 %vm77_vm6, %v12234_v41  ;;  %4580 = vmatpush.msra.mxu1 %v10106_v15  ;;  %v1570_v31 = vadd.f32 %v12726_v10, %v1514_v43  ;;  %v10520_v59 = vpop.f32.mrf.mxu3  ;;  %v12732_v49 = vld [vmem:[#allocation164_spill] sm:$0xff] }
 0x279   :  { %4655 = vmatpush.msra.mxu2 %v12729_v9  ;;  %4714 = vmatpush.msra.mxu3 %v12712_v19  ;;  %12730 = vst [vmem:[#allocation19_spill] sm:$0xff] %v10520_v59  ;;  %v12733_v9 = vand.u32 4294901760, %v12732_v49  ;;  %v12734_v19 = vld [vmem:[#allocation65_spill] sm:$0xff]  ;;  %v10547_v23 = vsub.f32 %v371_v22, %v10510_v46  ;;  %v12735_v10 = vld [vmem:[#allocation64_spill] sm:$0xff]  ;;  %v12737_v59 = vld [vmem:[#allocation46_spill] sm:$0xff]  ;;  %v12738_v22 = vand.u32 4294901760, %v10170_v35 }
 0x27a   :  { %4513 = vmatpush.msra.mxu0 %v12714_v55  ;;  %4582 = vmatpush.msra.mxu1 %v10132_v54  ;;  %v1653_v43 = vadd.f32 %v12731_v42, %v1570_v31  ;;  %v1558_v55 = vadd.f32 %v12734_v19, %v1504_v29  ;;  %v1442_v31 = vadd.f32 %v12735_v10, %v1321_v12  ;;  %v4372_v29 = vand.u32 4294901760, %v4371_v25  ;;  %v368_v19 = vld [vmem:[%s12054_s1 + $0x550] sm:$0xff]  ;;  %v12739_v12 = vld [vmem:[#allocation78_spill] sm:$0xff]  ;;  %v10568_v10 = vpop.f32.mrf.mxu1 }
 0x27b   :  { %4659 = vmatpush.msra.mxu2 %v12733_v9  ;;  %4716 = vmatpush.msra.mxu3 %v10082_v39  ;;  %v12736_v39 = vld [vmem:[#allocation74_spill] sm:$0xff]  ;;  %v10553_v9 = vand.u32 4294901760, %v369_v58  ;;  %12740 = vst [vmem:[#allocation33_spill] sm:$0xff] %v10568_v10 }
 0x27c   :  { %6230 = vmatmul.msk.f32.gmra.mxu1 %vm89_vm3, %v12234_v41  ;;  %6225 = vmatmul.msk.f32.gmra.mxu0 %vm76_vm2, %v12234_v41  ;;  %v1519_v42 = vadd.f32 %v12736_v39, %v1450_v11  ;;  %v1645_v34 = vadd.f32 %v12737_v59, %v1558_v55  ;;  %v1702_v25 = vadd.f32 %v12739_v12, %v1653_v43  ;;  %v367_v59 = vld [vmem:[%s12054_s1 + $0x548] sm:$0xff]  ;;  %v12742_v55 = vand.u32 4294901760, %v10508_v2  ;;  %v12746_v43 = vld [vmem:[#allocation39_spill] sm:$0xff] }
 0x27d   :  { %4516 = vmatpush.msra.mxu0 %v12719_v17  ;;  %4584 = vmatpush.msra.mxu1 %v10155_v36  ;;  %v10564_v17 = vsub.f32 %v370_v20, %v10527_v1  ;;  %v10580_v39 = vand.u32 4294901760, %v368_v19  ;;  %v10587_v11 = vsub.f32 %v369_v58, %v10553_v9 }
 0x27e   :  { %4663 = vmatpush.msra.mxu2 %v12738_v22  ;;  %4718 = vmatpush.msra.mxu3 %v10106_v15  ;;  %v12741_v15 = vand.u32 4294901760, %v10194_v47  ;;  %v4814_v20 = vsub.f32 %v10508_v2, %v12742_v55  ;;  %v12744_v22 = vld [vmem:[#allocation45_spill] sm:$0xff]  ;;  %v1694_v45 = vadd.f32 %v12746_v43, %v1645_v34  ;;  %v12750_v34 = vld [vmem:[#allocation83_spill] sm:$0xff] }
 0x27f   :  { %4373 = vmatmul.f32.gmra.mxu2 %v4372_v29  ;;  %4519 = vmatpush.msra.mxu0 %v12728_v4  ;;  %v12743_v4 = vld [vmem:[#allocation67_spill] sm:$0xff]  ;;  %v1576_v12 = vadd.f32 %v12744_v22, %v1519_v42  ;;  %v10606_v42 = vpop.f32.mrf.mxu2 }
 0x280   :  { %4586 = vmatpush.msra.mxu1 %v10172_v37  ;;  %4667 = vmatpush.msra.mxu2 %v12741_v15  ;;  %v1509_v29 = vadd.f32 %v12743_v4, %v1442_v31  ;;  %v366_v15 = vld [vmem:[%s12054_s1 + $0x540] sm:$0xff]  ;;  %v10592_v55 = vpop.f32.mrf.mxu0  ;;  %v10604_v31 = vand.u32 4294901760, %v367_v59  ;;  %12748 = vst [vmem:[#allocation10_spill] sm:$0xff] %v10606_v42  ;;  %v12749_v4 = vld [vmem:[#allocation80_spill] sm:$0xff] }
 0x281   :  { %4720 = vmatpush.msra.mxu3 %v10132_v54  ;;  %4522 = vmatpush.msra.mxu0 %v12732_v49  ;;  %12745 = vst [vmem:[#allocation37_spill] sm:$0xff] %v10592_v55  ;;  %v12747_v54 = vand.u32 4294901760, %v10525_v53  ;;  %v1763_v22 = vadd.f32 %v12749_v4, %v1702_v25  ;;  %v1657_v43 = vadd.f32 %v12750_v34, %v1576_v12  ;;  %v12753_v49 = vand.u32 4294901760, %v10547_v23  ;;  %v12756_v34 = vld [vmem:[#allocation51_spill] sm:$0xff]  ;;  %v12803_v55 = vld [vmem:[#allocation89_spill] sm:$0xff] }
 0x282   :  { %6234 = vmatmul.msk.f32.gmra.mxu3 %vm90_vm7, %v12234_v41  ;;  %4588 = vmatpush.msra.mxu1 %v10204_v18  ;;  %v10613_v38 = vpop.f32.mrf.mxu3  ;;  %v10621_v25 = vsub.f32 %v368_v19, %v10580_v39  ;;  %v10623_v12 = vand.u32 4294901760, %v366_v15  ;;  %v12757_v19 = vand.u32 4294901760, %v10254_v44 }
 0x283   :  { %v4820_v58 = vsub.f32 %v10525_v53, %v12747_v54  ;;  %4671 = vmatpush.msra.mxu2 %v12751_v40  ;;  %4722 = vmatpush.msra.mxu3 %v10155_v36  ;;  %12752 = vst [vmem:[#allocation25_spill] sm:$0xff] %v10613_v38  ;;  %v4815_v54 = vand.u32 4294901760, %v4814_v20  ;;  %v4826_v42 = vsub.f32 %v10547_v23, %v12753_v49  ;;  %v365_v36 = vld [vmem:[%s12054_s1 + $0x538] sm:$0xff] }
 0x284   :  { %4525 = vmatpush.msra.mxu0 %v10170_v35  ;;  %4590 = vmatpush.msra.mxu1 %v10222_v60  ;;  %v12754_v40 = vld [vmem:[#allocation68_spill] sm:$0xff]  ;;  %v12755_v35 = vand.u32 4294901760, %v10238_v61  ;;  %v1747_v49 = vadd.f32 %v12756_v34, %v1694_v45  ;;  %v1880_v45 = vadd.f32 %v12761_v16, %v1763_v22  ;;  %v12762_v34 = vld [vmem:[#allocation82_spill] sm:$0xff]  ;;  %v10652_v33 = vand.u32 4294901760, %v365_v36 }
 0x285   :  { %v1564_v4 = vadd.f32 %v12754_v40, %v1509_v29  ;;  %4724 = vmatpush.msra.mxu3 %v10172_v37  ;;  %4594 = vmatmul.f32.vlgmr.msra.gmra.mxu1 %v12757_v19  ;;  %v4821_v38 = vand.u32 4294901760, %v4820_v58  ;;  %v12758_v29 = vand.u32 4294901760, %v10564_v17  ;;  %v12760_v37 = vld [vmem:[#allocation75_spill] sm:$0xff]  ;;  %v1706_v5 = vadd.f32 %v12762_v34, %v1657_v43  ;;  %v12765_v22 = vld [vmem:[#allocation98_spill] sm:$0xff] }
 0x286   :  { %4675 = vmatpush.msra.mxu2 %v12755_v35  ;;  %6226 = vmatmul.msk.f32.gmra.mxu0 %vm89_vm3, %v12234_v41  ;;  %v10644_v35 = vsub.f32 %v367_v59, %v10604_v31  ;;  %v12763_v19 = vand.u32 4294901760, %v10257_v26  ;;  %v364_v58 = vld [vmem:[%s12054_s1 + $0x530] sm:$0xff]  ;;  %v4827_v59 = vand.u32 4294901760, %v4826_v42  ;;  %v10660_v16 = vsub.f32 %v366_v15, %v10623_v12  ;;  %v363_v15 = vld [vmem:[%s12054_s1 + $0x528] sm:$0xff]  ;;  %v12768_v42 = vld [vmem:[#allocation52_spill] sm:$0xff] }
 0x287   :  { %v4832_v40 = vsub.f32 %v10564_v17, %v12758_v29  ;;  %v1649_v20 = vadd.f32 %v12760_v37, %v1564_v4  ;;  %4528 = vmatpush.msra.mxu0 %v10194_v47  ;;  %4726 = vmatpush.msra.mxu3 %v10204_v18  ;;  %v1948_v47 = vadd.f32 %v12765_v22, %v1880_v45  ;;  %v12766_v43 = vand.u32 4294901760, %v10587_v11  ;;  %v12769_v34 = vld [vmem:[#allocation54_spill] sm:$0xff]  ;;  %v12770_v22 = vld [vmem:[#allocation84_spill] sm:$0xff] }
 0x288   :  { %12759 = vst [vmem:[#allocation28_spill] sm:$0xff] %v10644_v35  ;;  %4679 = vmatpush.msra.mxu2 %v12763_v19  ;;  %4816 = vmatpush.msrb.mxu1 %v4815_v54  ;;  %v10671_v54 = vpop.f32.mrf.mxu1  ;;  %v1872_v29 = vadd.f32 %v12768_v42, %v1747_v49  ;;  %v12181_v37 = vand.u32 4294901760, %v10644_v35  ;;  %v10679_v45 = vand.u32 4294901760, %v364_v58  ;;  %v10686_v4 = vsub.f32 %v365_v36, %v10652_v33  ;;  %v12773_v49 = vld [vmem:[#allocation87_spill] sm:$0xff] }
 0x289   :  { %12764 = vst [vmem:[#allocation34_spill] sm:$0xff] %v10660_v16  ;;  %4531 = vmatpush.msra.mxu0 %v10212_v30  ;;  %6235 = vmatmul.msk.f32.vlgmr.msra.gmra.mxu2 %vm51_vm4, %v12234_v41  ;;  %v4838_v18 = vsub.f32 %v10587_v11, %v12766_v43  ;;  %v4833_v30 = vand.u32 4294901760, %v4832_v40  ;;  %v1698_v19 = vadd.f32 %v12769_v34, %v1649_v20  ;;  %v10702_v20 = vand.u32 4294901760, %v363_v15  ;;  %v10704_v42 = vpop.f32.mrf.mxu2  ;;  %v12776_v34 = vld [vmem:[#allocation97_spill] sm:$0xff] }
 0x28a   :  { %12767 = vst [vmem:[#allocation31_spill] sm:$0xff] %v10671_v54  ;;  %4728 = vmatpush.msra.mxu3 %v10222_v60  ;;  %4822 = vmatpush.msrb.mxu1 %v4821_v38  ;;  %v1771_v43 = vadd.f32 %v12770_v22, %v1706_v5  ;;  %v362_v60 = vld [vmem:[%s12054_s1 + $0x520] sm:$0xff]  ;;  %v10691_v38 = vpop.f32.mrf.mxu0  ;;  %v1938_v40 = vadd.f32 %v12773_v49, %v1872_v29  ;;  %v12774_v5 = vand.u32 4294901760, %v10621_v25 }
 0x28b   :  { %4926 = vmatpush.msrb.mxu2 %v10508_v2  ;;  %4534 = vmatpush.msra.mxu0 %v10238_v61  ;;  %12771 = vst [vmem:[#allocation55_spill] sm:$0xff] %v10686_v4  ;;  %v2004_v22 = vadd.f32 %v12776_v34, %v1948_v47  ;;  %v4839_v29 = vand.u32 4294901760, %v4838_v18  ;;  %v10718_v36 = vand.u32 4294901760, %v362_v60  ;;  %v361_v47 = vld [vmem:[%s12054_s1 + $0x518] sm:$0xff] }
 0x28c   :  { %12772 = vst [vmem:[#allocation26_spill] sm:$0xff] %v10691_v38  ;;  %6239 = vmatmul.msk.f32.vlgmr.msra.gmra.mxu3 %vm51_vm4, %v12234_v41  ;;  %4828 = vmatpush.msrb.mxu1 %v4827_v59  ;;  %v4844_v61 = vsub.f32 %v10621_v25, %v12774_v5  ;;  %v10709_v49 = vpop.f32.mrf.mxu3  ;;  %v4850_v59 = vsub.f32 %v10644_v35, %v12181_v37  ;;  %v12779_v34 = vld [vmem:[#allocation76_spill] sm:$0xff]  ;;  %v12783_v38 = vand.u32 4294901760, %v10660_v16  ;;  %vm6048_vm4 = vcmask 261120  }
 0x28d   :  { %12775 = vst [vmem:[#allocation23_spill] sm:$0xff] %v10704_v42  ;;  %4929 = vmatpush.msrb.mxu2 %v10525_v53  ;;  %4994 = vmatpush.msrb.mxu3 %v10475_v3  ;;  %v10716_v5 = vsub.f32 %v364_v58, %v10679_v45  ;;  %v1755_v18 = vadd.f32 %v12779_v34, %v1698_v19  ;;  %v12780_v42 = vld [vmem:[#allocation85_spill] sm:$0xff]  ;;  %v12782_v58 = vand.u32 4294901760, %v10323_v27 }
 0x28e   :  { %12777 = vst [vmem:[#allocation38_spill] sm:$0xff] %v10709_v49  ;;  %4537 = vmatpush.msra.mxu0 %v10257_v26  ;;  %4834 = vmatpush.msrb.mxu1 %v4833_v30  ;;  %v1884_v49 = vadd.f32 %v12780_v42, %v1771_v43  ;;  %v12781_v30 = vld [vmem:[#allocation86_spill] sm:$0xff]  ;;  %v4845_v54 = vand.u32 4294901760, %v4844_v61  ;;  %v4856_v19 = vsub.f32 %v10660_v16, %v12783_v38  ;;  %v12785_v42 = vld [vmem:[#allocation100_spill] sm:$0xff]  ;;  %v10740_v26 = vand.u32 4294901760, %v361_v47 }
 0x28f   :  { %12778 = vst [vmem:[#allocation42_spill] sm:$0xff] %v10716_v5  ;;  %4932 = vmatpush.msrb.mxu2 %v10547_v23  ;;  %4996 = vmatpush.msrb.mxu3 %v10488_v21  ;;  %v1992_v37 = vadd.f32 %v12781_v30, %v1938_v40  ;;  %v10736_v43 = vsub.f32 %v363_v15, %v10702_v20  ;;  %v360_v40 = vld [vmem:[%s12054_s1 + $0x510] sm:$0xff]  ;;  %v4851_v38 = vand.u32 4294901760, %v4850_v59  ;;  %v12788_v30 = vld [vmem:[#allocation77_spill] sm:$0xff]  ;;  %v12791_v59 = vld [vmem:[#allocation88_spill] sm:$0xff] }
 0x290   :  { %4600 = vmatmul.f32.gmra.mxu1 %v12782_v58  ;;  %4540 = vmatmul.f32.vlgmr.msra.gmra.mxu0 %v10254_v44  ;;  %v2087_v34 = vadd.f32 %v12785_v42, %v2004_v22  ;;  %v12786_v44 = vld [vmem:[#allocation105_spill] sm:$0xff]  ;;  %v10750_v22 = vsub.f32 %v362_v60, %v10718_v36  ;;  %v10761_v42 = vpop.f32.mrf.mxu1  ;;  %v359_v60 = vld [vmem:[%s12054_s1 + $0x508] sm:$0xff]  ;;  %v10769_v15 = vand.u32 4294901760, %v360_v40 }
 0x291   :  { %12784 = vst [vmem:[#allocation47_spill] sm:$0xff] %v10736_v43  ;;  %4747 = vmatpush.msrb.mxu0 %v10475_v3  ;;  %4840 = vmatpush.msrb.mxu1 %v4839_v29  ;;  %v1953_v61 = vadd.f32 %v12786_v44, %v1884_v49  ;;  %v1876_v29 = vadd.f32 %v12788_v30, %v1755_v18  ;;  %v12789_v49 = vand.u32 4294901760, %v10686_v4  ;;  %v4857_v18 = vand.u32 4294901760, %v4856_v19  ;;  %v12796_v19 = vld [vmem:[#allocation104_spill] sm:$0xff]  ;;  %v12800_v30 = vld [vmem:[#allocation118_spill] sm:$0xff] }
 0x292   :  { %4935 = vmatpush.msrb.mxu2 %v10564_v17  ;;  %4998 = vmatpush.msrb.mxu3 %v10510_v46  ;;  %12787 = vst [vmem:[#allocation138_spill] sm:$0xff] %v10750_v22  ;;  %v2079_v44 = vadd.f32 %v12791_v59, %v1992_v37 }
 0x293   :  { %6236 = vmatmul.msk.f32.gmra.mxu2 %vm64_vm5, %v12234_v41  ;;  %4749 = vmatpush.msrb.mxu0 %v10488_v21  ;;  %v4862_v58 = vsub.f32 %v10686_v4, %v12789_v49  ;;  %12790 = vst [vmem:[#allocation29_spill] sm:$0xff] %v10761_v42  ;;  %v1943_v10 = vadd.f32 %v12792_v7, %v1876_v29  ;;  %v10794_v29 = vpop.f32.mrf.mxu2 }
 0x294   :  { %4846 = vmatpush.msrb.mxu1 %v4845_v54  ;;  %4938 = vmatpush.msrb.mxu2 %v10587_v11  ;;  %v2136_v49 = vadd.f32 %v12793_v63, %v2087_v34  ;;  %v10776_v42 = vsub.f32 %v361_v47, %v10740_v26  ;;  %v358_v54 = vld [vmem:[%s12054_s1 + $0x500] sm:$0xff]  ;;  %v10781_v37 = vpop.f32.mrf.mxu0  ;;  %v2010_v59 = vadd.f32 %v12796_v19, %v1953_v61  ;;  %v12797_v63 = vand.u32 4294901760, %v10716_v5 }
 0x295   :  { %5000 = vmatpush.msrb.mxu3 %v10527_v1  ;;  %4751 = vmatpush.msrb.mxu0 %v10510_v46  ;;  %12795 = vst [vmem:[#allocation144_spill] sm:$0xff] %v10781_v37  ;;  %v10792_v34 = vand.u32 4294901760, %v359_v60  ;;  %v4863_v61 = vand.u32 4294901760, %v4862_v58  ;;  %v10806_v47 = vsub.f32 %v360_v40, %v10769_v15  ;;  %v2128_v50 = vadd.f32 %v12803_v55, %v2079_v44 }
 0x296   :  { %12794 = vst [vmem:[#allocation40_spill] sm:$0xff] %v10776_v42  ;;  %6240 = vmatmul.msk.f32.gmra.mxu3 %vm64_vm5, %v12234_v41  ;;  %4852 = vmatpush.msrb.mxu1 %v4851_v38  ;;  %v4868_v7 = vsub.f32 %v10716_v5, %v12797_v63  ;;  %v10798_v19 = vpop.f32.mrf.mxu3  ;;  %v2197_v37 = vadd.f32 %v12800_v30, %v2136_v49  ;;  %v12801_v38 = vand.u32 4294901760, %v10736_v43  ;;  %v12810_v30 = vld [vmem:[#allocation117_spill] sm:$0xff] }
 0x297   :  { %12798 = vst [vmem:[#allocation36_spill] sm:$0xff] %v10794_v29  ;;  %4941 = vmatpush.msrb.mxu2 %v10621_v25  ;;  %5002 = vmatpush.msrb.mxu3 %v10553_v9  ;;  %v10808_v29 = vand.u32 4294901760, %v358_v54  ;;  %v1998_v58 = vadd.f32 %v12804_v6, %v1943_v10  ;;  %v10823_v6 = vsub.f32 %v359_v60, %v10792_v34  ;;  %v12809_v10 = vld [vmem:[#allocation110_spill] sm:$0xff] }
 0x298   :  { %12799 = vst [vmem:[#allocation139_spill] sm:$0xff] %v10798_v19  ;;  %4753 = vmatpush.msrb.mxu0 %v10527_v1  ;;  %4858 = vmatpush.msrb.mxu1 %v4857_v18  ;;  %v4874_v63 = vsub.f32 %v10736_v43, %v12801_v38  ;;  %v12805_v18 = vld [vmem:[#allocation106_spill] sm:$0xff]  ;;  %v12806_v19 = vand.u32 4294901760, %v10387_v8  ;;  %v4869_v40 = vand.u32 4294901760, %v4868_v7  ;;  %v12807_v38 = vand.u32 4294901760, %v10750_v22  ;;  %v12817_v7 = vld [vmem:[#allocation109_spill] sm:$0xff] }
 0x299   :  { %12802 = vst [vmem:[#allocation56_spill] sm:$0xff] %v10806_v47  ;;  %4944 = vmatpush.msrb.mxu2 %v10644_v35  ;;  %5004 = vmatpush.msrb.mxu3 %v10580_v39  ;;  %v2091_v49 = vadd.f32 %v12805_v18, %v2010_v59  ;;  %v2181_v44 = vadd.f32 %v12809_v10, %v2128_v50  ;;  %v12812_v18 = vld [vmem:[#allocation94_spill] sm:$0xff]  ;;  %v12813_v50 = vand.u32 4294901760, %v10776_v42 }
 0x29a   :  { %4606 = vmatmul.f32.gmra.mxu1 %v12806_v19  ;;  %4545 = vmatmul.f32.gmra.mxu0 %v10323_v27  ;;  %v4880_v55 = vsub.f32 %v10750_v22, %v12807_v38  ;;  %12808 = vst [vmem:[#allocation59_spill] sm:$0xff] %v10823_v6  ;;  %v2314_v59 = vadd.f32 %v12810_v30, %v2197_v37  ;;  %v4875_v27 = vand.u32 4294901760, %v4874_v63  ;;  %v12815_v63 = vld [vmem:[#allocation107_spill] sm:$0xff]  ;;  %v12816_v38 = vld [vmem:[#allocation5_spill] sm:$0xff] }
 0x29b   :  { %4755 = vmatpush.msrb.mxu0 %v10553_v9  ;;  %4864 = vmatpush.msrb.mxu1 %v4863_v61  ;;  %v10832_v19 = vsub.f32 %v358_v54, %v10808_v29  ;;  %v2083_v60 = vadd.f32 %v12812_v18, %v1998_v58  ;;  %v4886_v37 = vsub.f32 %v10776_v42, %v12813_v50  ;;  %v10843_v61 = vpop.f32.mrf.mxu1  ;;  %v10849_v10 = vadd.s32 1280, %v12816_v38  ;;  %v389_v18 = vld [vmem:[%s12054_s1 + $0x5f8] sm:$0xff] }
 0x29c   :  { %4947 = vmatpush.msrb.mxu2 %v10660_v16  ;;  %5006 = vmatpush.msrb.mxu3 %v10604_v31  ;;  %12814 = vst [vmem:[#allocation30_spill] sm:$0xff] %v10843_v61  ;;  %v2140_v30 = vadd.f32 %v12815_v63, %v2091_v49  ;;  %v4881_v54 = vand.u32 4294901760, %v4880_v55  ;;  %v2306_v32 = vadd.f32 %v12817_v7, %v2181_v44  ;;  %v12820_v55 = vld [vmem:[#allocation90_spill] sm:$0xff]  ;;  %v12821_v58 = vand.u32 4294901760, %v10806_v47  ;;  %v388_v61 = vld [vmem:[%s12054_s1 + $0x5f0] sm:$0xff] }
 0x29d   :  { %12811 = vst [vmem:[#allocation147_spill] sm:$0xff] %v10832_v19  ;;  %6237 = vmatmul.msk.f32.gmra.mxu2 %vm77_vm6, %v12234_v41  ;;  %4757 = vmatpush.msrb.mxu0 %v10580_v39  ;;  %vm52_vm8 = vcmp.eq.s32.totalorder %v10849_v10, %v6868_v0  ;;  %v12832_v16 = vand.u32 4294901760, %v10446_v51  ;;  %vm65_vm9 = vcmp.eq.s32.totalorder %v10849_v10, %v6896_v48 }
 0x29e   :  { %4870 = vmatpush.msrb.mxu1 %v4869_v40  ;;  %4950 = vmatpush.msrb.mxu2 %v10686_v4  ;;  %v10857_v49 = vpop.f32.mrf.mxu0  ;;  %v12819_v40 = vld [vmem:[#allocation119_spill] sm:$0xff]  ;;  %v2205_v63 = vadd.f32 %v12820_v55, %v2140_v30  ;;  %v4892_v44 = vsub.f32 %v10806_v47, %v12821_v58  ;;  %v12826_v58 = vand.u32 4294901760, %v10823_v6  ;;  %vm78_vm10 = vcmp.eq.s32.totalorder %v10849_v10, %v6885_v57 }
 0x29f   :  { %5008 = vmatpush.msrb.mxu3 %v10623_v12  ;;  %4759 = vmatpush.msrb.mxu0 %v10604_v31  ;;  %12818 = vst [vmem:[#allocation43_spill] sm:$0xff] %v10857_v49  ;;  %v2382_v50 = vadd.f32 %v12819_v40, %v2314_v59  ;;  %v10872_v49 = vpop.f32.mrf.mxu2  ;;  %v12823_v59 = vld [vmem:[#allocation95_spill] sm:$0xff]  ;;  %v4887_v40 = vand.u32 4294901760, %v4886_v37  ;;  %v10891_v37 = vand.u32 4294901760, %v388_v61  ;;  %vm91_vm11 = vcmp.eq.s32.totalorder %v10849_v10, %v6917_v28 }
 0x2a0   :  { %6241 = vmatmul.msk.f32.gmra.mxu3 %vm77_vm6, %v12234_v41  ;;  %4876 = vmatpush.msrb.mxu1 %v4875_v27  ;;  %12822 = vst [vmem:[#allocation150_spill] sm:$0xff] %v10872_v49  ;;  %v2132_v30 = vadd.f32 %v12823_v59, %v2083_v60  ;;  %v10877_v27 = vand.u32 4294901760, %v389_v18  ;;  %v10879_v55 = vpop.f32.mrf.mxu3  ;;  %v4898_v7 = vsub.f32 %v10823_v6, %v12826_v58  ;;  %v12827_v60 = vld [vmem:[#allocation111_spill] sm:$0xff]  ;;  %v12828_v49 = vld [vmem:[#allocation114_spill] sm:$0xff]  ;;  %v12831_v58 = vld [vmem:[#allocation121_spill] sm:$0xff] }
 0x2a1   :  { %4953 = vmatpush.msrb.mxu2 %v10716_v5  ;;  %5010 = vmatpush.msrb.mxu3 %v10652_v33  ;;  %12825 = vst [vmem:[#allocation57_spill] sm:$0xff] %v10879_v55  ;;  %v2372_v59 = vadd.f32 %v12827_v60, %v2306_v32  ;;  %v12830_v55 = vld [vmem:[#allocation120_spill] sm:$0xff]  ;;  %v2318_v24 = vadd.f32 %v12831_v58, %v2205_v63  ;;  %v4893_v32 = vand.u32 4294901760, %v4892_v44  ;;  %v396_v10 = vld [vmem:[%s12054_s1 + $0x630] sm:$0xff] }
 0x2a2   :  { %12824 = vst [vmem:[#allocation48_spill] sm:$0xff] %v10877_v27  ;;  %4761 = vmatpush.msrb.mxu0 %v10623_v12  ;;  %4882 = vmatpush.msrb.mxu1 %v4881_v54  ;;  %v2189_v5 = vadd.f32 %v12828_v49, %v2132_v30  ;;  %v387_v54 = vld [vmem:[%s12054_s1 + $0x5e8] sm:$0xff]  ;;  %v2438_v4 = vadd.f32 %v12830_v55, %v2382_v50  ;;  %v12833_v49 = vand.u32 4294901760, %v10832_v19  ;;  %v6081_v50 = vsel %vm52_vm8, 1.0, %v12235_v56  ;;  %v12835_v55 = vld [vmem:[#allocation127_spill] sm:$0xff]  ;;  %v12836_v60 = vld [vmem:[#allocation112_spill] sm:$0xff] }
 0x2a3   :  { %4956 = vmatpush.msrb.mxu2 %v10736_v43  ;;  %5012 = vmatpush.msrb.mxu3 %v10679_v45  ;;  %12829 = vst [vmem:[#allocation53_spill] sm:$0xff] %v10891_v37  ;;  %v10910_v63 = vsub.f32 %v389_v18, %v10877_v27  ;;  %v10915_v44 = vand.u32 4294901760, %v387_v54  ;;  %v2426_v58 = vadd.f32 %v12836_v60, %v2372_v59  ;;  %v10929_v18 = vpop.f32.mrf.mxu1  ;;  %v385_v43 = vld [vmem:[%s12054_s1 + $0x5d8] sm:$0xff] }
 0x2a4   :  { %4612 = vmatmul.f32.gmra.mxu1 %v12832_v16  ;;  %4550 = vmatmul.f32.gmra.mxu0 %v10387_v8  ;;  %v4904_v30 = vsub.f32 %v10832_v19, %v12833_v49  ;;  %v2521_v16 = vadd.f32 %v12835_v55, %v2438_v4  ;;  %v4899_v8 = vand.u32 4294901760, %v4898_v7  ;;  %v10927_v4 = vsub.f32 %v388_v61, %v10891_v37  ;;  %v12839_v7 = vld [vmem:[#allocation113_spill] sm:$0xff]  ;;  %v12840_v55 = vld [vmem:[#allocation122_spill] sm:$0xff] }
 0x2a5   :  { %4763 = vmatpush.msrb.mxu0 %v10652_v33  ;;  %4888 = vmatpush.msrb.mxu1 %v4887_v40  ;;  %12834 = vst [vmem:[#allocation151_spill] sm:$0xff] %v10910_v63  ;;  %v386_v40 = vld [vmem:[%s12054_s1 + $0x5e0] sm:$0xff]  ;;  %v2310_v49 = vadd.f32 %v12839_v7, %v2189_v5  ;;  %v10934_v60 = vsub.f32 %v6081_v50, %v6081_v50  ;;  %v384_v50 = vld [vmem:[%s12054_s1 + $0x5d0] sm:$0xff]  ;;  %v10965_v7 = vand.u32 4294901760, %v385_v43 }
 0x2a6   :  { %4959 = vmatpush.msrb.mxu2 %v10750_v22  ;;  %5014 = vmatpush.msrb.mxu3 %v10702_v20  ;;  %12837 = vst [vmem:[#allocation70_spill] sm:$0xff] %v10927_v4  ;;  %v2387_v22 = vadd.f32 %v12840_v55, %v2318_v24  ;;  %v4905_v59 = vand.u32 4294901760, %v4904_v30  ;;  %v2513_v35 = vadd.f32 %v12841_v13, %v2426_v58  ;;  %v10945_v24 = vand.u32 4294901760, %v386_v40 }
 0x2a7   :  { %6238 = vmatmul.msk.f32.gmra.mxu2 %vm90_vm7, %v12234_v41  ;;  %4765 = vmatpush.msrb.mxu0 %v10679_v45  ;;  %12838 = vst [vmem:[#allocation44_spill] sm:$0xff] %v10929_v18  ;;  %v10955_v13 = vsub.f32 %v387_v54, %v10915_v44  ;;  %v10960_v58 = vpop.f32.mrf.mxu2  ;;  %v12848_v54 = vld [vmem:[#allocation96_spill] sm:$0xff]  ;;  %v4780_v5 = vand.u32 4294901760, %v10934_v60  ;;  %v12849_v18 = vld [vmem:[#allocation91_spill] sm:$0xff] }
 0x2a8   :  { %4894 = vmatpush.msrb.mxu1 %v4893_v32  ;;  %4962 = vmatpush.msrb.mxu2 %v10776_v42  ;;  %v10947_v61 = vpop.f32.mrf.mxu0  ;;  %v12843_v32 = vld [vmem:[#allocation126_spill] sm:$0xff]  ;;  %12845 = vst [vmem:[#allocation152_spill] sm:$0xff] %v10960_v58  ;;  %v6094_v58 = vsel %vm65_vm9, 1.0, %v12235_v56 }
 0x2a9   :  { %5016 = vmatpush.msrb.mxu3 %v10718_v36  ;;  %4767 = vmatpush.msrb.mxu0 %v10702_v20  ;;  %12842 = vst [vmem:[#allocation41_spill] sm:$0xff] %v10947_v61  ;;  %v2570_v30 = vadd.f32 %v12843_v32, %v2521_v16  ;;  %v2444_v32 = vadd.f32 %v12848_v54, %v2387_v22  ;;  %v383_v54 = vld [vmem:[%s12054_s1 + $0x5c8] sm:$0xff] }
 0x2aa   :  { %6242 = vmatmul.msk.f32.gmra.mxu3 %vm90_vm7, %v12234_v41  ;;  %4900 = vmatpush.msrb.mxu1 %v4899_v8  ;;  %12844 = vst [vmem:[#allocation60_spill] sm:$0xff] %v10955_v13  ;;  %v10967_v52 = vpop.f32.mrf.mxu3  ;;  %v12847_v8 = vld [vmem:[#allocation115_spill] sm:$0xff]  ;;  %v2562_v16 = vadd.f32 %v12849_v18, %v2513_v35  ;;  %v4781_v35 = vsub.f32 %v10934_v60, %v4780_v5 }
 0x2ab   :  { %4965 = vmatpush.msrb.mxu2 %v10806_v47  ;;  %5018 = vmatpush.msrb.mxu3 %v10740_v26  ;;  %12846 = vst [vmem:[#allocation62_spill] sm:$0xff] %v10967_v52  ;;  %v2377_v55 = vadd.f32 %v12847_v8, %v2310_v49  ;;  %v12850_v49 = vand.u32 4294901760, %v10910_v63  ;;  %v10984_v8 = vsub.f32 %v386_v40, %v10945_v24  ;;  %v12851_v52 = vld [vmem:[#allocation128_spill] sm:$0xff]  ;;  %v12852_v40 = vld [vmem:[#allocation131_spill] sm:$0xff]  ;;  %v12860_v47 = vld [vmem:[#allocation129_spill] sm:$0xff] }
 0x2ac   :  { %4769 = vmatpush.msrb.mxu0 %v10718_v36  ;;  %4906 = vmatpush.msrb.mxu1 %v4905_v59  ;;  %v10986_v59 = vand.u32 4294901760, %v384_v50  ;;  %v2631_v61 = vadd.f32 %v12851_v52, %v2570_v30  ;;  %v2525_v18 = vadd.f32 %v12852_v40, %v2444_v32  ;;  %v12853_v30 = vand.u32 4294901760, %v10927_v4 }
 0x2ad   :  { %4968 = vmatpush.msrb.mxu2 %v10823_v6  ;;  %5020 = vmatpush.msrb.mxu3 %v10769_v15  ;;  %v5248_v22 = vsub.f32 %v10910_v63, %v12850_v49  ;;  %v11007_v49 = vsub.f32 %v385_v43, %v10965_v7  ;;  %v12855_v6 = vld [vmem:[#allocation116_spill] sm:$0xff]  ;;  %v11013_v32 = vsub.f32 %v6094_v58, %v6094_v58  ;;  %v11015_v40 = vand.u32 4294901760, %v383_v54  ;;  %v11027_v58 = vpop.f32.mrf.mxu1 }
 0x2ae   :  { %6243 = vmatmul.msk.f32.vlgmr.msrb.gmra.mxu1 %vm52_vm8, %v12234_v41  ;;  %4555 = vmatmul.f32.gmra.mxu0 %v10446_v51  ;;  %v5254_v52 = vsub.f32 %v10927_v4, %v12853_v30  ;;  %v2432_v51 = vadd.f32 %v12855_v6, %v2377_v55  ;;  %v12856_v30 = vld [vmem:[#allocation102_spill] sm:$0xff]  ;;  %12858 = vst [vmem:[#allocation49_spill] sm:$0xff] %v11027_v58  ;;  %v12859_v55 = vld [vmem:[#allocation124_spill] sm:$0xff]  ;;  %v12869_v58 = vld [vmem:[#allocation103_spill] sm:$0xff] }
 0x2af   :  { %4771 = vmatpush.msrb.mxu0 %v10740_v26  ;;  %4971 = vmatpush.msrb.mxu2 %v10832_v19  ;;  %12854 = vst [vmem:[#allocation69_spill] sm:$0xff] %v11007_v49  ;;  %v382_v19 = vld [vmem:[%s12054_s1 + $0x5c0] sm:$0xff]  ;;  %v2615_v4 = vadd.f32 %v12856_v30, %v2562_v16  ;;  %v5249_v43 = vand.u32 4294901760, %v5248_v22  ;;  %v2748_v42 = vadd.f32 %v12860_v47, %v2631_v61  ;;  %v12861_v16 = vand.u32 4294901760, %v10955_v13  ;;  %v381_v22 = vld [vmem:[%s12054_s1 + $0x5b8] sm:$0xff] }
 0x2b0   :  { %5022 = vmatpush.msrb.mxu3 %v10792_v34  ;;  %5132 = vmatpush.msra.mxu1 %v10475_v3  ;;  %v11025_v3 = vsub.f32 %v384_v50, %v10986_v59  ;;  %v2517_v63 = vadd.f32 %v12859_v55, %v2432_v51  ;;  %v12862_v50 = vld [vmem:[#allocation130_spill] sm:$0xff]  ;;  %v5255_v51 = vand.u32 4294901760, %v5254_v52  ;;  %v11043_v61 = vand.u32 4294901760, %v382_v19  ;;  %v380_v52 = vld [vmem:[%s12054_s1 + $0x5b0] sm:$0xff] }
 0x2b1   :  { %4773 = vmatpush.msrb.mxu0 %v10769_v15  ;;  %4974 = vmatmul.f32.vlgmr.msrb.gmra.mxu2 %v10934_v60  ;;  %v5260_v60 = vsub.f32 %v10955_v13, %v12861_v16  ;;  %v2574_v30 = vadd.f32 %v12862_v50, %v2525_v18  ;;  %v12864_v55 = vld [vmem:[#allocation146_spill] sm:$0xff]  ;;  %v11050_v16 = vsub.f32 %v383_v54, %v11015_v40  ;;  %v6107_v18 = vsel %vm78_vm10, 1.0, %v12235_v56  ;;  %v11059_v50 = vpop.f32.mrf.mxu2  ;;  %v12870_v13 = vld [vmem:[#allocation123_spill] sm:$0xff] }
 0x2b2   :  { %12857 = vst [vmem:[#allocation155_spill] sm:$0xff] %v11025_v3  ;;  %5024 = vmatpush.msrb.mxu3 %v10808_v29  ;;  %5134 = vmatpush.msra.mxu1 %v10488_v21  ;;  %v11045_v21 = vpop.f32.mrf.mxu0  ;;  %v2816_v6 = vadd.f32 %v12864_v55, %v2748_v42  ;;  %v4782_v42 = vand.u32 4294901760, %v4781_v35  ;;  %v11066_v55 = vand.u32 4294901760, %v381_v22  ;;  %v4788_v35 = vand.u32 4294901760, %v11013_v32 }
 0x2b3   :  { %5181 = vmatpush.msra.mxu2 %v10877_v27  ;;  %4775 = vmatpush.msrb.mxu0 %v10792_v34  ;;  %12863 = vst [vmem:[#allocation61_spill] sm:$0xff] %v11045_v21  ;;  %v2740_v21 = vadd.f32 %v12869_v58, %v2615_v4  ;;  %v2566_v27 = vadd.f32 %v12870_v13, %v2517_v63  ;;  %v11083_v63 = vand.u32 4294901760, %v380_v52  ;;  %v12873_v13 = vld [vmem:[#allocation135_spill] sm:$0xff] }
 0x2b4   :  { %5028 = vmatmul.f32.vlgmr.msrb.gmra.mxu3 %v4780_v5  ;;  %5136 = vmatpush.msra.mxu1 %v10510_v46  ;;  %12865 = vst [vmem:[#allocation157_spill] sm:$0xff] %v11050_v16  ;;  %v12867_v46 = vand.u32 4294901760, %v10984_v8  ;;  %v11068_v47 = vpop.f32.mrf.mxu3  ;;  %v11081_v4 = vsub.f32 %v382_v19, %v11043_v61  ;;  %v12875_v19 = vand.u32 4294901760, %v10508_v2  ;;  %v4789_v2 = vsub.f32 %v11013_v32, %v4788_v35 }
 0x2b5   :  { %12866 = vst [vmem:[#allocation58_spill] sm:$0xff] %v11059_v50  ;;  %5183 = vmatpush.msra.mxu2 %v10891_v37  ;;  %5250 = vmatpush.msra.mxu3 %v5249_v43  ;;  %v5261_v43 = vand.u32 4294901760, %v5260_v60  ;;  %v12871_v50 = vld [vmem:[#allocation132_spill] sm:$0xff]  ;;  %v2806_v58 = vadd.f32 %v12873_v13, %v2740_v21  ;;  %v12874_v60 = vld [vmem:[#allocation145_spill] sm:$0xff]  ;;  %v12876_v21 = vand.u32 4294901760, %v11025_v3  ;;  %v11106_v13 = vsub.f32 %v381_v22, %v11066_v55 }
 0x2b6   :  { %v5266_v5 = vsub.f32 %v10984_v8, %v12867_v46  ;;  %12868 = vst [vmem:[#allocation159_spill] sm:$0xff] %v11068_v47  ;;  %4777 = vmatpush.msrb.mxu0 %v10808_v29  ;;  %5138 = vmatpush.msra.mxu1 %v10527_v1  ;;  %v2639_v37 = vadd.f32 %v12871_v50, %v2574_v30  ;;  %v12872_v46 = vand.u32 4294901760, %v11007_v49  ;;  %v379_v1 = vld [vmem:[%s12054_s1 + $0x5a8] sm:$0xff] }
 0x2b7   :  { %5185 = vmatpush.msra.mxu2 %v10915_v44  ;;  %5256 = vmatpush.msra.mxu3 %v5255_v51  ;;  %v2872_v30 = vadd.f32 %v12874_v60, %v2816_v6  ;;  %v5278_v6 = vsub.f32 %v11025_v3, %v12876_v21  ;;  %v11127_v51 = vpop.f32.mrf.mxu1  ;;  %v12881_v47 = vld [vmem:[#allocation134_spill] sm:$0xff] }
 0x2b8   :  { %v5272_v54 = vsub.f32 %v11007_v49, %v12872_v46  ;;  %6244 = vmatmul.msk.f32.gmra.mxu1 %vm65_vm9, %v12234_v41  ;;  %4783 = vmatmul.f32.vlgmr.msrb.gmra.mxu0 %v4782_v42  ;;  %v5267_v50 = vand.u32 4294901760, %v5266_v5  ;;  %v11103_v46 = vsub.f32 %v6107_v18, %v6107_v18  ;;  %v12877_v42 = vld [vmem:[#allocation125_spill] sm:$0xff]  ;;  %v11117_v5 = vadd.s32 1408, %v12816_v38  ;;  %12880 = vst [vmem:[#allocation71_spill] sm:$0xff] %v11127_v51  ;;  %v12882_v49 = vld [vmem:[#allocation148_spill] sm:$0xff] }
 0x2b9   :  { %5053 = vmatpush.msra.mxu0 %v12875_v19  ;;  %5140 = vmatpush.msra.mxu1 %v10553_v9  ;;  %v2623_v60 = vadd.f32 %v12877_v42, %v2566_v27  ;;  %v11111_v19 = vand.u32 4294901760, %v379_v1  ;;  %v378_v9 = vld [vmem:[%s12054_s1 + $0x5a0] sm:$0xff]  ;;  %v12879_v27 = vand.u32 4294901760, %v10525_v53  ;;  %v11125_v42 = vsub.f32 %v380_v52, %v11083_v63  ;;  %v12884_v52 = vld [vmem:[#allocation154_spill] sm:$0xff] }
 0x2ba   :  { %5187 = vmatpush.msra.mxu2 %v10945_v24  ;;  %5262 = vmatpush.msra.mxu3 %v5261_v43  ;;  %v12878_v18 = vld [vmem:[#allocation133_spill] sm:$0xff]  ;;  %v5273_v22 = vand.u32 4294901760, %v5272_v54  ;;  %v12209_v43 = vand.u32 4294901760, %v11081_v4  ;;  %v2860_v3 = vadd.f32 %v12881_v47, %v2806_v58  ;;  %v2955_v38 = vadd.f32 %v12882_v49, %v2872_v30  ;;  %v12890_v49 = vld [vmem:[#allocation136_spill] sm:$0xff] }
 0x2bb   :  { %v2752_v21 = vadd.f32 %v12878_v18, %v2639_v37  ;;  %4979 = vmatmul.f32.gmra.mxu2 %v11013_v32  ;;  %5057 = vmatpush.msra.mxu0 %v12879_v27  ;;  %v12883_v37 = vand.u32 4294901760, %v11050_v16  ;;  %v377_v32 = vld [vmem:[%s12054_s1 + $0x598] sm:$0xff]  ;;  %v12885_v18 = vand.u32 4294901760, %v10547_v23  ;;  %v5279_v47 = vand.u32 4294901760, %v5278_v6 }
 0x2bc   :  { %5142 = vmatpush.msra.mxu1 %v10580_v39  ;;  %5189 = vmatpush.msra.mxu2 %v10965_v7  ;;  %v11143_v39 = vand.u32 4294901760, %v378_v9  ;;  %v11145_v58 = vpop.f32.mrf.mxu0  ;;  %v4796_v30 = vand.u32 4294901760, %v11103_v46  ;;  %v11150_v27 = vsub.f32 %v379_v1, %v11111_v19  ;;  %v6120_v23 = vsel %vm91_vm11, 1.0, %v12235_v56 }
 0x2bd   :  { %v5284_v53 = vsub.f32 %v11050_v16, %v12883_v37  ;;  %v2821_v54 = vadd.f32 %v12884_v52, %v2752_v21  ;;  %5268 = vmatpush.msra.mxu3 %v5267_v50  ;;  %5061 = vmatpush.msra.mxu0 %v12885_v18  ;;  %12886 = vst [vmem:[#allocation35_spill] sm:$0xff] %v11145_v58  ;;  %v376_v50 = vld [vmem:[%s12054_s1 + $0x590] sm:$0xff]  ;;  %v11168_v21 = vand.u32 4294901760, %v377_v32  ;;  %v12889_v52 = vld [vmem:[#allocation108_spill] sm:$0xff]  ;;  %v12891_v58 = vld [vmem:[#allocation149_spill] sm:$0xff]  ;;  %v12892_v16 = vand.u32 4294901760, %v10564_v17 }
 0x2be   :  { %5034 = vmatmul.f32.gmra.mxu3 %v4788_v35  ;;  %5144 = vmatpush.msra.mxu1 %v10604_v31  ;;  %vm53_vm12 = vcmp.eq.s32.totalorder %v11117_v5, %v6868_v0  ;;  %v11161_v35 = vpop.f32.mrf.mxu2  ;;  %v4790_v31 = vand.u32 4294901760, %v4789_v2  ;;  %v5290_v1 = vsub.f32 %v11081_v4, %v12209_v43  ;;  %v11170_v37 = vpop.f32.mrf.mxu3  ;;  %v2744_v18 = vadd.f32 %v12889_v52, %v2623_v60  ;;  %v375_v17 = vld [vmem:[%s12054_s1 + $0x588] sm:$0xff] }
 0x2bf   :  { %12887 = vst [vmem:[#allocation160_spill] sm:$0xff] %v11161_v35  ;;  %5191 = vmatpush.msra.mxu2 %v10986_v59  ;;  %5274 = vmatpush.msra.mxu3 %v5273_v22  ;;  %v2947_v51 = vadd.f32 %v12890_v49, %v2860_v3  ;;  %v3004_v35 = vadd.f32 %v12891_v58, %v2955_v38  ;;  %v5285_v2 = vand.u32 4294901760, %v5284_v53  ;;  %v12893_v22 = vld [vmem:[#allocation153_spill] sm:$0xff]  ;;  %v12894_v6 = vand.u32 4294901760, %v11106_v13 }
 0x2c0   :  { %12888 = vst [vmem:[#allocation50_spill] sm:$0xff] %v11170_v37  ;;  %5065 = vmatpush.msra.mxu0 %v12892_v16  ;;  %5146 = vmatpush.msra.mxu1 %v10623_v12  ;;  %v2878_v43 = vadd.f32 %v12893_v22, %v2821_v54  ;;  %v11184_v60 = vsub.f32 %v378_v9, %v11143_v39  ;;  %v11186_v3 = vand.u32 4294901760, %v376_v50  ;;  %v12895_v12 = vld [vmem:[#allocation141_spill] sm:$0xff]  ;;  %v12210_v53 = vand.u32 4294901760, %v11150_v27  ;;  %v11229_v22 = vpop.f32.mrf.mxu1 }
 0x2c1   :  { %5193 = vmatpush.msra.mxu2 %v11015_v40  ;;  %5280 = vmatpush.msra.mxu3 %v5279_v47  ;;  %v5296_v37 = vsub.f32 %v11106_v13, %v12894_v6  ;;  %v2811_v38 = vadd.f32 %v12895_v12, %v2744_v18  ;;  %v3065_v16 = vadd.f32 %v10304_v62, %v3004_v35  ;;  %v12896_v9 = vand.u32 4294901760, %v10587_v11  ;;  %v374_v35 = vld [vmem:[%s12054_s1 + $0x580] sm:$0xff]  ;;  %v12902_v12 = vld [vmem:[#allocation140_spill] sm:$0xff] }
 0x2c2   :  { %6245 = vmatmul.msk.f32.gmra.mxu1 %vm78_vm10, %v12234_v41  ;;  %4791 = vmatmul.f32.gmra.mxu0 %v4790_v31  ;;  %v5291_v54 = vand.u32 4294901760, %v5290_v1  ;;  %v12897_v47 = vand.u32 4294901760, %v11125_v42  ;;  %v11204_v58 = vsub.f32 %v6120_v23, %v6120_v23  ;;  %v11207_v62 = vsub.f32 %v377_v32, %v11168_v21  ;;  %v12898_v31 = vld [vmem:[#allocation137_spill] sm:$0xff]  ;;  %v12899_v32 = vld [vmem:[#allocation156_spill] sm:$0xff]  ;;  %12901 = vst [vmem:[#allocation63_spill] sm:$0xff] %v11229_v22 }
 0x2c3   :  { %5069 = vmatpush.msra.mxu0 %v12896_v9  ;;  %5148 = vmatpush.msra.mxu1 %v10652_v33  ;;  %v2996_v6 = vadd.f32 %v12898_v31, %v2947_v51  ;;  %v4797_v11 = vsub.f32 %v11103_v46, %v4796_v30  ;;  %v11215_v33 = vand.u32 4294901760, %v375_v17  ;;  %v6082_v23 = vsel %vm53_vm12, 1.0, %v12235_v56 }
 0x2c4   :  { %v5302_v49 = vsub.f32 %v11125_v42, %v12897_v47  ;;  %5195 = vmatpush.msra.mxu2 %v11043_v61  ;;  %5286 = vmatpush.msra.mxu3 %v5285_v2  ;;  %v2959_v1 = vadd.f32 %v12899_v32, %v2878_v43  ;;  %v12900_v52 = vand.u32 4294901760, %v10621_v25  ;;  %v5297_v51 = vand.u32 4294901760, %v5296_v37  ;;  %v12903_v43 = vld [vmem:[#allocation163_spill] sm:$0xff] }
 0x2c5   :  { %4984 = vmatmul.f32.gmra.mxu2 %v11103_v46  ;;  %v12211_v18 = vand.u32 4294901760, %v11184_v60  ;;  %v11227_v2 = vsub.f32 %v376_v50, %v11186_v3  ;;  %v2866_v9 = vadd.f32 %v12902_v12, %v2811_v38  ;;  %v3182_v47 = vadd.f32 %v10288_v14, %v3065_v16  ;;  %5150 = vmatpush.msra.mxu1 %v10679_v45  ;;  %v12904_v50 = vld [vmem:[#allocation28_spill] sm:$0xff] }
 0x2c6   :  { %5073 = vmatpush.msra.mxu0 %v12900_v52  ;;  %5197 = vmatpush.msra.mxu2 %v11066_v55  ;;  %v5308_v25 = vsub.f32 %v11150_v27, %v12210_v53  ;;  %v11238_v46 = vand.u32 4294901760, %v374_v35  ;;  %v3049_v37 = vadd.f32 %v12903_v43, %v2996_v6  ;;  %v12905_v31 = vand.u32 4294901760, %v12904_v50  ;;  %v11244_v14 = vpop.f32.mrf.mxu0  ;;  %v11253_v6 = vpop.f32.mrf.mxu2  ;;  %v12911_v53 = vld [vmem:[#allocation34_spill] sm:$0xff] }
 0x2c7   :  { %5292 = vmatpush.msra.mxu3 %v5291_v54  ;;  %v5303_v32 = vand.u32 4294901760, %v5302_v49  ;;  %5152 = vmatpush.msra.mxu1 %v10702_v20  ;;  %v4804_v45 = vand.u32 4294901760, %v11204_v58  ;;  %v11249_v16 = vsub.f32 %v375_v17, %v11215_v33  ;;  %v11251_v52 = vsub.f32 %v6082_v23, %v6082_v23  ;;  %12906 = vst [vmem:[#allocation66_spill] sm:$0xff] %v11253_v6  ;;  %v12907_v54 = vld [vmem:[#allocation158_spill] sm:$0xff] }
 0x2c8   :  { %5077 = vmatpush.msra.mxu0 %v12905_v31  ;;  %5040 = vmatmul.f32.gmra.mxu3 %v4796_v30  ;;  %v3008_v12 = vadd.f32 %v12907_v54, %v2959_v1  ;;  %v4798_v49 = vand.u32 4294901760, %v4797_v11  ;;  %v5314_v30 = vsub.f32 %v11184_v60, %v12211_v18  ;;  %v12212_v20 = vand.u32 4294901760, %v11227_v2  ;;  %v11261_v43 = vpop.f32.mrf.mxu3  ;;  %v12909_v17 = vld [vmem:[#allocation142_spill] sm:$0xff]  ;;  %v12915_v18 = vld [vmem:[#allocation15_spill] sm:$0xff] }
 0x2c9   :  { %5199 = vmatpush.msra.mxu2 %v11083_v63  ;;  %5298 = vmatpush.msra.mxu3 %v5297_v51  ;;  %12908 = vst [vmem:[#allocation72_spill] sm:$0xff] %v11261_v43  ;;  %v2951_v50 = vadd.f32 %v12909_v17, %v2866_v9  ;;  %v12910_v23 = vld [vmem:[#allocation14_spill] sm:$0xff]  ;;  %v12912_v38 = vand.u32 4294901760, %v12911_v53  ;;  %v5309_v1 = vand.u32 4294901760, %v5308_v25  ;;  %v11269_v11 = vsub.f32 %v374_v35, %v11238_v46  ;;  %v12917_v53 = vld [vmem:[#allocation55_spill] sm:$0xff] }
 0x2ca   :  { %v3250_v31 = vadd.f32 %v12910_v23, %v3182_v47  ;;  %5154 = vmatpush.msra.mxu1 %v10718_v36  ;;  %v12914_v51 = vld [vmem:[#allocation162_spill] sm:$0xff]  ;;  %v3073_v6 = vadd.f32 %v12915_v18, %v3008_v12  ;;  %v12916_v9 = vand.u32 4294901760, %v11207_v62  ;;  %4799 = vmatmul.f32.gmra.mxu0 %v4798_v49  ;;  %v12215_v36 = vand.u32 4294901760, %v11249_v16  ;;  %v12922_v23 = vld [vmem:[#allocation20_spill] sm:$0xff] }
 0x2cb   :  { %5081 = vmatpush.msra.mxu0 %v12912_v38  ;;  %12913 = vst [vmem:[#allocation73_spill] sm:$0xff] %v11269_v11  ;;  %v3174_v54 = vadd.f32 %v12914_v51, %v3049_v37  ;;  %5201 = vmatpush.msra.mxu2 %v11111_v19  ;;  %v12918_v35 = vand.u32 4294901760, %v12917_v53  ;;  %v5315_v18 = vand.u32 4294901760, %v5314_v30  ;;  %v5326_v25 = vsub.f32 %v11227_v2, %v12212_v20  ;;  %v12919_v37 = vld [vmem:[#allocation143_spill] sm:$0xff]  ;;  %v12920_v38 = vld [vmem:[#allocation18_spill] sm:$0xff] }
 0x2cc   :  { %5304 = vmatpush.msra.mxu3 %v5303_v32  ;;  %v5320_v47 = vsub.f32 %v11207_v62, %v12916_v9  ;;  %6246 = vmatmul.msk.f32.gmra.mxu1 %vm91_vm11, %v12234_v41  ;;  %vm66_vm13 = vcmp.eq.s32.totalorder %v11117_v5, %v6896_v48  ;;  %v3000_v32 = vadd.f32 %v12919_v37, %v2951_v50  ;;  %v12213_v17 = vand.u32 4294901760, %v11269_v11  ;;  %v12923_v9 = vld [vmem:[#allocation42_spill] sm:$0xff]  ;;  %v12925_v37 = vld [vmem:[#allocation13_spill] sm:$0xff] }
 0x2cd   :  { %5085 = vmatpush.msra.mxu0 %v12918_v35  ;;  %5156 = vmatpush.msra.mxu1 %v10740_v26  ;;  %v3306_v12 = vadd.f32 %v12920_v38, %v3250_v31  ;;  %v4805_v49 = vsub.f32 %v11204_v58, %v4804_v45  ;;  %v12921_v26 = vld [vmem:[#allocation165_spill] sm:$0xff]  ;;  %v3186_v51 = vadd.f32 %v12922_v23, %v3073_v6  ;;  %v12924_v53 = vand.u32 4294901760, %v12923_v9  ;;  %v11301_v31 = vpop.f32.mrf.mxu1  ;;  %v12927_v6 = vld [vmem:[#allocation47_spill] sm:$0xff]  ;;  %v12930_v9 = vld [vmem:[#allocation32_spill] sm:$0xff] }
 0x2ce   :  { %5203 = vmatpush.msra.mxu2 %v11143_v39  ;;  %5310 = vmatpush.msra.mxu3 %v5309_v1  ;;  %v3240_v30 = vadd.f32 %v12921_v26, %v3174_v54  ;;  %v5321_v35 = vand.u32 4294901760, %v5320_v47  ;;  %v12214_v50 = vand.u32 4294901760, %v11251_v52  ;;  %v3057_v1 = vadd.f32 %v12925_v37, %v3000_v32  ;;  %v12926_v38 = vld [vmem:[#allocation37_spill] sm:$0xff] }
 0x2cf   :  { %4989 = vmatmul.f32.gmra.mxu2 %v11204_v58  ;;  %5089 = vmatpush.msra.mxu0 %v12924_v53  ;;  %v3389_v20 = vadd.f32 %v12926_v38, %v3306_v12  ;;  %v5332_v58 = vsub.f32 %v11249_v16, %v12215_v36  ;;  %v12928_v54 = vand.u32 4294901760, %v12927_v6  ;;  %v5327_v47 = vand.u32 4294901760, %v5326_v25  ;;  %v11322_v12 = vpop.f32.mrf.mxu2  ;;  %v12931_v53 = vld [vmem:[#allocation6_spill] sm:$0xff]  ;;  %v12932_v38 = vld [vmem:[#allocation33_spill] sm:$0xff] }
 0x2d0   :  { %5158 = vmatpush.msra.mxu1 %v10769_v15  ;;  %5205 = vmatpush.msra.mxu2 %v11168_v21  ;;  %v5338_v15 = vsub.f32 %v11269_v11, %v12213_v17  ;;  %v6095_v32 = vsel %vm66_vm13, 1.0, %v12235_v56  ;;  %v3255_v25 = vadd.f32 %v12930_v9, %v3186_v51  ;;  %v3178_v37 = vadd.f32 %v12931_v53, %v3057_v1  ;;  %v12936_v1 = vld [vmem:[#allocation7_spill] sm:$0xff]  ;;  %v12937_v53 = vld [vmem:[#allocation40_spill] sm:$0xff] }
 0x2d1   :  { %5316 = vmatpush.msra.mxu3 %v5315_v18  ;;  %5093 = vmatpush.msra.mxu0 %v12928_v54  ;;  %v11312_v26 = vpop.f32.mrf.mxu0  ;;  %v12929_v18 = vld [vmem:[#allocation16_spill] sm:$0xff]  ;;  %v3438_v6 = vadd.f32 %v12932_v38, %v3389_v20  ;;  %v12933_v54 = vld [vmem:[#allocation138_spill] sm:$0xff]  ;;  %v5333_v51 = vand.u32 4294901760, %v5332_v58  ;;  %v12939_v58 = vld [vmem:[#allocation11_spill] sm:$0xff]  ;;  %vm79_vm14 = vcmp.eq.s32.totalorder %v11117_v5, %v6885_v57  ;;  %vm92_vm15 = vcmp.eq.s32.totalorder %v11117_v5, %v6917_v28 }
 0x2d2   :  { %5046 = vmatmul.f32.gmra.mxu3 %v4804_v45  ;;  %5160 = vmatpush.msra.mxu1 %v10792_v34  ;;  %v3294_v23 = vadd.f32 %v12929_v18, %v3240_v30  ;;  %v5215_v34 = vsub.f32 %v11251_v52, %v12214_v50  ;;  %v11330_v45 = vpop.f32.mrf.mxu3  ;;  %v12934_v17 = vand.u32 4294901760, %v12933_v54  ;;  %v4806_v30 = vand.u32 4294901760, %v4805_v49  ;;  %v12935_v18 = vld [vmem:[#allocation12_spill] sm:$0xff]  ;;  %v12943_v50 = vld [vmem:[#allocation26_spill] sm:$0xff]  ;;  %v12959_v11 = vld [vmem:[#allocation147_spill] sm:$0xff] }
 0x2d3   :  { %5207 = vmatpush.msra.mxu2 %v11186_v3  ;;  %5322 = vmatpush.msra.mxu3 %v5321_v35  ;;  %v11339_v35 = vsub.f32 %v6095_v32, %v6095_v32  ;;  %v5339_v20 = vand.u32 4294901760, %v5338_v15  ;;  %v12941_v38 = vld [vmem:[#allocation48_spill] sm:$0xff]  ;;  %v12960_v22 = vand.u32 4294901760, %v12959_v11 }
 0x2d4   :  { %5097 = vmatpush.msra.mxu0 %v12934_v17  ;;  %5162 = vmatpush.msra.mxu1 %v10808_v29  ;;  %v3381_v9 = vadd.f32 %v12935_v18, %v3294_v23  ;;  %v3312_v17 = vadd.f32 %v12936_v1, %v3255_v25  ;;  %v12938_v29 = vand.u32 4294901760, %v12937_v53  ;;  %v5216_v49 = vand.u32 4294901760, %v5215_v34  ;;  %v12942_v54 = vld [vmem:[#allocation8_spill] sm:$0xff]  ;;  %v12952_v53 = vld [vmem:[#allocation25_spill] sm:$0xff] }
 0x2d5   :  { %5209 = vmatpush.msra.mxu2 %v11215_v33  ;;  %5328 = vmatpush.msra.mxu3 %v5327_v47  ;;  %v3245_v23 = vadd.f32 %v12939_v58, %v3178_v37  ;;  %v12940_v47 = vld [vmem:[#allocation10_spill] sm:$0xff]  ;;  %v12944_v15 = vld [vmem:[#allocation56_spill] sm:$0xff]  ;;  %v12220_v25 = vand.u32 4294901760, %v11339_v35  ;;  %v11359_v34 = vpop.f32.mrf.mxu1  ;;  %v12946_v37 = vld [vmem:[#allocation53_spill] sm:$0xff] }
 0x2d6   :  { %6251 = vmatmul.msk.f32.vlgmr.msra.gmra.mxu1 %vm52_vm8, %v12234_v41  ;;  %4807 = vmatmul.f32.gmra.mxu0 %v4806_v30  ;;  %v3499_v32 = vadd.f32 %v12940_v47, %v3438_v6  ;;  %v3430_v18 = vadd.f32 %v12942_v54, %v3381_v9  ;;  %v3393_v30 = vadd.f32 %v12943_v50, %v3312_v17  ;;  %v12945_v36 = vand.u32 4294901760, %v12944_v15  ;;  %v12947_v6 = vld [vmem:[#allocation151_spill] sm:$0xff]  ;;  %v12953_v58 = vld [vmem:[#allocation21_spill] sm:$0xff]  ;;  %v12955_v15 = vld [vmem:[#allocation70_spill] sm:$0xff] }
 0x2d7   :  { %5101 = vmatpush.msra.mxu0 %v12938_v29  ;;  %5211 = vmatpush.msra.mxu2 %v11238_v46  ;;  %v12949_v9 = vld [vmem:[#allocation59_spill] sm:$0xff] }
 0x2d8   :  { %5334 = vmatpush.msra.mxu3 %v5333_v51  ;;  %5428 = vmatpush.msrb.mxu1 %v12941_v38  ;;  %v12948_v51 = vand.u32 4294901760, %v12947_v6  ;;  %v12950_v1 = vand.u32 4294901760, %v12949_v9  ;;  %v3616_v29 = vadd.f32 %v12952_v53, %v3499_v32  ;;  %v3483_v47 = vadd.f32 %v12953_v58, %v3430_v18  ;;  %v12954_v54 = vld [vmem:[#allocation31_spill] sm:$0xff]  ;;  %v12958_v53 = vld [vmem:[#allocation41_spill] sm:$0xff]  ;;  %v12961_v18 = vld [vmem:[#allocation60_spill] sm:$0xff] }
 0x2d9   :  { %5105 = vmatpush.msra.mxu0 %v12945_v36  ;;  %5217 = vmatmul.f32.vlgmr.msra.gmra.mxu2 %v5216_v49  ;;  %v12951_v36 = vld [vmem:[#allocation17_spill] sm:$0xff]  ;;  %v11379_v49 = vpop.f32.mrf.mxu2  ;;  %v12956_v32 = vand.u32 4294901760, %v12955_v15 }
 0x2da   :  { %5340 = vmatpush.msra.mxu3 %v5339_v20  ;;  %5430 = vmatpush.msrb.mxu1 %v12946_v37  ;;  %v3300_v17 = vadd.f32 %v12951_v36, %v3245_v23  ;;  %v6108_v20 = vsel %vm79_vm14, 1.0, %v12235_v56  ;;  %v3442_v23 = vadd.f32 %v12954_v54, %v3393_v30  ;;  %v3684_v43 = vadd.f32 %v12958_v53, %v3616_v29  ;;  %v12966_v54 = vld [vmem:[#allocation44_spill] sm:$0xff] }
 0x2db   :  { %5487 = vmatpush.msrb.mxu2 %v12948_v51  ;;  %5109 = vmatpush.msra.mxu0 %v12950_v1  ;;  %v11366_v50 = vpop.f32.mrf.mxu0  ;;  %v5223_v51 = vsub.f32 %v11339_v35, %v12220_v25  ;;  %v12957_v1 = vld [vmem:[#allocation9_spill] sm:$0xff]  ;;  %v12962_v30 = vand.u32 4294901760, %v12961_v18  ;;  %v12968_v53 = vld [vmem:[#allocation144_spill] sm:$0xff] }
 0x2dc   :  { %6255 = vmatmul.msk.f32.vlgmr.msra.gmra.mxu3 %vm53_vm12, %v12234_v41  ;;  %5432 = vmatpush.msrb.mxu1 %v10915_v44  ;;  %v11389_v9 = vpop.f32.mrf.mxu3  ;;  %v3385_v36 = vadd.f32 %v12957_v1, %v3300_v17  ;;  %v12964_v17 = vld [vmem:[#allocation23_spill] sm:$0xff]  ;;  %v12967_v1 = vand.u32 4294901760, %v10984_v8 }
 0x2dd   :  { %5491 = vmatpush.msrb.mxu2 %v12956_v32  ;;  %5566 = vmatpush.msrb.mxu3 %v12941_v38  ;;  %v11399_v38 = vsub.f32 %v6108_v20, %v6108_v20  ;;  %v3507_v29 = vadd.f32 %v12964_v17, %v3442_v23  ;;  %v12965_v20 = vld [vmem:[#allocation27_spill] sm:$0xff]  ;;  %v3740_v32 = vadd.f32 %v12966_v54, %v3684_v43  ;;  %v12969_v43 = vld [vmem:[#allocation69_spill] sm:$0xff] }
 0x2de   :  { %5113 = vmatpush.msra.mxu0 %v12960_v22  ;;  %5434 = vmatpush.msrb.mxu1 %v10945_v24  ;;  %v12963_v22 = vld [vmem:[#allocation24_spill] sm:$0xff]  ;;  %v3434_v58 = vadd.f32 %v12965_v20, %v3385_v36  ;;  %v12970_v23 = vand.u32 4294901760, %v12969_v43  ;;  %v12975_v20 = vld [vmem:[#allocation61_spill] sm:$0xff]  ;;  %v12976_v54 = vld [vmem:[#allocation155_spill] sm:$0xff] }
 0x2df   :  { %5495 = vmatpush.msrb.mxu2 %v12962_v30  ;;  %5568 = vmatpush.msrb.mxu3 %v12946_v37  ;;  %v3608_v11 = vadd.f32 %v12963_v22, %v3483_v47  ;;  %v5224_v37 = vand.u32 4294901760, %v5223_v51  ;;  %v12219_v47 = vand.u32 4294901760, %v11399_v38  ;;  %v12971_v51 = vld [vmem:[#allocation38_spill] sm:$0xff] }
 0x2e0   :  { %6252 = vmatmul.msk.f32.gmra.mxu1 %vm65_vm9, %v12234_v41  ;;  %6247 = vmatmul.msk.f32.vlgmr.msra.gmra.mxu0 %vm52_vm8, %v12234_v41  ;;  %v3620_v36 = vadd.f32 %v12971_v51, %v3507_v29 }
 0x2e1   :  { %5360 = vmatpush.msrb.mxu0 %v12947_v6  ;;  %5436 = vmatpush.msrb.mxu1 %v10965_v7  ;;  %v3674_v30 = vadd.f32 %v12968_v53, %v3608_v11  ;;  %v11423_v6 = vpop.f32.mrf.mxu1  ;;  %v12973_v11 = vld [vmem:[#allocation152_spill] sm:$0xff] }
 0x2e2   :  { %5499 = vmatpush.msrb.mxu2 %v12967_v1  ;;  %5570 = vmatpush.msrb.mxu3 %v10915_v44  ;;  %v3823_v17 = vadd.f32 %v12973_v11, %v3740_v32  ;;  %v12977_v32 = vand.u32 4294901760, %v12976_v54  ;;  %v5231_v1 = vsub.f32 %v11399_v38, %v12219_v47  ;;  %v12981_v11 = vld [vmem:[#allocation62_spill] sm:$0xff] }
 0x2e3   :  { %5225 = vmatmul.f32.gmra.mxu2 %v5224_v37  ;;  %5363 = vmatpush.msrb.mxu0 %v12955_v15  ;;  %v12972_v15 = vld [vmem:[#allocation22_spill] sm:$0xff] }
 0x2e4   :  { %5438 = vmatpush.msrb.mxu1 %v10986_v59  ;;  %5503 = vmatpush.msrb.mxu2 %v12970_v23  ;;  %v3491_v22 = vadd.f32 %v12972_v15, %v3434_v58  ;;  %v11444_v29 = vpop.f32.mrf.mxu2  ;;  %v3689_v58 = vadd.f32 %v12975_v20, %v3620_v36  ;;  %v12978_v23 = vld [vmem:[#allocation157_spill] sm:$0xff]  ;;  %v12980_v36 = vld [vmem:[#allocation19_spill] sm:$0xff] }
 0x2e5   :  { %5572 = vmatpush.msrb.mxu3 %v10945_v24  ;;  %5366 = vmatpush.msrb.mxu0 %v12961_v18  ;;  %v11431_v44 = vpop.f32.mrf.mxu0  ;;  %v6121_v24 = vsel %vm92_vm15, 1.0, %v12235_v56  ;;  %v12974_v18 = vld [vmem:[#allocation29_spill] sm:$0xff]  ;;  %v12979_v51 = vand.u32 4294901760, %v12978_v23 }
 0x2e6   :  { %6256 = vmatmul.msk.f32.gmra.mxu3 %vm66_vm13, %v12234_v41  ;;  %5440 = vmatpush.msrb.mxu1 %v11015_v40  ;;  %v3728_v37 = vadd.f32 %v12974_v18, %v3674_v30  ;;  %v405_v30 = vld [vmem:[%s12054_s1 + $0x678] sm:$0xff]  ;;  %v3612_v15 = vadd.f32 %v12980_v36, %v3491_v22  ;;  %v3872_v18 = vadd.f32 %v12981_v11, %v3823_v17  ;;  %v5232_v22 = vand.u32 4294901760, %v5231_v1  ;;  %v403_v1 = vld [vmem:[%s12054_s1 + $0x668] sm:$0xff] }
 0x2e7   :  { %5507 = vmatpush.msrb.mxu2 %v12977_v32  ;;  %5574 = vmatpush.msrb.mxu3 %v10965_v7  ;;  %v11454_v53 = vpop.f32.mrf.mxu3  ;;  %v11464_v7 = vsub.f32 %v6121_v24, %v6121_v24  ;;  %v12983_v32 = vld [vmem:[#allocation49_spill] sm:$0xff]  ;;  %v11480_v17 = vand.u32 4294901760, %v405_v30  ;;  %v404_v24 = vld [vmem:[%s12054_s1 + $0x670] sm:$0xff]  ;;  %v12985_v11 = vand.u32 4294901760, %v11081_v4 }
 0x2e8   :  { %5369 = vmatpush.msrb.mxu0 %v10984_v8  ;;  %5442 = vmatpush.msrb.mxu1 %v11043_v61  ;;  %v12982_v8 = vld [vmem:[#allocation36_spill] sm:$0xff] }
 0x2e9   :  { %5511 = vmatpush.msrb.mxu2 %v12979_v51  ;;  %5576 = vmatpush.msrb.mxu3 %v10986_v59  ;;  %v3815_v20 = vadd.f32 %v12982_v8, %v3728_v37  ;;  %v3746_v59 = vadd.f32 %v12983_v32, %v3689_v58  ;;  %v12984_v51 = vld [vmem:[#allocation43_spill] sm:$0xff]  ;;  %v3933_v37 = vadd.f32 %v11312_v26, %v3872_v18  ;;  %v11492_v58 = vpop.f32.mrf.mxu1  ;;  %v11500_v8 = vand.u32 4294901760, %v404_v24  ;;  %v12988_v18 = vld [vmem:[#allocation58_spill] sm:$0xff] }
 0x2ea   :  { %6253 = vmatmul.msk.f32.gmra.mxu1 %vm78_vm10, %v12234_v41  ;;  %6248 = vmatmul.msk.f32.gmra.mxu0 %vm65_vm9, %v12234_v41  ;;  %v3679_v36 = vadd.f32 %v12984_v51, %v3612_v15  ;;  %v12986_v15 = vand.u32 4294901760, %v11106_v13 }
 0x2eb   :  { %5372 = vmatpush.msrb.mxu0 %v12969_v43  ;;  %5444 = vmatpush.msrb.mxu1 %v11066_v55  ;;  %v12218_v43 = vand.u32 4294901760, %v11464_v7  ;;  %v3827_v32 = vadd.f32 %v12988_v18, %v3746_v59 }
 0x2ec   :  { %5515 = vmatpush.msrb.mxu2 %v12985_v11  ;;  %5578 = vmatpush.msrb.mxu3 %v11015_v40  ;;  %v12987_v40 = vld [vmem:[#allocation139_spill] sm:$0xff]  ;;  %v12989_v11 = vld [vmem:[#allocation30_spill] sm:$0xff] }
 0x2ed   :  { %5233 = vmatmul.f32.gmra.mxu2 %v5232_v22  ;;  %5375 = vmatpush.msrb.mxu0 %v12976_v54  ;;  %v3864_v26 = vadd.f32 %v12987_v40, %v3815_v20  ;;  %v11507_v54 = vsub.f32 %v405_v30, %v11480_v17  ;;  %v402_v22 = vld [vmem:[%s12054_s1 + $0x660] sm:$0xff]  ;;  %v12990_v20 = vld [vmem:[#allocation35_spill] sm:$0xff]  ;;  %v12991_v40 = vand.u32 4294901760, %v11125_v42 }
 0x2ee   :  { %5446 = vmatpush.msrb.mxu1 %v11083_v63  ;;  %5519 = vmatpush.msrb.mxu2 %v12986_v15  ;;  %v3734_v15 = vadd.f32 %v12989_v11, %v3679_v36  ;;  %v11523_v30 = vpop.f32.mrf.mxu2  ;;  %v5239_v36 = vsub.f32 %v11464_v7, %v12218_v43 }
 0x2ef   :  { %5580 = vmatpush.msrb.mxu3 %v11043_v61  ;;  %5378 = vmatpush.msrb.mxu0 %v12978_v23  ;;  %v11512_v51 = vpop.f32.mrf.mxu0  ;;  %v4050_v61 = vadd.f32 %v11301_v31, %v3933_v37  ;;  %v11521_v23 = vand.u32 4294901760, %v403_v1  ;;  %v3917_v59 = vadd.f32 %v12990_v20, %v3864_v26  ;;  %v11537_v31 = vsub.f32 %v404_v24, %v11500_v8  ;;  %v401_v26 = vld [vmem:[%s12054_s1 + $0x658] sm:$0xff] }
 0x2f0   :  { %6257 = vmatmul.msk.f32.gmra.mxu3 %vm79_vm14, %v12234_v41  ;;  %5448 = vmatpush.msrb.mxu1 %v11111_v19  ;;  %v11539_v37 = vand.u32 4294901760, %v402_v22  ;;  %v12993_v20 = vand.u32 4294901760, %v11150_v27 }
 0x2f1   :  { %5523 = vmatpush.msrb.mxu2 %v12991_v40  ;;  %5582 = vmatpush.msrb.mxu3 %v11066_v55  ;;  %v11532_v18 = vpop.f32.mrf.mxu3  ;;  %v12992_v55 = vld [vmem:[#allocation159_spill] sm:$0xff]  ;;  %v12995_v40 = vld [vmem:[#allocation150_spill] sm:$0xff]  ;;  %v4118_v24 = vadd.f32 %v11322_v12, %v4050_v61  ;;  %v5240_v12 = vand.u32 4294901760, %v5239_v36  ;;  %v11568_v61 = vand.u32 4294901760, %v401_v26 }
 0x2f2   :  { %5381 = vmatpush.msrb.mxu0 %v11081_v4  ;;  %5450 = vmatpush.msrb.mxu1 %v11143_v39  ;;  %v3876_v11 = vadd.f32 %v12992_v55, %v3827_v32  ;;  %v11549_v4 = vand.u32 4294901760, %v11507_v54  ;;  %v3819_v43 = vadd.f32 %v12995_v40, %v3734_v15  ;;  %v11562_v32 = vsub.f32 %v403_v1, %v11521_v23  ;;  %v399_v36 = vld [vmem:[%s12054_s1 + $0x648] sm:$0xff] }
 0x2f3   :  { %5527 = vmatpush.msrb.mxu2 %v12993_v20  ;;  %5584 = vmatpush.msrb.mxu3 %v11083_v63  ;;  %v12996_v63 = vld [vmem:[#allocation71_spill] sm:$0xff]  ;;  %v12997_v40 = vand.u32 4294901760, %v11184_v60  ;;  %v11577_v1 = vand.u32 4294901760, %v11537_v31 }
 0x2f4   :  { %12994 = vst [vmem:[#allocation161_spill] sm:$0xff] %v11549_v4  ;;  %6254 = vmatmul.msk.f32.gmra.mxu1 %vm91_vm11, %v12234_v41  ;;  %6249 = vmatmul.msk.f32.gmra.mxu0 %vm78_vm10, %v12234_v41  ;;  %v4042_v55 = vadd.f32 %v12996_v63, %v3917_v59  ;;  %v3941_v15 = vadd.f32 %v11366_v50, %v3876_v11  ;;  %v400_v20 = vld [vmem:[%s12054_s1 + $0x650] sm:$0xff]  ;;  %v4305_v59 = vpop.f32.mrf.mxu1  ;;  %v12999_v11 = vld [vmem:[#allocation57_spill] sm:$0xff] }
 0x2f5   :  { %5384 = vmatpush.msrb.mxu0 %v11106_v13  ;;  %5452 = vmatpush.msrb.mxu1 %v11168_v21  ;;  %12998 = vst [vmem:[#allocation79_spill] sm:$0xff] %v11577_v1  ;;  %v11580_v13 = vsub.f32 %v402_v22, %v11539_v37  ;;  %v5682_v50 = vsub.f32 %v11507_v54, %v11549_v4  ;;  %v13000_v22 = vand.u32 4294901760, %v11207_v62 }
 0x2f6   :  { %5531 = vmatpush.msrb.mxu2 %v12997_v40  ;;  %5586 = vmatpush.msrb.mxu3 %v11111_v19  ;;  %v3868_v63 = vadd.f32 %v12999_v11, %v3819_v43  ;;  %v4174_v19 = vadd.f32 %v11330_v45, %v4118_v24  ;;  %v13002_v40 = vld [vmem:[#allocation160_spill] sm:$0xff]  ;;  %v4054_v43 = vadd.f32 %v11359_v34, %v3941_v15  ;;  %v398_v24 = vld [vmem:[%s12054_s1 + $0x640] sm:$0xff]  ;;  %v11618_v34 = vand.u32 4294901760, %v399_v36 }
 0x2f7   :  { %5241 = vmatmul.f32.gmra.mxu2 %v5240_v12  ;;  %5387 = vmatpush.msrb.mxu0 %v11125_v42  ;;  %v11594_v12 = vand.u32 4294901760, %v11562_v32  ;;  %v11596_v42 = vand.u32 4294901760, %v400_v20  ;;  %v4108_v47 = vadd.f32 %v13002_v40, %v4042_v55  ;;  %v11603_v45 = vsub.f32 %v401_v26, %v11568_v61 }
 0x2f8   :  { %5454 = vmatpush.msrb.mxu1 %v11186_v3  ;;  %5535 = vmatpush.msrb.mxu2 %v13000_v22  ;;  %v4366_v55 = vpop.f32.mrf.mxu2  ;;  %v3925_v15 = vadd.f32 %v11244_v14, %v3868_v63  ;;  %v13003_v22 = vand.u32 4294901760, %v11227_v2  ;;  %v5683_v40 = vand.u32 4294901760, %v5682_v50  ;;  %v397_v14 = vld [vmem:[%s12054_s1 + $0x638] sm:$0xff] }
 0x2f9   :  { %13001 = vst [vmem:[#allocation164_spill] sm:$0xff] %v11594_v12  ;;  %5588 = vmatpush.msrb.mxu3 %v11143_v39  ;;  %5390 = vmatpush.msrb.mxu0 %v11150_v27  ;;  %v4256_v11 = vpop.f32.mrf.mxu0  ;;  %v5688_v39 = vsub.f32 %v11537_v31, %v11577_v1  ;;  %v11616_v27 = vand.u32 4294901760, %v11580_v13  ;;  %v5694_v1 = vsub.f32 %v11562_v32, %v11594_v12  ;;  %v11660_v12 = vand.u32 4294901760, %v397_v14 }
 0x2fa   :  { %6258 = vmatmul.msk.f32.gmra.mxu3 %vm92_vm15, %v12234_v41  ;;  %5456 = vmatpush.msrb.mxu1 %v11215_v33  ;;  %v4257_v26 = vadd.f32 %v4256_v11, %v4174_v19  ;;  %v11629_v4 = vsub.f32 %v400_v20, %v11596_v42  ;;  %v11631_v19 = vand.u32 4294901760, %v398_v24  ;;  %v4123_v11 = vadd.f32 %v11379_v49, %v4054_v43 }
 0x2fb   :  { %5539 = vmatpush.msrb.mxu2 %v13003_v22  ;;  %5590 = vmatpush.msrb.mxu3 %v11168_v21  ;;  %v4483_v25 = vpop.f32.mrf.mxu3  ;;  %v13004_v21 = vld [vmem:[#allocation50_spill] sm:$0xff]  ;;  %v11642_v22 = vand.u32 4294901760, %v11603_v45  ;;  %v13006_v20 = vand.u32 4294901760, %v11251_v52  ;;  %v5700_v49 = vsub.f32 %v11580_v13, %v11616_v27 }
 0x2fc   :  { %5393 = vmatpush.msrb.mxu0 %v11184_v60  ;;  %5458 = vmatpush.msrb.mxu1 %v11238_v46  ;;  %v4306_v63 = vadd.f32 %v4305_v59, %v4257_v26  ;;  %v4162_v50 = vadd.f32 %v13004_v21, %v4108_v47  ;;  %v13005_v60 = vand.u32 4294901760, %v11249_v16  ;;  %v5689_v59 = vand.u32 4294901760, %v5688_v39  ;;  %v13008_v21 = vld [vmem:[#allocation73_spill] sm:$0xff] }
 0x2fd   :  { %5592 = vmatpush.msrb.mxu3 %v11186_v3  ;;  %5462 = vmatmul.f32.vlgmr.msrb.gmra.mxu1 %v13006_v20  ;;  %v11653_v47 = vsub.f32 %v399_v36, %v11618_v34  ;;  %v13007_v3 = vld [vmem:[#allocation63_spill] sm:$0xff]  ;;  %v5695_v36 = vand.u32 4294901760, %v5694_v1  ;;  %v11667_v39 = vand.u32 4294901760, %v11629_v4  ;;  %v395_v1 = vld [vmem:[%s12054_s1 + $0x628] sm:$0xff] }
 0x2fe   :  { %5543 = vmatpush.msrb.mxu2 %v13005_v60  ;;  %6250 = vmatmul.msk.f32.gmra.mxu0 %vm91_vm11, %v12234_v41  ;;  %v4367_v43 = vadd.f32 %v4366_v55, %v4306_v63  ;;  %v4046_v26 = vadd.f32 %v13007_v3, %v3925_v15  ;;  %v13009_v60 = vand.u32 4294901760, %v13008_v21  ;;  %v4249_v20 = vadd.f32 %v11431_v44, %v4162_v50  ;;  %v4309_v44 = vpop.f32.mrf.mxu1 }
 0x2ff   :  { %5396 = vmatpush.msrb.mxu0 %v11207_v62  ;;  %5594 = vmatpush.msrb.mxu3 %v11215_v33  ;;  %v11670_v62 = vsub.f32 %v398_v24, %v11631_v19  ;;  %v5706_v33 = vsub.f32 %v11603_v45, %v11642_v22  ;;  %v4180_v24 = vadd.f32 %v11389_v9, %v4123_v11  ;;  %v11689_v15 = vand.u32 4294901760, %v396_v10 }
 0x300   :  { %5547 = vmatpush.msrb.mxu2 %v13009_v60  ;;  %5684 = vmatpush.msra.mxu1 %v5683_v40  ;;  %v11672_v55 = vadd.f32 %v4483_v25, %v4367_v43  ;;  %v5701_v25 = vand.u32 4294901760, %v5700_v49  ;;  %v13010_v40 = vld [vmem:[#allocation66_spill] sm:$0xff]  ;;  %v4298_v50 = vadd.f32 %v11423_v6, %v4249_v20  ;;  %v11696_v43 = vsub.f32 %v397_v14, %v11660_v12  ;;  %v393_v20 = vld [vmem:[%s12054_s1 + $0x618] sm:$0xff] }
 0x301   :  { %5399 = vmatpush.msrb.mxu0 %v11227_v2  ;;  %6259 = vmatmul.msk.f32.vlgmr.msrb.gmra.mxu2 %vm53_vm12, %v12234_v41  ;;  %v11687_v2 = vand.u32 4294901760, %v11653_v47  ;;  %v4113_v63 = vadd.f32 %v13010_v40, %v4046_v26  ;;  %v11710_v6 = vand.u32 4294901760, %v395_v1  ;;  %v11718_v26 = vsub.f32 %v396_v10, %v11689_v15 }
 0x302   :  { %5596 = vmatpush.msrb.mxu3 %v11238_v46  ;;  %5690 = vmatpush.msra.mxu1 %v5689_v59  ;;  %v394_v46 = vld [vmem:[%s12054_s1 + $0x620] sm:$0xff]  ;;  %v4374_v11 = vpop.f32.mrf.mxu2  ;;  %v5707_v59 = vand.u32 4294901760, %v5706_v33  ;;  %v4351_v33 = vadd.f32 %v11444_v29, %v4298_v50  ;;  %v13012_v10 = vand.u32 4294901760, %v11339_v35  ;;  %v392_v50 = vld [vmem:[%s12054_s1 + $0x610] sm:$0xff] }
 0x303   :  { %5794 = vmatpush.msra.mxu2 %v11507_v54  ;;  %5402 = vmatpush.msrb.mxu0 %v11249_v16  ;;  %v4260_v9 = vpop.f32.mrf.mxu0  ;;  %v5712_v54 = vsub.f32 %v11629_v4, %v11667_v39  ;;  %v11708_v16 = vand.u32 4294901760, %v11670_v62  ;;  %v5718_v3 = vsub.f32 %v11653_v47, %v11687_v2  ;;  %v11720_v60 = vand.u32 4294901760, %v394_v46 }
 0x304   :  { %6263 = vmatmul.msk.f32.vlgmr.msrb.gmra.mxu3 %vm53_vm12, %v12234_v41  ;;  %5696 = vmatpush.msra.mxu1 %v5695_v36  ;;  %v4261_v14 = vadd.f32 %v4260_v9, %v4180_v24  ;;  %v13011_v36 = vld [vmem:[#allocation72_spill] sm:$0xff]  ;;  %v11738_v40 = vsub.f32 %v395_v1, %v11710_v6  ;;  %v11750_v1 = vand.u32 4294901760, %v11718_v26 }
 0x305   :  { %5797 = vmatpush.msra.mxu2 %v11537_v31  ;;  %5862 = vmatpush.msra.mxu3 %v11480_v17  ;;  %v4487_v49 = vpop.f32.mrf.mxu3  ;;  %v4168_v24 = vadd.f32 %v13011_v36, %v4113_v63  ;;  %v11742_v63 = vand.u32 4294901760, %v393_v20  ;;  %v11753_v9 = vsub.f32 %v394_v46, %v11720_v60  ;;  %v4476_v46 = vadd.f32 %v11454_v53, %v4351_v33  ;;  %v390_v53 = vld [vmem:[%s12054_s1 + $0x600] sm:$0xff] }
 0x306   :  { %5405 = vmatpush.msrb.mxu0 %v13008_v21  ;;  %5702 = vmatpush.msra.mxu1 %v5701_v25  ;;  %v4310_v31 = vadd.f32 %v4309_v44, %v4261_v14  ;;  %v11730_v21 = vand.u32 4294901760, %v11696_v43  ;;  %v5713_v25 = vand.u32 4294901760, %v5712_v54  ;;  %v5724_v44 = vsub.f32 %v11670_v62, %v11708_v16  ;;  %v391_v14 = vld [vmem:[%s12054_s1 + $0x608] sm:$0xff]  ;;  %s6348_s1 = smov [#allocation2]  }
 0x307   :  { %5800 = vmatpush.msra.mxu2 %v11562_v32  ;;  %5864 = vmatpush.msra.mxu3 %v11500_v8  ;;  %v4253_v32 = vadd.f32 %v11512_v51, %v4168_v24  ;;  %v5736_v36 = vsub.f32 %v11718_v26, %v11750_v1  ;;  %v11790_v24 = vand.u32 4294901760, %v11753_v9  ;;  %s6057_s27 = sshll.u32 %s6348_s1, 4  ;;  %s6058_s27 = int_to_ptr.vmem [resolvable:$true] %s6057_s27 }
 0x308   :  { %5468 = vmatmul.f32.gmra.mxu1 %v13012_v10  ;;  %5408 = vmatmul.f32.vlgmr.msrb.gmra.mxu0 %v11251_v52  ;;  %v4375_v29 = vadd.f32 %v4374_v11, %v4310_v31  ;;  %v5719_v52 = vand.u32 4294901760, %v5718_v3  ;;  %v5730_v51 = vsub.f32 %v11696_v43, %v11730_v21  ;;  %v5725_v11 = vand.u32 4294901760, %v5724_v44 }
 0x309   :  { %5615 = vmatpush.msra.mxu0 %v11480_v17  ;;  %5708 = vmatpush.msra.mxu1 %v5707_v59  ;;  %v11770_v59 = vand.u32 4294901760, %v11738_v40  ;;  %v4302_v3 = vadd.f32 %v11492_v58, %v4253_v32  ;;  %v11778_v31 = vsub.f32 %v393_v20, %v11742_v63  ;;  %v11792_v58 = vand.u32 4294901760, %v391_v14 }
 0x30a   :  { %5803 = vmatpush.msra.mxu2 %v11580_v13  ;;  %5866 = vmatpush.msra.mxu3 %v11521_v23  ;;  %v11755_v54 = vadd.f32 %v4487_v49, %v4375_v29  ;;  %v4595_v13 = vpop.f32.mrf.mxu1  ;;  %v11772_v49 = vand.u32 4294901760, %v392_v50  ;;  %v5731_v10 = vand.u32 4294901760, %v5730_v51  ;;  %v11802_v32 = vand.u32 4294901760, %v390_v53 }
 0x30b   :  { %6260 = vmatmul.msk.f32.gmra.mxu2 %vm66_vm13, %v12234_v41  ;;  %5617 = vmatpush.msra.mxu0 %v11500_v8  ;;  %v5742_v44 = vsub.f32 %v11738_v40, %v11770_v59  ;;  %v13013_v51 = vand.u32 4294901760, %v11399_v38 }
 0x30c   :  { %5714 = vmatpush.msra.mxu1 %v5713_v25  ;;  %5806 = vmatpush.msra.mxu2 %v11603_v45  ;;  %v4682_v33 = vpop.f32.mrf.mxu2  ;;  %v11800_v29 = vsub.f32 %v392_v50, %v11772_v49  ;;  %v5748_v50 = vsub.f32 %v11753_v9, %v11790_v24 }
 0x30d   :  { %5868 = vmatpush.msra.mxu3 %v11539_v37  ;;  %5619 = vmatpush.msra.mxu0 %v11521_v23  ;;  %v4541_v45 = vpop.f32.mrf.mxu0 }
 0x30e   :  { %6264 = vmatmul.msk.f32.gmra.mxu3 %vm66_vm13, %v12234_v41  ;;  %5720 = vmatpush.msra.mxu1 %v5719_v52  ;;  %v4542_v20 = vadd.f32 %v4541_v45, %v4476_v46  ;;  %v4359_v46 = vadd.f32 %v11523_v30, %v4302_v3  ;;  %v11822_v3 = vand.u32 4294901760, %v11800_v29 }
 0x30f   :  { %5809 = vmatpush.msra.mxu2 %v11629_v4  ;;  %5870 = vmatpush.msra.mxu3 %v11568_v61  ;;  %v4731_v25 = vpop.f32.mrf.mxu3  ;;  %v11808_v4 = vand.u32 4294901760, %v11778_v31 }
 0x310   :  { %5621 = vmatpush.msra.mxu0 %v11539_v37  ;;  %5726 = vmatpush.msra.mxu1 %v5725_v11  ;;  %v4596_v52 = vadd.f32 %v4595_v13, %v4542_v20  ;;  %v5737_v11 = vand.u32 4294901760, %v5736_v36  ;;  %v11816_v13 = vsub.f32 %v391_v14, %v11792_v58  ;;  %v4480_v36 = vadd.f32 %v11532_v18, %v4359_v46 }
 0x311   :  { %5812 = vmatpush.msra.mxu2 %v11653_v47  ;;  %5872 = vmatpush.msra.mxu3 %v11596_v42  ;;  %v5743_v47 = vand.u32 4294901760, %v5742_v44  ;;  %v5760_v18 = vsub.f32 %v11800_v29, %v11822_v3 }
 0x312   :  { %5474 = vmatmul.f32.gmra.mxu1 %v13013_v51  ;;  %5413 = vmatmul.f32.gmra.mxu0 %v11339_v35  ;;  %v4683_v30 = vadd.f32 %v4682_v33, %v4596_v52  ;;  %v11825_v35 = vsub.f32 %v390_v53, %v11802_v32  ;;  %v4601_v14 = vpop.f32.mrf.mxu1  ;;  %v5749_v53 = vand.u32 4294901760, %v5748_v50  ;;  %v11839_v20 = vand.u32 4294901760, %v11816_v13 }
 0x313   :  { %5623 = vmatpush.msra.mxu0 %v11568_v61  ;;  %5732 = vmatpush.msra.mxu1 %v5731_v10  ;;  %v13014_v10 = vld [vmem:[#allocation5_spill] sm:$0xff] }
 0x314   :  { %5815 = vmatpush.msra.mxu2 %v11670_v62  ;;  %5874 = vmatpush.msra.mxu3 %v11618_v34  ;;  %v11827_v45 = vadd.f32 %v4731_v25, %v4683_v30  ;;  %v5754_v62 = vsub.f32 %v11778_v31, %v11808_v4  ;;  %v11853_v25 = vadd.s32 1536, %v13014_v10  ;;  %v13015_v30 = vand.u32 4294901760, %v11464_v7 }
 0x315   :  { %6261 = vmatmul.msk.f32.gmra.mxu2 %vm79_vm14, %v12234_v41  ;;  %5625 = vmatpush.msra.mxu0 %v11596_v42 }
 0x316   :  { %5738 = vmatpush.msra.mxu1 %v5737_v11  ;;  %5818 = vmatpush.msra.mxu2 %v11696_v43  ;;  %v11850_v43 = vand.u32 4294901760, %v11825_v35  ;;  %v4686_v52 = vpop.f32.mrf.mxu2  ;;  %v5755_v46 = vand.u32 4294901760, %v5754_v62  ;;  %v5766_v11 = vsub.f32 %v11816_v13, %v11839_v20  ;;  %vm54_vm0 = vcmp.eq.s32.totalorder %v11853_v25, %v6868_v0 }
 0x317   :  { %5876 = vmatpush.msra.mxu3 %v11631_v19  ;;  %5627 = vmatpush.msra.mxu0 %v11618_v34  ;;  %v4546_v33 = vpop.f32.mrf.mxu0  ;;  %vm67_vm1 = vcmp.eq.s32.totalorder %v11853_v25, %v6896_v48  ;;  %vm80_vm2 = vcmp.eq.s32.totalorder %v11853_v25, %v6885_v57  ;;  %vm93_vm3 = vcmp.eq.s32.totalorder %v11853_v25, %v6917_v28 }
 0x318   :  { %6265 = vmatmul.msk.f32.gmra.mxu3 %vm79_vm14, %v12234_v41  ;;  %5744 = vmatpush.msra.mxu1 %v5743_v47  ;;  %v4547_v44 = vadd.f32 %v4546_v33, %v4480_v36  ;;  %v5772_v47 = vsub.f32 %v11825_v35, %v11850_v43 }
 0x319   :  { %5821 = vmatpush.msra.mxu2 %v11718_v26  ;;  %5878 = vmatpush.msra.mxu3 %v11660_v12  ;;  %v4735_v51 = vpop.f32.mrf.mxu3  ;;  %v5761_v26 = vand.u32 4294901760, %v5760_v18 }
 0x31a   :  { %5629 = vmatpush.msra.mxu0 %v11631_v19  ;;  %5750 = vmatpush.msra.mxu1 %v5749_v53  ;;  %v4602_v50 = vadd.f32 %v4601_v14, %v4547_v44  ;;  %v4607_v36 = vpop.f32.mrf.mxu1 }
 0x31b   :  { %5824 = vmatpush.msra.mxu2 %v11738_v40  ;;  %5880 = vmatpush.msra.mxu3 %v11689_v15  ;;  %v5767_v40 = vand.u32 4294901760, %v5766_v11 }
 0x31c   :  { %5480 = vmatmul.f32.gmra.mxu1 %v13015_v30  ;;  %5418 = vmatmul.f32.gmra.mxu0 %v11399_v38  ;;  %v4687_v62 = vadd.f32 %v4686_v52, %v4602_v50  ;;  %v6083_v38 = vsel %vm54_vm0, 1.0, %v12235_v56  ;;  %v13016_v52 = vld [vmem:[#allocation161_spill] sm:$0xff] }
 0x31d   :  { %5631 = vmatpush.msra.mxu0 %v11660_v12  ;;  %5756 = vmatpush.msra.mxu1 %v5755_v46  ;;  %v5647_v33 = vsub.f32 %v6083_v38, %v6083_v38  ;;  %v6109_v38 = vsel %vm80_vm2, 1.0, %v12235_v56 }
 0x31e   :  { %5827 = vmatpush.msra.mxu2 %v11753_v9  ;;  %5882 = vmatpush.msra.mxu3 %v11710_v6  ;;  %v11872_v14 = vadd.f32 %v4735_v51, %v4687_v62  ;;  %v5773_v9 = vand.u32 4294901760, %v5772_v47  ;;  %v13017_v51 = vld [vmem:[#allocation79_spill] sm:$0xff]  ;;  %v13018_v47 = vld [vmem:[#allocation164_spill] sm:$0xff] }
 0x31f   :  { %6262 = vmatmul.msk.f32.gmra.mxu2 %vm92_vm15, %v12234_v41  ;;  %5633 = vmatpush.msra.mxu0 %v11689_v15  ;;  %v5648_v5 = vand.u32 4294901760, %v5647_v33 }
 0x320   :  { %5762 = vmatpush.msra.mxu1 %v5761_v26  ;;  %5830 = vmatpush.msra.mxu2 %v11778_v31  ;;  %v4690_v10 = vpop.f32.mrf.mxu2 }
 0x321   :  { %5884 = vmatpush.msra.mxu3 %v11720_v60  ;;  %5635 = vmatpush.msra.mxu0 %v11710_v6  ;;  %v4551_v53 = vpop.f32.mrf.mxu0 }
 0x322   :  { %6266 = vmatmul.msk.f32.gmra.mxu3 %vm92_vm15, %v12234_v41  ;;  %5768 = vmatpush.msra.mxu1 %v5767_v40  ;;  %v4552_v18 = vadd.f32 %v4551_v53, %v11672_v55 }
 0x323   :  { %5833 = vmatpush.msra.mxu2 %v11800_v29  ;;  %5886 = vmatpush.msra.mxu3 %v11742_v63  ;;  %v4739_v31 = vpop.f32.mrf.mxu3 }
 0x324   :  { %5637 = vmatpush.msra.mxu0 %v11720_v60  ;;  %5774 = vmatpush.msra.mxu1 %v5773_v9  ;;  %v4608_v44 = vadd.f32 %v4607_v36, %v4552_v18 }
 0x325   :  { %5836 = vmatpush.msra.mxu2 %v11816_v13  ;;  %5888 = vmatpush.msra.mxu3 %v11772_v49  ;;  %v4613_v13 = vpop.f32.mrf.mxu1 }
 0x326   :  { %6267 = vmatmul.msk.f32.vlgmr.msra.gmra.mxu1 %vm54_vm0, %v12234_v41  ;;  %5423 = vmatmul.f32.gmra.mxu0 %v11464_v7  ;;  %v4691_v55 = vadd.f32 %v4690_v10, %v4608_v44  ;;  %v6096_v7 = vsel %vm67_vm1, 1.0, %v12235_v56 }
 0x327   :  { %5639 = vmatpush.msra.mxu0 %v11742_v63  ;;  %5839 = vmatpush.msra.mxu2 %v11825_v35  ;;  %v5649_v35 = vsub.f32 %v5647_v33, %v5648_v5  ;;  %v5655_v11 = vsub.f32 %v6096_v7, %v6096_v7 }
 0x328   :  { %5890 = vmatpush.msra.mxu3 %v11792_v58  ;;  %6000 = vmatpush.msrb.mxu1 %v11480_v17  ;;  %v11907_v29 = vadd.f32 %v4739_v31, %v4691_v55 }
 0x329   :  { %5641 = vmatpush.msra.mxu0 %v11772_v49  ;;  %5842 = vmatmul.f32.vlgmr.msra.gmra.mxu2 %v5647_v33  ;;  %v5650_v62 = vand.u32 4294901760, %v5649_v35  ;;  %v5663_v33 = vsub.f32 %v6109_v38, %v6109_v38 }
 0x32a   :  { %5892 = vmatpush.msra.mxu3 %v11802_v32  ;;  %6279 = vmatpush.msrb.mxu2 %v13016_v52  ;;  %v4694_v30 = vpop.f32.mrf.mxu2 }
 0x32b   :  { %6002 = vmatpush.msrb.mxu1 %v11500_v8  ;;  %5643 = vmatpush.msra.mxu0 %v11792_v58  ;;  %v4556_v46 = vpop.f32.mrf.mxu0 }
 0x32c   :  { %5896 = vmatmul.f32.vlgmr.msra.gmra.mxu3 %v5648_v5  ;;  %6280 = vmatpush.msrb.mxu2 %v13017_v51  ;;  %v4557_v50 = vadd.f32 %v4556_v46, %v11755_v54 }
 0x32d   :  { %6295 = vmatpush.msrb.mxu3 %v11480_v17  ;;  %6004 = vmatpush.msrb.mxu1 %v11521_v23  ;;  %v4743_v26 = vpop.f32.mrf.mxu3  ;;  %v5656_v17 = vand.u32 4294901760, %v5655_v11  ;;  %v4909_v36 = vpop.f32.mrf.mxu1 }
 0x32e   :  { %5645 = vmatpush.msra.mxu0 %v11802_v32  ;;  %6281 = vmatpush.msrb.mxu2 %v13018_v47  ;;  %v4614_v40 = vadd.f32 %v4613_v13, %v4557_v50 }
 0x32f   :  { %6296 = vmatpush.msrb.mxu3 %v11500_v8  ;;  %6006 = vmatpush.msrb.mxu1 %v11539_v37  ;;  %v5657_v9 = vsub.f32 %v5655_v11, %v5656_v17 }
 0x330   :  { %6268 = vmatmul.msk.f32.gmra.mxu1 %vm67_vm1, %v12234_v41  ;;  %5651 = vmatmul.f32.vlgmr.msra.gmra.mxu0 %v5650_v62  ;;  %v4695_v54 = vadd.f32 %v4694_v30, %v4614_v40 }
 0x331   :  { %5921 = vmatpush.msrb.mxu0 %v13016_v52  ;;  %6282 = vmatpush.msrb.mxu2 %v11616_v27 }
 0x332   :  { %6297 = vmatpush.msrb.mxu3 %v11521_v23  ;;  %6008 = vmatpush.msrb.mxu1 %v11568_v61  ;;  %v11936_v8 = vadd.f32 %v4743_v26, %v4695_v54 }
 0x333   :  { %5847 = vmatmul.f32.gmra.mxu2 %v5655_v11  ;;  %5925 = vmatpush.msrb.mxu0 %v13017_v51 }
 0x334   :  { %6283 = vmatpush.msrb.mxu2 %v11642_v22  ;;  %6298 = vmatpush.msrb.mxu3 %v11539_v37  ;;  %v4975_v53 = vpop.f32.mrf.mxu2  ;;  %v5658_v37 = vand.u32 4294901760, %v5657_v9 }
 0x335   :  { %6010 = vmatpush.msrb.mxu1 %v11596_v42  ;;  %5902 = vmatmul.f32.gmra.mxu3 %v5656_v17  ;;  %v4784_v23 = vpop.f32.mrf.mxu0  ;;  %v4913_v44 = vpop.f32.mrf.mxu1 }
 0x336   :  { %5929 = vmatpush.msrb.mxu0 %v13018_v47  ;;  %6284 = vmatpush.msrb.mxu2 %v11667_v39  ;;  %v4785_v18 = vadd.f32 %v4784_v23, %v11827_v45 }
 0x337   :  { %6299 = vmatpush.msrb.mxu3 %v11568_v61  ;;  %6012 = vmatpush.msrb.mxu1 %v11618_v34  ;;  %v5029_v10 = vpop.f32.mrf.mxu3  ;;  %v5664_v61 = vand.u32 4294901760, %v5663_v33 }
 0x338   :  { %5933 = vmatpush.msrb.mxu0 %v11616_v27  ;;  %6285 = vmatpush.msrb.mxu2 %v11687_v2  ;;  %v4910_v31 = vadd.f32 %v4909_v36, %v4785_v18  ;;  %v6122_v27 = vsel %vm93_vm3, 1.0, %v12235_v56 }
 0x339   :  { %6300 = vmatpush.msrb.mxu3 %v11596_v42  ;;  %6014 = vmatpush.msrb.mxu1 %v11631_v19 }
 0x33a   :  { %6269 = vmatmul.msk.f32.gmra.mxu1 %vm80_vm2, %v12234_v41  ;;  %5659 = vmatmul.f32.gmra.mxu0 %v5658_v37  ;;  %v4976_v45 = vadd.f32 %v4975_v53, %v4910_v31 }
 0x33b   :  { %5937 = vmatpush.msrb.mxu0 %v11642_v22  ;;  %6286 = vmatpush.msrb.mxu2 %v11708_v16  ;;  %v5665_v22 = vsub.f32 %v5663_v33, %v5664_v61 }
 0x33c   :  { %6301 = vmatpush.msrb.mxu3 %v11618_v34  ;;  %6016 = vmatpush.msrb.mxu1 %v11660_v12  ;;  %v11965_v42 = vadd.f32 %v5029_v10, %v4976_v45 }
 0x33d   :  { %5852 = vmatmul.f32.gmra.mxu2 %v5663_v33  ;;  %5941 = vmatpush.msrb.mxu0 %v11667_v39  ;;  %v5671_v39 = vsub.f32 %v6122_v27, %v6122_v27 }
 0x33e   :  { %6287 = vmatpush.msrb.mxu2 %v11730_v21  ;;  %6302 = vmatpush.msrb.mxu3 %v11631_v19  ;;  %v4980_v5 = vpop.f32.mrf.mxu2  ;;  %v5666_v19 = vand.u32 4294901760, %v5665_v22 }
 0x33f   :  { %6018 = vmatpush.msrb.mxu1 %v11689_v15  ;;  %5908 = vmatmul.f32.gmra.mxu3 %v5664_v61  ;;  %v4792_v34 = vpop.f32.mrf.mxu0 }
 0x340   :  { %5945 = vmatpush.msrb.mxu0 %v11687_v2  ;;  %6288 = vmatpush.msrb.mxu2 %v11750_v1  ;;  %v4793_v55 = vadd.f32 %v4792_v34, %v11872_v14 }
 0x341   :  { %6303 = vmatpush.msrb.mxu3 %v11660_v12  ;;  %6020 = vmatpush.msrb.mxu1 %v11710_v6  ;;  %v5035_v56 = vpop.f32.mrf.mxu3  ;;  %v5672_v12 = vand.u32 4294901760, %v5671_v39 }
 0x342   :  { %5949 = vmatpush.msrb.mxu0 %v11708_v16  ;;  %6289 = vmatpush.msrb.mxu2 %v11770_v59  ;;  %v4914_v7 = vadd.f32 %v4913_v44, %v4793_v55 }
 0x343   :  { %6304 = vmatpush.msrb.mxu3 %v11689_v15  ;;  %6022 = vmatpush.msrb.mxu1 %v11720_v60  ;;  %v4917_v15 = vpop.f32.mrf.mxu1  ;;  %v5673_v14 = vsub.f32 %v5671_v39, %v5672_v12 }
 0x344   :  { %6270 = vmatmul.msk.f32.gmra.mxu1 %vm93_vm3, %v12234_v41  ;;  %5667 = vmatmul.f32.gmra.mxu0 %v5666_v19  ;;  %v4981_v2 = vadd.f32 %v4980_v5, %v4914_v7 }
 0x345   :  { %5953 = vmatpush.msrb.mxu0 %v11730_v21  ;;  %6290 = vmatpush.msrb.mxu2 %v11790_v24 }
 0x346   :  { %6305 = vmatpush.msrb.mxu3 %v11710_v6  ;;  %6024 = vmatpush.msrb.mxu1 %v11742_v63  ;;  %v5036_v16 = vadd.f32 %v5035_v56, %v4981_v2 }
 0x347   :  { %5857 = vmatmul.f32.gmra.mxu2 %v5671_v39  ;;  %5957 = vmatpush.msrb.mxu0 %v11750_v1  ;;  %v4800_v21 = vpop.f32.mrf.mxu0 }
 0x348   :  { %6291 = vmatpush.msrb.mxu2 %v11808_v4  ;;  %6306 = vmatpush.msrb.mxu3 %v11720_v60  ;;  %v4985_v13 = vpop.f32.mrf.mxu2  ;;  %v4801_v6 = vadd.f32 %v4800_v21, %v11907_v29  ;;  %v5674_v60 = vand.u32 4294901760, %v5673_v14 }
 0x349   :  { %6026 = vmatpush.msrb.mxu1 %v11772_v49  ;;  %5914 = vmatmul.f32.gmra.mxu3 %v5672_v12 }
 0x34a   :  { %5961 = vmatpush.msrb.mxu0 %v11770_v59  ;;  %6292 = vmatpush.msrb.mxu2 %v11822_v3  ;;  %v4918_v52 = vadd.f32 %v4917_v15, %v4801_v6 }
 0x34b   :  { %6307 = vmatpush.msrb.mxu3 %v11742_v63  ;;  %6028 = vmatpush.msrb.mxu1 %v11792_v58  ;;  %v5041_v1 = vpop.f32.mrf.mxu3 }
 0x34c   :  { %5965 = vmatpush.msrb.mxu0 %v11790_v24  ;;  %6293 = vmatpush.msrb.mxu2 %v11839_v20  ;;  %v4986_v63 = vadd.f32 %v4985_v13, %v4918_v52 }
 0x34d   :  { %6308 = vmatpush.msrb.mxu3 %v11772_v49  ;;  %6030 = vmatpush.msrb.mxu1 %v11802_v32  ;;  %v4921_v49 = vpop.f32.mrf.mxu1 }
 0x34e   :  { %6275 = vmatmul.msk.f32.vlgmr.msrb.gmra.mxu1 %vm54_vm0, %v12234_v41  ;;  %5675 = vmatmul.f32.gmra.mxu0 %v5674_v60  ;;  %v5042_v59 = vadd.f32 %v5041_v1, %v4986_v63 }
 0x34f   :  { %5969 = vmatpush.msrb.mxu0 %v11808_v4  ;;  %6294 = vmatpush.msrb.mxu2 %v11850_v43 }
 0x350   :  { %6309 = vmatpush.msrb.mxu3 %v11792_v58  ;;  %6273 = vmatmul.msk.f32.vlgmr.msrb.gmra.mxu2 %vm80_vm2, %v12234_v41 }
 0x351   :  { %5973 = vmatpush.msrb.mxu0 %v11822_v3 }
 0x352   :  { %6310 = vmatpush.msrb.mxu3 %v11802_v32  ;;  %v4990_v24 = vpop.f32.mrf.mxu2 }
 0x353   :  { %5977 = vmatpush.msrb.mxu0 %v11839_v20  ;;  %6277 = vmatmul.msk.f32.vlgmr.msrb.gmra.mxu3 %vm80_vm2, %v12234_v41  ;;  %v4808_v58 = vpop.f32.mrf.mxu0 }
 0x354   :  { %v4809_v4 = vadd.f32 %v4808_v58, %v11936_v8 }
 0x355   :  { %5981 = vmatpush.msrb.mxu0 %v11850_v43  ;;  %v5047_v29 = vpop.f32.mrf.mxu3  ;;  %v5165_v20 = vpop.f32.mrf.mxu1 }
 0x356   :  { %6276 = vmatmul.msk.f32.gmra.mxu1 %vm67_vm1, %v12234_v41  ;;  %6271 = vmatmul.msk.f32.vlgmr.msrb.gmra.mxu0 %vm54_vm0, %v12234_v41  ;;  %v4922_v32 = vadd.f32 %v4921_v49, %v4809_v4 }
 0x358   :  { %6274 = vmatmul.msk.f32.gmra.mxu2 %vm93_vm3, %v12234_v41  ;;  %v4991_v57 = vadd.f32 %v4990_v24, %v4922_v32 }
 0x35a   :  { %v5048_v3 = vadd.f32 %v5047_v29, %v4991_v57 }
 0x35b   :  { %6278 = vmatmul.msk.f32.gmra.mxu3 %vm93_vm3, %v12234_v41 }
 0x35c   :  { %v5218_v43 = vpop.f32.mrf.mxu2 }
 0x35d   :  { %v5116_v35 = vpop.f32.mrf.mxu0  ;;  %v5169_v30 = vpop.f32.mrf.mxu1 }
 0x35e   :  { %6272 = vmatmul.msk.f32.gmra.mxu0 %vm67_vm1, %v12234_v41  ;;  %v5117_v0 = vadd.f32 %v5116_v35, %v11965_v42 }
 0x35f   :  { %v5343_v46 = vpop.f32.mrf.mxu3 }
 0x360   :  { %v5166_v51 = vadd.f32 %v5165_v20, %v5117_v0 }
 0x362   :  { %v5219_v11 = vadd.f32 %v5218_v43, %v5166_v51 }
 0x364   :  { %v5344_v50 = vadd.f32 %v5343_v46, %v5219_v11 }
 0x366   :  { %v5226_v26 = vpop.f32.mrf.mxu2 }
 0x367   :  { %v5120_v47 = vpop.f32.mrf.mxu0  ;;  %v5173_v8 = vpop.f32.mrf.mxu1 }
 0x368   :  { %v5121_v62 = vadd.f32 %v5120_v47, %v5036_v16 }
 0x369   :  { %v5347_v28 = vpop.f32.mrf.mxu3 }
 0x36a   :  { %v5170_v40 = vadd.f32 %v5169_v30, %v5121_v62 }
 0x36c   :  { %v5227_v17 = vadd.f32 %v5226_v26, %v5170_v40 }
 0x36e   :  { %v5348_v54 = vadd.f32 %v5347_v28, %v5227_v17 }
 0x370   :  { %v5234_v38 = vpop.f32.mrf.mxu2 }
 0x371   :  { %v5124_v36 = vpop.f32.mrf.mxu0  ;;  %v5177_v48 = vpop.f32.mrf.mxu1 }
 0x372   :  { %v5125_v56 = vadd.f32 %v5124_v36, %v5042_v59 }
 0x373   :  { %v5351_v9 = vpop.f32.mrf.mxu3 }
 0x374   :  { %v5174_v2 = vadd.f32 %v5173_v8, %v5125_v56 }
 0x376   :  { %v5235_v15 = vadd.f32 %v5234_v38, %v5174_v2 }
 0x378   :  { %v5352_v6 = vadd.f32 %v5351_v9, %v5235_v15 }
 0x37a   :  { %v5242_v41 = vpop.f32.mrf.mxu2  ;;  %v5463_v23 = vpop.f32.mrf.mxu1 }
 0x37b   :  { %v5128_v25 = vpop.f32.mrf.mxu0 }
 0x37c   :  { %v5129_v14 = vadd.f32 %v5128_v25, %v5048_v3 }
 0x37d   :  { %v5355_v53 = vpop.f32.mrf.mxu3 }
 0x37e   :  { %v5178_v1 = vadd.f32 %v5177_v48, %v5129_v14 }
 0x380   :  { %v5243_v24 = vadd.f32 %v5242_v41, %v5178_v1 }
 0x382   :  { %v5356_v29 = vadd.f32 %v5355_v53, %v5243_v24 }
 0x384   :  { %v5550_v33 = vpop.f32.mrf.mxu2 }
 0x385   :  { %v5409_v18 = vpop.f32.mrf.mxu0  ;;  %v5469_v37 = vpop.f32.mrf.mxu1 }
 0x386   :  { %v5410_v52 = vadd.f32 %v5409_v18, %v5344_v50 }
 0x387   :  { %v5599_v10 = vpop.f32.mrf.mxu3 }
 0x388   :  { %v5464_v58 = vadd.f32 %v5463_v23, %v5410_v52 }
 0x38a   :  { %v5551_v32 = vadd.f32 %v5550_v33, %v5464_v58 }
 0x38c   :  { %v5600_v46 = vadd.f32 %v5599_v10, %v5551_v32 }
 0x38e   :  { %v5554_v31 = vpop.f32.mrf.mxu2 }
 0x38f   :  { %v5414_v61 = vpop.f32.mrf.mxu0  ;;  %v5475_v42 = vpop.f32.mrf.mxu1 }
 0x390   :  { %v5415_v57 = vadd.f32 %v5414_v61, %v5348_v54 }
 0x391   :  { %v5603_v45 = vpop.f32.mrf.mxu3 }
 0x392   :  { %v5470_v51 = vadd.f32 %v5469_v37, %v5415_v57 }
 0x394   :  { %v5555_v47 = vadd.f32 %v5554_v31, %v5470_v51 }
 0x396   :  { %v5604_v36 = vadd.f32 %v5603_v45, %v5555_v47 }
 0x398   :  { %v5558_v27 = vpop.f32.mrf.mxu2 }
 0x399   :  { %v5419_v44 = vpop.f32.mrf.mxu0  ;;  %v5481_v5 = vpop.f32.mrf.mxu1 }
 0x39a   :  { %v5420_v49 = vadd.f32 %v5419_v44, %v5352_v6 }
 0x39b   :  { %v5607_v22 = vpop.f32.mrf.mxu3 }
 0x39c   :  { %v5476_v4 = vadd.f32 %v5475_v42, %v5420_v49 }
 0x39e   :  { %v5559_v43 = vadd.f32 %v5558_v27, %v5476_v4 }
 0x3a0   :  { %v5608_v11 = vadd.f32 %v5607_v22, %v5559_v43 }
 0x3a2   :  { %v5562_v34 = vpop.f32.mrf.mxu2 }
 0x3a3   :  { %v5424_v39 = vpop.f32.mrf.mxu0  ;;  %v5777_v19 = vpop.f32.mrf.mxu1 }
 0x3a4   :  { %v5425_v35 = vadd.f32 %v5424_v39, %v5356_v29 }
 0x3a5   :  { %v5611_v55 = vpop.f32.mrf.mxu3 }
 0x3a6   :  { %v5482_v30 = vadd.f32 %v5481_v5, %v5425_v35 }
 0x3a8   :  { %v5563_v62 = vadd.f32 %v5562_v34, %v5482_v30 }
 0x3aa   :  { %v5612_v9 = vadd.f32 %v5611_v55, %v5563_v62 }
 0x3ac   :  { %v5843_v7 = vpop.f32.mrf.mxu2 }
 0x3ad   :  { %v5652_v12 = vpop.f32.mrf.mxu0  ;;  %v5781_v13 = vpop.f32.mrf.mxu1 }
 0x3ae   :  { %v5653_v26 = vadd.f32 %v5652_v12, %v5600_v46 }
 0x3af   :  { %v5897_v16 = vpop.f32.mrf.mxu3 }
 0x3b0   :  { %v5778_v40 = vadd.f32 %v5777_v19, %v5653_v26 }
 0x3b2   :  { %v5844_v48 = vadd.f32 %v5843_v7, %v5778_v40 }
 0x3b4   :  { %v5898_v23 = vadd.f32 %v5897_v16, %v5844_v48 }
 0x3b6   :  { %v5848_v21 = vpop.f32.mrf.mxu2 }
 0x3b7   :  { %v5660_v60 = vpop.f32.mrf.mxu0  ;;  %v5785_v59 = vpop.f32.mrf.mxu1 }
 0x3b8   :  { %v5903_v63 = vpop.f32.mrf.mxu3  ;;  %v5661_v41 = vadd.f32 %v5660_v60, %v5604_v36 }
 0x3ba   :  { %v5782_v33 = vadd.f32 %v5781_v13, %v5661_v41 }
 0x3bc   :  { %v5849_v44 = vadd.f32 %v5848_v21, %v5782_v33 }
 0x3be   :  { %v5904_v39 = vadd.f32 %v5903_v63, %v5849_v44 }
 0x3c0   :  { %v5853_v20 = vpop.f32.mrf.mxu2 }
 0x3c1   :  { %v5668_v0 = vpop.f32.mrf.mxu0  ;;  %v5789_v28 = vpop.f32.mrf.mxu1 }
 0x3c2   :  { %v5909_v3 = vpop.f32.mrf.mxu3  ;;  %v5669_v50 = vadd.f32 %v5668_v0, %v5608_v11 }
 0x3c4   :  { %v5786_v8 = vadd.f32 %v5785_v59, %v5669_v50 }
 0x3c6   :  { %v5854_v25 = vadd.f32 %v5853_v20, %v5786_v8 }
 0x3c8   :  { %v5910_v18 = vadd.f32 %v5909_v3, %v5854_v25 }
 0x3ca   :  { %v5858_v17 = vpop.f32.mrf.mxu2 }
 0x3cb   :  { %v5676_v38 = vpop.f32.mrf.mxu0  ;;  %v6033_v10 = vpop.f32.mrf.mxu1 }
 0x3cc   :  { %v5915_v54 = vpop.f32.mrf.mxu3  ;;  %v5677_v53 = vadd.f32 %v5676_v38, %v5612_v9 }
 0x3ce   :  { %v5790_v37 = vadd.f32 %v5789_v28, %v5677_v53 }
 0x3d0   :  { %v5859_v45 = vadd.f32 %v5858_v17, %v5790_v37 }
 0x3d2   :  { %v5916_v55 = vadd.f32 %v5915_v54, %v5859_v45 }
 0x3d3   :  { %v5984_v61 = vpop.f32.mrf.mxu0  ;;  %v5992_v42 = vpop.f32.mrf.mxu2 }
 0x3d4   :  { %v5985_v31 = vadd.f32 %v5984_v61, %v5898_v23  ;;  %v5993_v27 = vadd.f32 %v5992_v42, %v5910_v18  ;;  %v6037_v12 = vpop.f32.mrf.mxu1 }
 0x3d6   :  { %v6034_v22 = vadd.f32 %v6033_v10, %v5985_v31  ;;  %v6041_v5 = vpop.f32.mrf.mxu3 }
 0x3d7   :  { %v6042_v34 = vadd.f32 %v6041_v5, %v5993_v27 }
 0x3d8   :  { %6049 = vst.msk [vmem:[#allocation2] sm:$0xff] %vm6048_vm4, %v6034_v22 }
 0x3d9   :  { %6051 = vst.msk [vmem:[#allocation2 + $0x10] sm:$0xff] %vm6048_vm4, %v6042_v34 }
 0x3db   :  { %v5988_v56 = vpop.f32.mrf.mxu0  ;;  %v5996_v7 = vpop.f32.mrf.mxu2 }
 0x3dc   :  { %v5989_v19 = vadd.f32 %v5988_v56, %v5904_v39  ;;  %v5997_v2 = vadd.f32 %v5996_v7, %v5916_v55 }
 0x3de   :  { %v6038_v16 = vadd.f32 %v6037_v12, %v5989_v19  ;;  %v6045_v15 = vpop.f32.mrf.mxu3 }
 0x3df   :  { %v6046_v14 = vadd.f32 %v6045_v15, %v5997_v2 }
 0x3e0   :  { %6050 = vst.msk [vmem:[#allocation2 + $0x8] sm:$0xff] %vm6048_vm4, %v6038_v16 }
 0x3e1   :  { %6052 = vst.msk [vmem:[#allocation2 + $0x18] sm:$0xff] %vm6048_vm4, %v6046_v14 }
 0x3e2   :  { %6065 = dma.vmem_to_hbm [thread:$0]  %s6058_s27, 512, %s6060_s30, [#allocation3], %s6349_s3, %s6349_s3, %s6350_s4  }
 0x3e3   :  { %6343 = dma.done.wait [#allocation3], 512  }
 0x3e4   :  { %6344 = vsyncadd [#allocation3], 4294966784 }
 0x3e5   :  { %6070 = vsyncpa [#allocation3], 1 }

</bundles_post_ra>
